<compile_context>
chip_gen: v6e
topology: v6e:2x2x1
jax: 0.10.0
libtpu: 0.0.40
codegen_flags: <defaults>
</compile_context>

<pallas_src>
import functools

import jax
import jax.numpy as jnp
from jax.experimental import pallas as pl
from jax.experimental.pallas import tpu as pltpu

EPS = 1e-5
HEAD_PAD = 128   # lane-dense padded width of the classifier head output


# ---------------------------------------------------------------------------
# Kernel 1: front-end  (input_transform1 ... bn2_2 + relu), gridless.
# Activations are <=128 channels wide, so they stay resident in VMEM.
# TODO(synk): for very large B*N (>~100K rows) this stage should be row-tiled
# with per-layer two-phase BN statistics sweeps as well.
# ---------------------------------------------------------------------------
def frontend_kernel(x_ref, wa_ref, w12_ref, wb_ref, w22_ref, bn_ref, y_ref):
    x = x_ref[...]                                     # (M, 3) f32
    wa = wa_ref[...]                                   # (3, 64) f32

    def bn_relu(y, g, b):
        # Two-pass training-mode BatchNorm1d over rows (biased var) + ReLU,
        # folded into one scale*y + shift.  Math kept in f32 (v5e has no bf16
        # VPU ALUs).
        m = y.shape[0]
        mean = jnp.sum(y, axis=0, keepdims=True) * (1.0 / m)
        d = y - mean
        var = jnp.sum(d * d, axis=0, keepdims=True) * (1.0 / m)
        scale = g * jax.lax.rsqrt(var + EPS)
        shift = b - mean * scale
        return jnp.maximum(y * scale + shift, 0.0)

    # layer 1: folded (input_transform1 . mlp1_1); K=3 -> 3 VPU FMAs, no MXU.
    # The mlp1_1 bias is dropped (cancels in BN).
    y = (x[:, 0:1] * wa[0:1, :]
         + x[:, 1:2] * wa[1:2, :]
         + x[:, 2:3] * wa[2:3, :])
    y = bn_relu(y, bn_ref[0:1, 0:64], bn_ref[1:2, 0:64])        # bn1_1 + relu

    # mlp1_2 (bias dropped) + bn1_2   -- bf16 MXU, f32 accumulate
    y = jnp.dot(y.astype(jnp.bfloat16), w12_ref[...],
                preferred_element_type=jnp.float32)
    y = bn_relu(y, bn_ref[2:3, 0:64], bn_ref[3:4, 0:64])

    # (feat_transform . mlp2_1) folded (bias dropped) + bn2_1
    y = jnp.dot(y.astype(jnp.bfloat16), wb_ref[...],
                preferred_element_type=jnp.float32)
    y = bn_relu(y, bn_ref[4:5, 0:64], bn_ref[5:6, 0:64])

    # mlp2_2 (bias dropped) + bn2_2
    y = jnp.dot(y.astype(jnp.bfloat16), w22_ref[...],
                preferred_element_type=jnp.float32)
    y = bn_relu(y, bn_ref[6:7, :], bn_ref[7:8, :])              # (M, 128)

    # store bf16: it is the matmul input of the next stage anyway and halves
    # the intermediate HBM traffic.
    y_ref[...] = y.astype(jnp.bfloat16)


# ---------------------------------------------------------------------------
# Kernel 2: row-tiled  mlp2_3 -> bn2_3 -> relu -> max-pool -> classifier head.
# grid = (B, N // TR): one row tile of one batch element per step.
# ---------------------------------------------------------------------------
def backend_kernel(B, N, y_ref, w23_ref, bn_ref, wh_ref, bh_ref, out_ref,
                   s_ref, zmax_ref, zmin_ref):
    b = pl.program_id(0)
    t = pl.program_id(1)
    nt = pl.num_programs(1)

    @pl.when(jnp.logical_and(b == 0, t == 0))
    def _():
        s_ref[...] = jnp.zeros_like(s_ref)
        zmax_ref[...] = jnp.full(zmax_ref.shape, -jnp.inf, zmax_ref.dtype)
        zmin_ref[...] = jnp.full(zmin_ref.shape, jnp.inf, zmin_ref.dtype)

    # mlp2_3 on this row tile (bf16 MXU, f32 accumulate).  Pre-BN bias b2_3
    # dropped (cancels in the batch mean).
    z = jnp.dot(y_ref[...], w23_ref[...],
                preferred_element_type=jnp.float32)             # (TR, 1024) f32

    # Fused epilogue: BN statistics + per-batch extrema, one traversal of z
    # while it is hot in vregs.  The (B*N, 1024) activation never exists.
    s_ref[0:1, :] = s_ref[0:1, :] + jnp.sum(z, axis=0, keepdims=True)
    s_ref[1:2, :] = s_ref[1:2, :] + jnp.sum(z * z, axis=0, keepdims=True)
    zmax_ref[pl.ds(b, 1), :] = jnp.maximum(zmax_ref[pl.ds(b, 1), :],
                                           jnp.max(z, axis=0, keepdims=True))
    zmin_ref[pl.ds(b, 1), :] = jnp.minimum(zmin_ref[pl.ds(b, 1), :],
                                           jnp.min(z, axis=0, keepdims=True))

    # Final grid step: finish BN, max-pool via the monotone-affine identity,
    # and run the collapsed classifier head.
    @pl.when(jnp.logical_and(b == B - 1, t == nt - 1))
    def _():
        inv_m = 1.0 / (B * N)
        mean = s_ref[0:1, :] * inv_m
        var = jnp.maximum(s_ref[1:2, :] * inv_m - mean * mean, 0.0)
        scale = bn_ref[0:1, :] * jax.lax.rsqrt(var + EPS)       # gamma*rsqrt
        shift = bn_ref[1:2, :] - mean * scale                   # beta - mean*scale
        # max_n relu(scale*z_n + shift) == relu(scale*extreme_n(z) + shift),
        # extreme = max for scale >= 0, min for scale < 0 (monotone map).
        zext = jnp.where(scale >= 0.0, zmax_ref[...], zmin_ref[...])  # (B,1024)
        gf = jnp.maximum(zext * scale + shift, 0.0)                   # (B,1024)
        out_ref[...] = (jnp.dot(gf.astype(jnp.bfloat16), wh_ref[...],
                                preferred_element_type=jnp.float32)
                        + bh_ref[...])


# ---------------------------------------------------------------------------
# Parameters (deterministic synthetic, shapes from cls_model.__init__).
# Linear weights stored pre-transposed as (in, out) so the model is x @ W.
# bn3_1 / bn3_2 exist in __init__ but are never used in forward -> omitted.
# ---------------------------------------------------------------------------
def make_params(key, num_classes=3):
    dims = dict(
        w_it1=(3, 3),
        w11=(3, 64), w12=(64, 64),
        w_ft=(64, 64),
        w21=(64, 64), w22=(64, 128), w23=(128, 1024),
        w31=(1024, 512), w32=(512, 256), w33=(256, num_classes),
    )
    bias_dims = dict(b11=64, b12=64, b21=64, b22=128, b23=1024,
                     b31=512, b32=256, b33=num_classes)
    bn_dims = dict(bn11=64, bn12=64, bn21=64, bn22=128, bn23=1024)

    params = {}
    keys = jax.random.split(key, len(dims) + len(bias_dims) + 2 * len(bn_dims))
    ki = 0
    for name, shp in dims.items():
        params[name] = 0.1 * jax.random.normal(keys[ki], shp, jnp.float32); ki += 1
    for name, c in bias_dims.items():
        params[name] = 0.05 * jax.random.normal(keys[ki], (1, c), jnp.float32); ki += 1
    for name, c in bn_dims.items():
        params["g_" + name] = 1.0 + 0.1 * jax.random.normal(keys[ki], (1, c), jnp.float32); ki += 1
        params["be_" + name] = 0.05 * jax.random.normal(keys[ki], (1, c), jnp.float32); ki += 1
    return params


def _fold_params(p):
    """Wrapper-side algebraic folding + packing of per-channel vectors."""
    nc = p["w33"].shape[1]
    wa = p["w_it1"] @ p["w11"]                                    # (3, 64)
    wb = p["w_ft"] @ p["w21"]                                     # (64, 64)
    wh = p["w31"] @ p["w32"] @ p["w33"]                           # (1024, nc)
    bh = (p["b31"] @ p["w32"] + p["b32"]) @ p["w33"] + p["b33"]   # (1, nc)

    # lane-dense head: zero-pad num_classes -> HEAD_PAD columns.
    wh_pad = jnp.zeros((1024, HEAD_PAD), jnp.float32).at[:, :nc].set(wh)
    bh_pad = jnp.zeros((1, HEAD_PAD), jnp.float32).at[:, :nc].set(bh)

    # pack all front-end per-channel BN params into one (8, 128) f32 slab.
    bn_front = jnp.zeros((8, 128), jnp.float32)
    bn_front = bn_front.at[0, :64].set(p["g_bn11"][0])
    bn_front = bn_front.at[1, :64].set(p["be_bn11"][0])
    bn_front = bn_front.at[2, :64].set(p["g_bn12"][0])
    bn_front = bn_front.at[3, :64].set(p["be_bn12"][0])
    bn_front = bn_front.at[4, :64].set(p["g_bn21"][0])
    bn_front = bn_front.at[5, :64].set(p["be_bn21"][0])
    bn_front = bn_front.at[6, :].set(p["g_bn22"][0])
    bn_front = bn_front.at[7, :].set(p["be_bn22"][0])
    bn_back = jnp.concatenate([p["g_bn23"], p["be_bn23"]], axis=0)  # (2, 1024)

    front = (wa,                                   # f32: used as VPU FMAs
             p["w12"].astype(jnp.bfloat16),
             wb.astype(jnp.bfloat16),
             p["w22"].astype(jnp.bfloat16),
             bn_front)
    back = (p["w23"].astype(jnp.bfloat16),
            bn_back,
            wh_pad.astype(jnp.bfloat16),
            bh_pad)
    return front, back


def _pick_tile_rows(n):
    for tr in (512, 256, 128, 64, 32, 16, 8):
        if n % tr == 0:
            return tr
    return n


@functools.partial(jax.jit, static_argnames=("num_classes",))
def cls_model_forward(points, params, num_classes=3):
    """points: (B, N, 3) float32 -> scores: (B, num_classes) float32."""
    B, N, _ = points.shape
    assert N % 8 == 0, "N must be a multiple of 8 for the row-tiled back-end"
    assert num_classes <= HEAD_PAD
    M = B * N
    x = points.reshape(M, 3)
    front, back = _fold_params(params)

    vmem = pl.BlockSpec(memory_space=pltpu.MemorySpace.VMEM)

    # --- call 1: gridless front-end (activations <= 128 channels wide).
    y22 = pl.pallas_call(
        frontend_kernel,
        out_shape=jax.ShapeDtypeStruct((M, 128), jnp.bfloat16),
        in_specs=[vmem] * 6,
        out_specs=vmem,
    )(x, *front)

    # --- call 2: row-tiled mlp2_3 / bn2_3 / max-pool / head.
    tr = _pick_tile_rows(N)
    nt = N // tr
    out = pl.pallas_call(
        functools.partial(backend_kernel, B, N),
        out_shape=jax.ShapeDtypeStruct((B, HEAD_PAD), jnp.float32),
        grid_spec=pltpu.PrefetchScalarGridSpec(
            num_scalar_prefetch=0,
            grid=(B, nt),
            in_specs=[
                pl.BlockSpec((tr, 128), lambda b, t: (b * nt + t, 0)),   # y22 tile
                pl.BlockSpec((128, 1024), lambda b, t: (0, 0)),          # w23
                pl.BlockSpec((2, 1024), lambda b, t: (0, 0)),            # bn2_3 g/beta
                pl.BlockSpec((1024, HEAD_PAD), lambda b, t: (0, 0)),     # wh
                pl.BlockSpec((1, HEAD_PAD), lambda b, t: (0, 0)),        # bh
            ],
            out_specs=pl.BlockSpec((B, HEAD_PAD), lambda b, t: (0, 0)),
            scratch_shapes=[
                pltpu.VMEM((2, 1024), jnp.float32),    # BN sum / sum-of-squares
                pltpu.VMEM((B, 1024), jnp.float32),    # per-batch running max(z)
                pltpu.VMEM((B, 1024), jnp.float32),    # per-batch running min(z)
            ]),
        compiler_params=pltpu.CompilerParams(
            # Both axes feed cross-step scratch accumulation -> sequential.
            # TODO(synk): v7x 2-TC sharding needs a per-core partial-stats /
            # partial-extrema reduction; kept single-core here.
            dimension_semantics=("arbitrary", "arbitrary")),
    )(y22, *back)
    return out[:, :num_classes]


# ---------------------------------------------------------------------------
# References.
# ---------------------------------------------------------------------------
def reference_faithful(points, params):
    """Direct f32 translation of the PyTorch forward (training-mode BN,
    unfolded linears, all biases, normalize-then-relu-then-max, 3-layer head).
    Used as a loose-tolerance structural check of the folds / cancellations."""
    p = params

    def bn_relu(y, g, b):   # y: (B, N, C); BatchNorm1d over (B, N)
        mean = jnp.mean(y, axis=(0, 1), keepdims=True)
        var = jnp.mean(jnp.square(y - mean), axis=(0, 1), keepdims=True)
        return jnp.maximum((y - mean) * jax.lax.rsqrt(var + EPS) * g + b, 0.0)

    y = points @ p["w_it1"]
    y = y @ p["w11"] + p["b11"]
    y = bn_relu(y, p["g_bn11"], p["be_bn11"])
    y = y @ p["w12"] + p["b12"]
    y = bn_relu(y, p["g_bn12"], p["be_bn12"])
    y = y @ p["w_ft"]
    y = y @ p["w21"] + p["b21"]
    y = bn_relu(y, p["g_bn21"], p["be_bn21"])
    y = y @ p["w22"] + p["b22"]
    y = bn_relu(y, p["g_bn22"], p["be_bn22"])
    y = y @ p["w23"] + p["b23"]
    y = bn_relu(y, p["g_bn23"], p["be_bn23"])              # (B, N, 1024)
    gf = jnp.max(y, axis=1)                                # (B, 1024)
    s = gf @ p["w31"] + p["b31"]
    s = s @ p["w32"] + p["b32"]
    s = s @ p["w33"] + p["b33"]
    return s


def reference_folded(points, params):
    """Same algebraic folds / bf16 matmul-input casts as the kernels
    (tight-tolerance numerical reference)."""
    p = params
    B, N, _ = points.shape
    x = points.reshape(B * N, 3).astype(jnp.float32)

    def bn_relu(y, g, b):
        mean = jnp.mean(y, axis=0, keepdims=True)
        var = jnp.mean(jnp.square(y - mean), axis=0, keepdims=True)
        return jnp.maximum((y - mean) * jax.lax.rsqrt(var + EPS) * g + b, 0.0)

    def mm(a, w):
        return jnp.dot(a.astype(jnp.bfloat16), w.astype(jnp.bfloat16),
                       preferred_element_type=jnp.float32)

    wa = p["w_it1"] @ p["w11"]
    wb = p["w_ft"] @ p["w21"]
    wh = p["w31"] @ p["w32"] @ p["w33"]
    bh = (p["b31"] @ p["w32"] + p["b32"]) @ p["w33"] + p["b33"]

    y = bn_relu(x @ wa, p["g_bn11"], p["be_bn11"])
    y = bn_relu(mm(y, p["w12"]), p["g_bn12"], p["be_bn12"])
    y = bn_relu(mm(y, wb), p["g_bn21"], p["be_bn21"])
    y = bn_relu(mm(y, p["w22"]), p["g_bn22"], p["be_bn22"])
    y = y.astype(jnp.bfloat16)                              # matches bf16 y22
    y = bn_relu(jnp.dot(y, p["w23"].astype(jnp.bfloat16),
                        preferred_element_type=jnp.float32),
                p["g_bn23"], p["be_bn23"])
    gf = jnp.max(y.reshape(B, N, -1), axis=1)
    return jnp.dot(gf.astype(jnp.bfloat16), wh.astype(jnp.bfloat16),
                   preferred_element_type=jnp.float32) + bh


if __name__ == "__main__":
    B, N, num_classes = 2, 64, 3
    key = jax.random.PRNGKey(0)
    k_pts, k_par = jax.random.split(key)
    points = jax.random.normal(k_pts, (B, N, 3), jnp.float32)
    params = make_params(k_par, num_classes=num_classes)

    scores = cls_model_forward(points, params, num_classes=num_classes)
    scores = jax.block_until_ready(scores)
    assert scores.shape == (B, num_classes)

    # Tight check against a reference with identical folds / bf16 casts.
    ref_tight = reference_folded(points, params)
    assert jnp.allclose(scores, ref_tight, atol=5e-3, rtol=5e-3), (scores, ref_tight)

    # Loose check against the strict unfolded f32 PyTorch-equivalent forward;
    # tolerance reflects the intentional bf16 matmul-input precision.
    ref_full = reference_faithful(points, params)
    assert jnp.allclose(scores, ref_full, atol=0.5, rtol=0.15), (scores, ref_full)

    print("KERNEL_OK")
</pallas_src>

<mosaic_0001>
module attributes {stable_mosaic.version = 11 : i64} {
  func.func @frontend_kernel(%arg0: memref<128x3xf32, #tpu.memory_space<vmem>>, %arg1: memref<3x64xf32, #tpu.memory_space<vmem>>, %arg2: memref<64x64xbf16, #tpu.memory_space<vmem>>, %arg3: memref<64x64xbf16, #tpu.memory_space<vmem>>, %arg4: memref<64x128xbf16, #tpu.memory_space<vmem>>, %arg5: memref<8x128xf32, #tpu.memory_space<vmem>>, %arg6: memref<128x128xbf16, #tpu.memory_space<vmem>>) attributes {dimension_semantics = [], scalar_prefetch = 0 : i64, scratch_operands = 0 : i64, tpu.core_type = #tpu.core_type<tc>} {
    %c0 = arith.constant 0 : index
    %c0_0 = arith.constant 0 : index
    %0 = vector.load %arg0[%c0, %c0_0] : memref<128x3xf32, #tpu.memory_space<vmem>>, vector<128x3xf32>
    %c0_1 = arith.constant 0 : index
    %c0_2 = arith.constant 0 : index
    %1 = vector.load %arg1[%c0_1, %c0_2] : memref<3x64xf32, #tpu.memory_space<vmem>>, vector<3x64xf32>
    %2 = vector.extract_strided_slice %0 {offsets = [0, 0], sizes = [128, 1], strides = [1, 1]} : vector<128x3xf32> to vector<128x1xf32>
    %3 = vector.extract_strided_slice %1 {offsets = [0, 0], sizes = [1, 64], strides = [1, 1]} : vector<3x64xf32> to vector<1x64xf32>
    %4 = vector.broadcast %2 : vector<128x1xf32> to vector<128x64xf32>
    %5 = vector.broadcast %3 : vector<1x64xf32> to vector<128x64xf32>
    %6 = arith.mulf %4, %5 : vector<128x64xf32>
    %7 = vector.extract_strided_slice %0 {offsets = [0, 1], sizes = [128, 1], strides = [1, 1]} : vector<128x3xf32> to vector<128x1xf32>
    %8 = vector.extract_strided_slice %1 {offsets = [1, 0], sizes = [1, 64], strides = [1, 1]} : vector<3x64xf32> to vector<1x64xf32>
    %9 = vector.broadcast %7 : vector<128x1xf32> to vector<128x64xf32>
    %10 = vector.broadcast %8 : vector<1x64xf32> to vector<128x64xf32>
    %11 = arith.mulf %9, %10 : vector<128x64xf32>
    %12 = arith.addf %6, %11 : vector<128x64xf32>
    %13 = vector.extract_strided_slice %0 {offsets = [0, 2], sizes = [128, 1], strides = [1, 1]} : vector<128x3xf32> to vector<128x1xf32>
    %14 = vector.extract_strided_slice %1 {offsets = [2, 0], sizes = [1, 64], strides = [1, 1]} : vector<3x64xf32> to vector<1x64xf32>
    %15 = vector.broadcast %13 : vector<128x1xf32> to vector<128x64xf32>
    %16 = vector.broadcast %14 : vector<1x64xf32> to vector<128x64xf32>
    %17 = arith.mulf %15, %16 : vector<128x64xf32>
    %18 = arith.addf %12, %17 : vector<128x64xf32>
    %c0_3 = arith.constant 0 : index
    %c0_4 = arith.constant 0 : index
    %19 = vector.load %arg5[%c0_3, %c0_4] : memref<8x128xf32, #tpu.memory_space<vmem>>, vector<1x64xf32>
    %c1 = arith.constant 1 : index
    %c0_5 = arith.constant 0 : index
    %20 = vector.load %arg5[%c1, %c0_5] : memref<8x128xf32, #tpu.memory_space<vmem>>, vector<1x64xf32>
    %cst = arith.constant dense<0.000000e+00> : vector<64xf32>
    %21 = vector.multi_reduction <add>, %18, %cst [0] : vector<128x64xf32> to vector<64xf32>
    %22 = vector.shape_cast %21 : vector<64xf32> to vector<1x64xf32>
    %cst_6 = arith.constant 7.812500e-03 : f32
    %23 = vector.broadcast %cst_6 : f32 to vector<1x64xf32>
    %24 = arith.mulf %22, %23 : vector<1x64xf32>
    %25 = vector.broadcast %24 : vector<1x64xf32> to vector<128x64xf32>
    %26 = arith.subf %18, %25 : vector<128x64xf32>
    %27 = arith.mulf %26, %26 : vector<128x64xf32>
    %cst_7 = arith.constant dense<0.000000e+00> : vector<64xf32>
    %28 = vector.multi_reduction <add>, %27, %cst_7 [0] : vector<128x64xf32> to vector<64xf32>
    %29 = vector.shape_cast %28 : vector<64xf32> to vector<1x64xf32>
    %cst_8 = arith.constant 7.812500e-03 : f32
    %30 = vector.broadcast %cst_8 : f32 to vector<1x64xf32>
    %31 = arith.mulf %29, %30 : vector<1x64xf32>
    %cst_9 = arith.constant 9.99999974E-6 : f32
    %32 = vector.broadcast %cst_9 : f32 to vector<1x64xf32>
    %33 = arith.addf %31, %32 : vector<1x64xf32>
    %34 = math.rsqrt %33 : vector<1x64xf32>
    %35 = arith.mulf %19, %34 : vector<1x64xf32>
    %36 = arith.mulf %24, %35 : vector<1x64xf32>
    %37 = arith.subf %20, %36 : vector<1x64xf32>
    %38 = vector.broadcast %35 : vector<1x64xf32> to vector<128x64xf32>
    %39 = arith.mulf %18, %38 : vector<128x64xf32>
    %40 = vector.broadcast %37 : vector<1x64xf32> to vector<128x64xf32>
    %41 = arith.addf %39, %40 : vector<128x64xf32>
    %cst_10 = arith.constant 0.000000e+00 : f32
    %42 = vector.broadcast %cst_10 : f32 to vector<128x64xf32>
    %43 = arith.maximumf %41, %42 : vector<128x64xf32>
    %44 = arith.truncf %43 : vector<128x64xf32> to vector<128x64xbf16>
    %c0_11 = arith.constant 0 : index
    %c0_12 = arith.constant 0 : index
    %45 = vector.load %arg2[%c0_11, %c0_12] : memref<64x64xbf16, #tpu.memory_space<vmem>>, vector<64x64xbf16>
    %cst_13 = arith.constant dense<0.000000e+00> : vector<128x64xf32>
    %46 = tpu.matmul %44, %45, %cst_13 {dimension_numbers = #tpu.dot_dimension_numbers<[1], [0], [0], [1], [0, 0, 1, 1], [], []>} : vector<128x64xbf16>, vector<64x64xbf16>, vector<128x64xf32> -> vector<128x64xf32>
    %c2 = arith.constant 2 : index
    %c0_14 = arith.constant 0 : index
    %47 = vector.load %arg5[%c2, %c0_14] : memref<8x128xf32, #tpu.memory_space<vmem>>, vector<1x64xf32>
    %c3 = arith.constant 3 : index
    %c0_15 = arith.constant 0 : index
    %48 = vector.load %arg5[%c3, %c0_15] : memref<8x128xf32, #tpu.memory_space<vmem>>, vector<1x64xf32>
    %cst_16 = arith.constant dense<0.000000e+00> : vector<64xf32>
    %49 = vector.multi_reduction <add>, %46, %cst_16 [0] : vector<128x64xf32> to vector<64xf32>
    %50 = vector.shape_cast %49 : vector<64xf32> to vector<1x64xf32>
    %cst_17 = arith.constant 7.812500e-03 : f32
    %51 = vector.broadcast %cst_17 : f32 to vector<1x64xf32>
    %52 = arith.mulf %50, %51 : vector<1x64xf32>
    %53 = vector.broadcast %52 : vector<1x64xf32> to vector<128x64xf32>
    %54 = arith.subf %46, %53 : vector<128x64xf32>
    %55 = arith.mulf %54, %54 : vector<128x64xf32>
    %cst_18 = arith.constant dense<0.000000e+00> : vector<64xf32>
    %56 = vector.multi_reduction <add>, %55, %cst_18 [0] : vector<128x64xf32> to vector<64xf32>
    %57 = vector.shape_cast %56 : vector<64xf32> to vector<1x64xf32>
    %cst_19 = arith.constant 7.812500e-03 : f32
    %58 = vector.broadcast %cst_19 : f32 to vector<1x64xf32>
    %59 = arith.mulf %57, %58 : vector<1x64xf32>
    %cst_20 = arith.constant 9.99999974E-6 : f32
    %60 = vector.broadcast %cst_20 : f32 to vector<1x64xf32>
    %61 = arith.addf %59, %60 : vector<1x64xf32>
    %62 = math.rsqrt %61 : vector<1x64xf32>
    %63 = arith.mulf %47, %62 : vector<1x64xf32>
    %64 = arith.mulf %52, %63 : vector<1x64xf32>
    %65 = arith.subf %48, %64 : vector<1x64xf32>
    %66 = vector.broadcast %63 : vector<1x64xf32> to vector<128x64xf32>
    %67 = arith.mulf %46, %66 : vector<128x64xf32>
    %68 = vector.broadcast %65 : vector<1x64xf32> to vector<128x64xf32>
    %69 = arith.addf %67, %68 : vector<128x64xf32>
    %cst_21 = arith.constant 0.000000e+00 : f32
    %70 = vector.broadcast %cst_21 : f32 to vector<128x64xf32>
    %71 = arith.maximumf %69, %70 : vector<128x64xf32>
    %72 = arith.truncf %71 : vector<128x64xf32> to vector<128x64xbf16>
    %c0_22 = arith.constant 0 : index
    %c0_23 = arith.constant 0 : index
    %73 = vector.load %arg3[%c0_22, %c0_23] : memref<64x64xbf16, #tpu.memory_space<vmem>>, vector<64x64xbf16>
    %cst_24 = arith.constant dense<0.000000e+00> : vector<128x64xf32>
    %74 = tpu.matmul %72, %73, %cst_24 {dimension_numbers = #tpu.dot_dimension_numbers<[1], [0], [0], [1], [0, 0, 1, 1], [], []>} : vector<128x64xbf16>, vector<64x64xbf16>, vector<128x64xf32> -> vector<128x64xf32>
    %c4 = arith.constant 4 : index
    %c0_25 = arith.constant 0 : index
    %75 = vector.load %arg5[%c4, %c0_25] : memref<8x128xf32, #tpu.memory_space<vmem>>, vector<1x64xf32>
    %c5 = arith.constant 5 : index
    %c0_26 = arith.constant 0 : index
    %76 = vector.load %arg5[%c5, %c0_26] : memref<8x128xf32, #tpu.memory_space<vmem>>, vector<1x64xf32>
    %cst_27 = arith.constant dense<0.000000e+00> : vector<64xf32>
    %77 = vector.multi_reduction <add>, %74, %cst_27 [0] : vector<128x64xf32> to vector<64xf32>
    %78 = vector.shape_cast %77 : vector<64xf32> to vector<1x64xf32>
    %cst_28 = arith.constant 7.812500e-03 : f32
    %79 = vector.broadcast %cst_28 : f32 to vector<1x64xf32>
    %80 = arith.mulf %78, %79 : vector<1x64xf32>
    %81 = vector.broadcast %80 : vector<1x64xf32> to vector<128x64xf32>
    %82 = arith.subf %74, %81 : vector<128x64xf32>
    %83 = arith.mulf %82, %82 : vector<128x64xf32>
    %cst_29 = arith.constant dense<0.000000e+00> : vector<64xf32>
    %84 = vector.multi_reduction <add>, %83, %cst_29 [0] : vector<128x64xf32> to vector<64xf32>
    %85 = vector.shape_cast %84 : vector<64xf32> to vector<1x64xf32>
    %cst_30 = arith.constant 7.812500e-03 : f32
    %86 = vector.broadcast %cst_30 : f32 to vector<1x64xf32>
    %87 = arith.mulf %85, %86 : vector<1x64xf32>
    %cst_31 = arith.constant 9.99999974E-6 : f32
    %88 = vector.broadcast %cst_31 : f32 to vector<1x64xf32>
    %89 = arith.addf %87, %88 : vector<1x64xf32>
    %90 = math.rsqrt %89 : vector<1x64xf32>
    %91 = arith.mulf %75, %90 : vector<1x64xf32>
    %92 = arith.mulf %80, %91 : vector<1x64xf32>
    %93 = arith.subf %76, %92 : vector<1x64xf32>
    %94 = vector.broadcast %91 : vector<1x64xf32> to vector<128x64xf32>
    %95 = arith.mulf %74, %94 : vector<128x64xf32>
    %96 = vector.broadcast %93 : vector<1x64xf32> to vector<128x64xf32>
    %97 = arith.addf %95, %96 : vector<128x64xf32>
    %cst_32 = arith.constant 0.000000e+00 : f32
    %98 = vector.broadcast %cst_32 : f32 to vector<128x64xf32>
    %99 = arith.maximumf %97, %98 : vector<128x64xf32>
    %100 = arith.truncf %99 : vector<128x64xf32> to vector<128x64xbf16>
    %c0_33 = arith.constant 0 : index
    %c0_34 = arith.constant 0 : index
    %101 = vector.load %arg4[%c0_33, %c0_34] : memref<64x128xbf16, #tpu.memory_space<vmem>>, vector<64x128xbf16>
    %cst_35 = arith.constant dense<0.000000e+00> : vector<128x128xf32>
    %102 = tpu.matmul %100, %101, %cst_35 {dimension_numbers = #tpu.dot_dimension_numbers<[1], [0], [0], [1], [0, 0, 1, 1], [], []>} : vector<128x64xbf16>, vector<64x128xbf16>, vector<128x128xf32> -> vector<128x128xf32>
    %c6 = arith.constant 6 : index
    %c0_36 = arith.constant 0 : index
    %103 = vector.load %arg5[%c6, %c0_36] : memref<8x128xf32, #tpu.memory_space<vmem>>, vector<1x128xf32>
    %c7 = arith.constant 7 : index
    %c0_37 = arith.constant 0 : index
    %104 = vector.load %arg5[%c7, %c0_37] : memref<8x128xf32, #tpu.memory_space<vmem>>, vector<1x128xf32>
    %cst_38 = arith.constant dense<0.000000e+00> : vector<128xf32>
    %105 = vector.multi_reduction <add>, %102, %cst_38 [0] : vector<128x128xf32> to vector<128xf32>
    %106 = vector.shape_cast %105 : vector<128xf32> to vector<1x128xf32>
    %cst_39 = arith.constant 7.812500e-03 : f32
    %107 = vector.broadcast %cst_39 : f32 to vector<1x128xf32>
    %108 = arith.mulf %106, %107 : vector<1x128xf32>
    %109 = vector.broadcast %108 : vector<1x128xf32> to vector<128x128xf32>
    %110 = arith.subf %102, %109 : vector<128x128xf32>
    %111 = arith.mulf %110, %110 : vector<128x128xf32>
    %cst_40 = arith.constant dense<0.000000e+00> : vector<128xf32>
    %112 = vector.multi_reduction <add>, %111, %cst_40 [0] : vector<128x128xf32> to vector<128xf32>
    %113 = vector.shape_cast %112 : vector<128xf32> to vector<1x128xf32>
    %cst_41 = arith.constant 7.812500e-03 : f32
    %114 = vector.broadcast %cst_41 : f32 to vector<1x128xf32>
    %115 = arith.mulf %113, %114 : vector<1x128xf32>
    %cst_42 = arith.constant 9.99999974E-6 : f32
    %116 = vector.broadcast %cst_42 : f32 to vector<1x128xf32>
    %117 = arith.addf %115, %116 : vector<1x128xf32>
    %118 = math.rsqrt %117 : vector<1x128xf32>
    %119 = arith.mulf %103, %118 : vector<1x128xf32>
    %120 = arith.mulf %108, %119 : vector<1x128xf32>
    %121 = arith.subf %104, %120 : vector<1x128xf32>
    %122 = vector.broadcast %119 : vector<1x128xf32> to vector<128x128xf32>
    %123 = arith.mulf %102, %122 : vector<128x128xf32>
    %124 = vector.broadcast %121 : vector<1x128xf32> to vector<128x128xf32>
    %125 = arith.addf %123, %124 : vector<128x128xf32>
    %cst_43 = arith.constant 0.000000e+00 : f32
    %126 = vector.broadcast %cst_43 : f32 to vector<128x128xf32>
    %127 = arith.maximumf %125, %126 : vector<128x128xf32>
    %128 = arith.truncf %127 : vector<128x128xf32> to vector<128x128xbf16>
    %c0_44 = arith.constant 0 : index
    %c0_45 = arith.constant 0 : index
    %129 = vector.load %arg6[%c0_44, %c0_45] : memref<128x128xbf16, #tpu.memory_space<vmem>>, vector<128x128xbf16>
    tpu.vector_store %arg6[%c0_44, %c0_45], %128 {strides = array<i32>} : memref<128x128xbf16, #tpu.memory_space<vmem>>, vector<128x128xbf16>,
    return
  }
}

module attributes {stable_mosaic.version = 11 : i64} {
  func.func @backend_kernel(%arg0: i32, %arg1: i32, %arg2: memref<64x128xbf16, #tpu.memory_space<vmem>>, %arg3: memref<128x1024xbf16, #tpu.memory_space<vmem>>, %arg4: memref<2x1024xf32, #tpu.memory_space<vmem>>, %arg5: memref<1024x128xbf16, #tpu.memory_space<vmem>>, %arg6: memref<1x128xf32, #tpu.memory_space<vmem>>, %arg7: memref<2x128xf32, #tpu.memory_space<vmem>>, %arg8: memref<2x1024xf32, #tpu.memory_space<vmem>>, %arg9: memref<2x1024xf32, #tpu.memory_space<vmem>>, %arg10: memref<2x1024xf32, #tpu.memory_space<vmem>>) attributes {dimension_semantics = [#tpu.dimension_semantics<arbitrary>, #tpu.dimension_semantics<arbitrary>], iteration_bounds = array<i64: 2, 1>, scalar_prefetch = 0 : i64, scratch_operands = 3 : i64, tpu.core_type = #tpu.core_type<tc>, window_params = [{transform_indices = @transform_0, window_bounds = array<i64: 64, 128>}, {pipeline_mode = #tpu.pipeline_mode<synchronous>, transform_indices = @transform_1, window_bounds = array<i64: 128, 1024>}, {pipeline_mode = #tpu.pipeline_mode<synchronous>, transform_indices = @transform_2, window_bounds = array<i64: 2, 1024>}, {pipeline_mode = #tpu.pipeline_mode<synchronous>, transform_indices = @transform_3, window_bounds = array<i64: 1024, 128>}, {pipeline_mode = #tpu.pipeline_mode<synchronous>, transform_indices = @transform_4, window_bounds = array<i64: 1, 128>}, {pipeline_mode = #tpu.pipeline_mode<synchronous>, transform_indices = @transform_5, window_bounds = array<i64: 2, 128>}]} {
    %c0_i32 = arith.constant 0 : i32
    %0 = arith.cmpi eq, %arg0, %c0_i32 : i32
    %c0_i32_0 = arith.constant 0 : i32
    %1 = arith.cmpi eq, %arg1, %c0_i32_0 : i32
    %2 = arith.andi %0, %1 : i1
    %3 = arith.extui %2 : i1 to i32
    %c0_i32_1 = arith.constant 0 : i32
    %4 = arith.cmpi ne, %3, %c0_i32_1 : i32
    scf.if %4 {
      %cst_22 = arith.constant 0.000000e+00 : f32
      %38 = vector.broadcast %cst_22 : f32 to vector<2x1024xf32>
      %c0_23 = arith.constant 0 : index
      %c0_24 = arith.constant 0 : index
      %39 = vector.load %arg8[%c0_23, %c0_24] : memref<2x1024xf32, #tpu.memory_space<vmem>>, vector<2x1024xf32>
      tpu.vector_store %arg8[%c0_23, %c0_24], %38 {strides = array<i32>} : memref<2x1024xf32, #tpu.memory_space<vmem>>, vector<2x1024xf32>,
      %cst_25 = arith.constant 0xFF800000 : f32
      %40 = vector.broadcast %cst_25 : f32 to vector<2x1024xf32>
      %c0_26 = arith.constant 0 : index
      %c0_27 = arith.constant 0 : index
      %41 = vector.load %arg9[%c0_26, %c0_27] : memref<2x1024xf32, #tpu.memory_space<vmem>>, vector<2x1024xf32>
      tpu.vector_store %arg9[%c0_26, %c0_27], %40 {strides = array<i32>} : memref<2x1024xf32, #tpu.memory_space<vmem>>, vector<2x1024xf32>,
      %cst_28 = arith.constant 0x7F800000 : f32
      %42 = vector.broadcast %cst_28 : f32 to vector<2x1024xf32>
      %c0_29 = arith.constant 0 : index
      %c0_30 = arith.constant 0 : index
      %43 = vector.load %arg10[%c0_29, %c0_30] : memref<2x1024xf32, #tpu.memory_space<vmem>>, vector<2x1024xf32>
      tpu.vector_store %arg10[%c0_29, %c0_30], %42 {strides = array<i32>} : memref<2x1024xf32, #tpu.memory_space<vmem>>, vector<2x1024xf32>,
    } else {
    }
    %c0 = arith.constant 0 : index
    %c0_2 = arith.constant 0 : index
    %5 = vector.load %arg2[%c0, %c0_2] : memref<64x128xbf16, #tpu.memory_space<vmem>>, vector<64x128xbf16>
    %c0_3 = arith.constant 0 : index
    %c0_4 = arith.constant 0 : index
    %6 = vector.load %arg3[%c0_3, %c0_4] : memref<128x1024xbf16, #tpu.memory_space<vmem>>, vector<128x1024xbf16>
    %cst = arith.constant dense<0.000000e+00> : vector<64x1024xf32>
    %7 = tpu.matmul %5, %6, %cst {dimension_numbers = #tpu.dot_dimension_numbers<[1], [0], [0], [1], [0, 0, 1, 1], [], []>} : vector<64x128xbf16>, vector<128x1024xbf16>, vector<64x1024xf32> -> vector<64x1024xf32>
    %c0_5 = arith.constant 0 : index
    %c0_6 = arith.constant 0 : index
    %8 = vector.load %arg8[%c0_5, %c0_6] : memref<2x1024xf32, #tpu.memory_space<vmem>>, vector<1x1024xf32>
    %cst_7 = arith.constant dense<0.000000e+00> : vector<1024xf32>
    %9 = vector.multi_reduction <add>, %7, %cst_7 [0] : vector<64x1024xf32> to vector<1024xf32>
    %10 = vector.shape_cast %9 : vector<1024xf32> to vector<1x1024xf32>
    %11 = arith.addf %8, %10 : vector<1x1024xf32>
    %c0_8 = arith.constant 0 : index
    %c0_9 = arith.constant 0 : index
    %12 = vector.load %arg8[%c0_8, %c0_9] : memref<2x1024xf32, #tpu.memory_space<vmem>>, vector<1x1024xf32>
    tpu.vector_store %arg8[%c0_8, %c0_9], %11 {strides = array<i32>} : memref<2x1024xf32, #tpu.memory_space<vmem>>, vector<1x1024xf32>,
    %c1 = arith.constant 1 : index
    %c0_10 = arith.constant 0 : index
    %13 = vector.load %arg8[%c1, %c0_10] : memref<2x1024xf32, #tpu.memory_space<vmem>>, vector<1x1024xf32>
    %14 = arith.mulf %7, %7 : vector<64x1024xf32>
    %cst_11 = arith.constant dense<0.000000e+00> : vector<1024xf32>
    %15 = vector.multi_reduction <add>, %14, %cst_11 [0] : vector<64x1024xf32> to vector<1024xf32>
    %16 = vector.shape_cast %15 : vector<1024xf32> to vector<1x1024xf32>
    %17 = arith.addf %13, %16 : vector<1x1024xf32>
    %c1_12 = arith.constant 1 : index
    %c0_13 = arith.constant 0 : index
    %18 = vector.load %arg8[%c1_12, %c0_13] : memref<2x1024xf32, #tpu.memory_space<vmem>>, vector<1x1024xf32>
    tpu.vector_store %arg8[%c1_12, %c0_13], %17 {strides = array<i32>} : memref<2x1024xf32, #tpu.memory_space<vmem>>, vector<1x1024xf32>,
    %19 = arith.index_cast %arg0 : i32 to index
    %c0_14 = arith.constant 0 : index
    %20 = vector.load %arg9[%19, %c0_14] : memref<2x1024xf32, #tpu.memory_space<vmem>>, vector<1x1024xf32>
    %cst_15 = arith.constant dense<0xFF800000> : vector<1024xf32>
    %21 = vector.multi_reduction <maximumf>, %7, %cst_15 [0] : vector<64x1024xf32> to vector<1024xf32>
    %22 = vector.shape_cast %21 : vector<1024xf32> to vector<1x1024xf32>
    %23 = arith.maximumf %20, %22 : vector<1x1024xf32>
    %24 = arith.index_cast %arg0 : i32 to index
    %c0_16 = arith.constant 0 : index
    %25 = vector.load %arg9[%24, %c0_16] : memref<2x1024xf32, #tpu.memory_space<vmem>>, vector<1x1024xf32>
    tpu.vector_store %arg9[%24, %c0_16], %23 {strides = array<i32>} : memref<2x1024xf32, #tpu.memory_space<vmem>>, vector<1x1024xf32>,
    %26 = arith.index_cast %arg0 : i32 to index
    %c0_17 = arith.constant 0 : index
    %27 = vector.load %arg10[%26, %c0_17] : memref<2x1024xf32, #tpu.memory_space<vmem>>, vector<1x1024xf32>
    %cst_18 = arith.constant dense<0x7F800000> : vector<1024xf32>
    %28 = vector.multi_reduction <minimumf>, %7, %cst_18 [0] : vector<64x1024xf32> to vector<1024xf32>
    %29 = vector.shape_cast %28 : vector<1024xf32> to vector<1x1024xf32>
    %30 = arith.minimumf %27, %29 : vector<1x1024xf32>
    %31 = arith.index_cast %arg0 : i32 to index
    %c0_19 = arith.constant 0 : index
    %32 = vector.load %arg10[%31, %c0_19] : memref<2x1024xf32, #tpu.memory_space<vmem>>, vector<1x1024xf32>
    tpu.vector_store %arg10[%31, %c0_19], %30 {strides = array<i32>} : memref<2x1024xf32, #tpu.memory_space<vmem>>, vector<1x1024xf32>,
    %c1_i32 = arith.constant 1 : i32
    %33 = arith.cmpi eq, %arg0, %c1_i32 : i32
    %c0_i32_20 = arith.constant 0 : i32
    %34 = arith.cmpi eq, %arg1, %c0_i32_20 : i32
    %35 = arith.andi %33, %34 : i1
    %36 = arith.extui %35 : i1 to i32
    %c0_i32_21 = arith.constant 0 : i32
    %37 = arith.cmpi ne, %36, %c0_i32_21 : i32
    scf.if %37 {
      %c0_22 = arith.constant 0 : index
      %c0_23 = arith.constant 0 : index
      %38 = vector.load %arg8[%c0_22, %c0_23] : memref<2x1024xf32, #tpu.memory_space<vmem>>, vector<1x1024xf32>
      %cst_24 = arith.constant 7.812500e-03 : f32
      %39 = vector.broadcast %cst_24 : f32 to vector<1x1024xf32>
      %40 = arith.mulf %38, %39 : vector<1x1024xf32>
      %c1_25 = arith.constant 1 : index
      %c0_26 = arith.constant 0 : index
      %41 = vector.load %arg8[%c1_25, %c0_26] : memref<2x1024xf32, #tpu.memory_space<vmem>>, vector<1x1024xf32>
      %cst_27 = arith.constant 7.812500e-03 : f32
      %42 = vector.broadcast %cst_27 : f32 to vector<1x1024xf32>
      %43 = arith.mulf %41, %42 : vector<1x1024xf32>
      %44 = arith.mulf %40, %40 : vector<1x1024xf32>
      %45 = arith.subf %43, %44 : vector<1x1024xf32>
      %cst_28 = arith.constant 0.000000e+00 : f32
      %46 = vector.broadcast %cst_28 : f32 to vector<1x1024xf32>
      %47 = arith.maximumf %45, %46 : vector<1x1024xf32>
      %c0_29 = arith.constant 0 : index
      %c0_30 = arith.constant 0 : index
      %48 = vector.load %arg4[%c0_29, %c0_30] : memref<2x1024xf32, #tpu.memory_space<vmem>>, vector<1x1024xf32>
      %cst_31 = arith.constant 9.99999974E-6 : f32
      %49 = vector.broadcast %cst_31 : f32 to vector<1x1024xf32>
      %50 = arith.addf %47, %49 : vector<1x1024xf32>
      %51 = math.rsqrt %50 : vector<1x1024xf32>
      %52 = arith.mulf %48, %51 : vector<1x1024xf32>
      %c1_32 = arith.constant 1 : index
      %c0_33 = arith.constant 0 : index
      %53 = vector.load %arg4[%c1_32, %c0_33] : memref<2x1024xf32, #tpu.memory_space<vmem>>, vector<1x1024xf32>
      %54 = arith.mulf %40, %52 : vector<1x1024xf32>
      %55 = arith.subf %53, %54 : vector<1x1024xf32>
      %cst_34 = arith.constant 0.000000e+00 : f32
      %56 = vector.broadcast %cst_34 : f32 to vector<1x1024xf32>
      %57 = arith.cmpf oge, %52, %56 : vector<1x1024xf32>
      %c0_35 = arith.constant 0 : index
      %c0_36 = arith.constant 0 : index
      %58 = vector.load %arg9[%c0_35, %c0_36] : memref<2x1024xf32, #tpu.memory_space<vmem>>, vector<2x1024xf32>
      %c0_37 = arith.constant 0 : index
      %c0_38 = arith.constant 0 : index
      %59 = vector.load %arg10[%c0_37, %c0_38] : memref<2x1024xf32, #tpu.memory_space<vmem>>, vector<2x1024xf32>
      %60 = vector.shape_cast %57 : vector<1x1024xi1> to vector<1x1024xi1>
      %61 = vector.broadcast %60 : vector<1x1024xi1> to vector<2x1024xi1>
      %62 = arith.select %61, %58, %59 : vector<2x1024xi1>, vector<2x1024xf32>
      %63 = vector.broadcast %52 : vector<1x1024xf32> to vector<2x1024xf32>
      %64 = arith.mulf %62, %63 : vector<2x1024xf32>
      %65 = vector.broadcast %55 : vector<1x1024xf32> to vector<2x1024xf32>
      %66 = arith.addf %64, %65 : vector<2x1024xf32>
      %cst_39 = arith.constant 0.000000e+00 : f32
      %67 = vector.broadcast %cst_39 : f32 to vector<2x1024xf32>
      %68 = arith.maximumf %66, %67 : vector<2x1024xf32>
      %69 = arith.truncf %68 : vector<2x1024xf32> to vector<2x1024xbf16>
      %c0_40 = arith.constant 0 : index
      %c0_41 = arith.constant 0 : index
      %70 = vector.load %arg5[%c0_40, %c0_41] : memref<1024x128xbf16, #tpu.memory_space<vmem>>, vector<1024x128xbf16>
      %cst_42 = arith.constant dense<0.000000e+00> : vector<2x128xf32>
      %71 = tpu.matmul %69, %70, %cst_42 {dimension_numbers = #tpu.dot_dimension_numbers<[1], [0], [0], [1], [0, 0, 1, 1], [], []>} : vector<2x1024xbf16>, vector<1024x128xbf16>, vector<2x128xf32> -> vector<2x128xf32>
      %c0_43 = arith.constant 0 : index
      %c0_44 = arith.constant 0 : index
      %72 = vector.load %arg6[%c0_43, %c0_44] : memref<1x128xf32, #tpu.memory_space<vmem>>, vector<1x128xf32>
      %73 = vector.broadcast %72 : vector<1x128xf32> to vector<2x128xf32>
      %74 = arith.addf %71, %73 : vector<2x128xf32>
      %c0_45 = arith.constant 0 : index
      %c0_46 = arith.constant 0 : index
      %75 = vector.load %arg7[%c0_45, %c0_46] : memref<2x128xf32, #tpu.memory_space<vmem>>, vector<2x128xf32>
      tpu.vector_store %arg7[%c0_45, %c0_46], %74 {strides = array<i32>} : memref<2x128xf32, #tpu.memory_space<vmem>>, vector<2x128xf32>,
    } else {
    }
    return
  }
  func.func @transform_0(%arg0: i32, %arg1: i32) -> (i32, i32) {
    %c1_i32 = arith.constant 1 : i32
    %0 = arith.muli %arg0, %c1_i32 : i32
    %1 = arith.addi %0, %arg1 : i32
    %c0_i32 = arith.constant 0 : i32
    %c0_i32_0 = arith.constant 0 : i32
    return %1, %c0_i32 : i32, i32
  }
  func.func @transform_1(%arg0: i32, %arg1: i32) -> (i32, i32) {
    %c0_i32 = arith.constant 0 : i32
    %c0_i32_0 = arith.constant 0 : i32
    %c0_i32_1 = arith.constant 0 : i32
    return %c0_i32, %c0_i32_0 : i32, i32
  }
  func.func @transform_2(%arg0: i32, %arg1: i32) -> (i32, i32) {
    %c0_i32 = arith.constant 0 : i32
    %c0_i32_0 = arith.constant 0 : i32
    %c0_i32_1 = arith.constant 0 : i32
    return %c0_i32, %c0_i32_0 : i32, i32
  }
  func.func @transform_3(%arg0: i32, %arg1: i32) -> (i32, i32) {
    %c0_i32 = arith.constant 0 : i32
    %c0_i32_0 = arith.constant 0 : i32
    %c0_i32_1 = arith.constant 0 : i32
    return %c0_i32, %c0_i32_0 : i32, i32
  }
  func.func @transform_4(%arg0: i32, %arg1: i32) -> (i32, i32) {
    %c0_i32 = arith.constant 0 : i32
    %c0_i32_0 = arith.constant 0 : i32
    %c0_i32_1 = arith.constant 0 : i32
    return %c0_i32, %c0_i32_0 : i32, i32
  }
  func.func @transform_5(%arg0: i32, %arg1: i32) -> (i32, i32) {
    %c0_i32 = arith.constant 0 : i32
    %c0_i32_0 = arith.constant 0 : i32
    %c0_i32_1 = arith.constant 0 : i32
    return %c0_i32, %c0_i32_0 : i32, i32
  }
}

</mosaic_0001>

<bundles_post_ra>
// kernel: cls_model_forward.2
= control target key start
LH: loop header
LB: loop body
LE: loop exit
PB: predicated region body
PF: predicated region fallthrough
CT: control target
= control target key end

     0   :  { %v1845_v0 = vmov 2   ;;  %v1846_v1 = vmov 1   ;;  %v1847_v10 = vmov 0   ;;  %v121_v36 = vlaneseq  ;;  %s2670_s0 = inlined_call_operand.vmem [shape: f32[128,3], index: 0, kind: input, shape index: {}]   ;;  %s2671_s1 = inlined_call_operand.vmem [shape: f32[3,64], index: 1, kind: input, shape index: {}]   ;;  %s2672_s2 = inlined_call_operand.vmem [shape: bf16[64,64], index: 2, kind: input, shape index: {}]   ;;  %s2673_s5 = inlined_call_operand.vmem [shape: f32[8,128], index: 5, kind: input, shape index: {}]   ;;  %s2674_s3 = inlined_call_operand.vmem [shape: bf16[64,64], index: 3, kind: input, shape index: {}]   ;;  %s2675_s4 = inlined_call_operand.vmem [shape: bf16[64,128], index: 4, kind: input, shape index: {}]   ;;  %s2676_s6 = inlined_call_operand.vmem [shape: bf16[128,128], index: 6, kind: output, shape index: {}]  }
   0x1   :  { %1796 = vset.pattern.permute.xlu0 %v1845_v0  ;;  %1795 = vset.pattern.permute.xlu1 %v1846_v1  ;;  %v24_v2 = vld [vmem:[%s2670_s0] sm:$0xff]  ;;  %v29_v3 = vld [vmem:[%s2670_s0 + $0x28] sm:$0xff]  ;;  %v30_v5 = vld [vmem:[%s2670_s0 + $0x30] sm:$0xff]  ;;  %vm343_vm0 = vcmask 523264  }
   0x2   :  { %242 = vperm.xlu0 %1796, %v24_v2   ;;  %142 = vperm.xlu1 %1795, %v24_v2   ;;  %v25_v4 = vld [vmem:[%s2670_s0 + $0x8] sm:$0xff]  ;;  %v26_v6 = vld [vmem:[%s2670_s0 + $0x10] sm:$0xff]  ;;  %v35_v8 = vld [vmem:[%s2670_s0 + $0x58] sm:$0xff]  ;;  %v122_v39 = vshrl.u32 %v121_v36, 7 }
   0x3   :  { %v34_v7 = vld [vmem:[%s2670_s0 + $0x50] sm:$0xff]  ;;  %v27_v9 = vld [vmem:[%s2670_s0 + $0x18] sm:$0xff]  ;;  %v28_v11 = vld [vmem:[%s2670_s0 + $0x20] sm:$0xff] }
   0x4   :  { %v32_v12 = vld [vmem:[%s2670_s0 + $0x40] sm:$0xff]  ;;  %v33_v13 = vld [vmem:[%s2670_s0 + $0x48] sm:$0xff]  ;;  %v38_v15 = vld [vmem:[%s2670_s0 + $0x70] sm:$0xff]  ;;  %v1979_v42 = vsub.s32 0, %v122_v39  ;;  %v207_v43 = vsub.s32 1, %v122_v39  ;;  %v307_v44 = vsub.s32 2, %v122_v39 }
   0x5   :  { %v37_v14 = vld [vmem:[%s2670_s0 + $0x68] sm:$0xff]  ;;  %v31_v16 = vld [vmem:[%s2670_s0 + $0x38] sm:$0xff]  ;;  %v36_v18 = vld [vmem:[%s2670_s0 + $0x60] sm:$0xff] }
   0x6   :  { %262 = vperm.xlu0 %1796, %v29_v3   ;;  %146 = vperm.xlu1 %1795, %v25_v4   ;;  %v39_v17 = vld [vmem:[%s2670_s0 + $0x78] sm:$0xff]  ;;  %v40_v45 = vld [vmem:[%s2671_s1] sm:$0x7] }
   0x7   :  { %v1986_v48 = vrot.slane %v40_v45, %v207_v43  ;;  %v1988_v49 = vrot.slane %v40_v45, %v307_v44  ;;  %v1991_v50 = vrot.slane %v40_v45, %v1979_v42 }
   0xa   :  { %266 = vperm.xlu0 %1796, %v30_v5   ;;  %150 = vperm.xlu1 %1795, %v26_v6  }
   0xe   :  { %282 = vperm.xlu0 %1796, %v34_v7   ;;  %1797 = vset.pattern.permute.xlu1 %v1845_v0 }
   0xf   :  { %246 = vperm.xlu1 %1797, %v25_v4  }
  0x12   :  { %286 = vperm.xlu0 %1796, %v35_v8  }
  0x13   :  { %1798 = vset.pattern.permute.xlu1 %v1847_v10 }
  0x14   :  { %58 = vperm.xlu1 %1798, %v27_v9  }
  0x16   :  { %1816 = vset.pattern.permute.xlu0 %v1846_v1 }
  0x17   :  { %154 = vperm.xlu0 %1816, %v27_v9  }
  0x18   :  { %1799 = vset.pattern.permute.xlu1 %v1845_v0 }
  0x19   :  { %250 = vperm.xlu1 %1799, %v26_v6  }
  0x1b   :  { %158 = vperm.xlu0 %1816, %v28_v11  }
  0x1d   :  { %1800 = vset.pattern.permute.xlu1 %v1847_v10 }
  0x1e   :  { %63 = vperm.xlu1 %1800, %v28_v11  }
  0x1f   :  { %174 = vperm.xlu0 %1816, %v32_v12  }
  0x22   :  { %1801 = vset.pattern.permute.xlu1 %v1845_v0 }
  0x23   :  { %178 = vperm.xlu0 %1816, %v33_v13   ;;  %254 = vperm.xlu1 %1801, %v27_v9  }
  0x27   :  { %194 = vperm.xlu0 %1816, %v37_v14   ;;  %1802 = vset.pattern.permute.xlu1 %v1846_v1 }
  0x28   :  { %162 = vperm.xlu1 %1802, %v29_v3  }
  0x2b   :  { %198 = vperm.xlu0 %1816, %v38_v15  }
  0x2c   :  { %1803 = vset.pattern.permute.xlu1 %v1845_v0 }
  0x2d   :  { %258 = vperm.xlu1 %1803, %v28_v11  }
  0x2f   :  { %1820 = vset.pattern.permute.xlu0 %v1847_v10 }
  0x30   :  { %43 = vperm.xlu0 %1820, %v24_v2  }
  0x31   :  { %1804 = vset.pattern.permute.xlu1 %v1846_v1 }
  0x32   :  { %166 = vperm.xlu1 %1804, %v30_v5  }
  0x34   :  { %48 = vperm.xlu0 %1820, %v25_v4  }
  0x36   :  { %1805 = vset.pattern.permute.xlu1 %v1847_v10 }
  0x37   :  { %78 = vperm.xlu1 %1805, %v31_v16  }
  0x38   :  { %53 = vperm.xlu0 %1820, %v26_v6  }
  0x3b   :  { %1806 = vset.pattern.permute.xlu1 %v1846_v1 }
  0x3c   :  { %68 = vperm.xlu0 %1820, %v29_v3   ;;  %170 = vperm.xlu1 %1806, %v31_v16  }
  0x40   :  { %73 = vperm.xlu0 %1820, %v30_v5   ;;  %1807 = vset.pattern.permute.xlu1 %v1847_v10 }
  0x41   :  { %83 = vperm.xlu1 %1807, %v32_v12  }
  0x44   :  { %93 = vperm.xlu0 %1820, %v34_v7  }
  0x45   :  { %1808 = vset.pattern.permute.xlu1 %v1845_v0 }
  0x46   :  { %270 = vperm.xlu1 %1808, %v31_v16   ;;  %v1825_v16 = vld [vmem:[%s2672_s2 + $0x18] sm:$0xff]  }
  0x47   :  { %1712 = vmatprep.subr.bf16.mxu0 %v1825_v16  ;;  %1784 = vmatprep.subr.bf16.mxu1 %v1825_v16 }
  0x48   :  { %98 = vperm.xlu0 %1820, %v35_v8   ;;  %1713 = vmatpush3.bf16.msra.mxu0 %v1825_v16 }
  0x49   :  { %1788 = vmatpush3.bf16.msra.mxu1 %v1825_v16 }
  0x4a   :  { %1809 = vset.pattern.permute.xlu1 %v1847_v10 }
  0x4b   :  { %88 = vperm.xlu1 %1809, %v33_v13  }
  0x4c   :  { %118 = vperm.xlu0 %1820, %v39_v17  }
  0x4f   :  { %1810 = vset.pattern.permute.xlu1 %v1845_v0 }
  0x50   :  { %274 = vperm.xlu1 %1810, %v32_v12   ;;  %1824 = vset.pattern.permute.xlu0 %v1845_v0 }
  0x51   :  { %302 = vperm.xlu0 %1824, %v39_v17  }
  0x54   :  { %1811 = vset.pattern.permute.xlu1 %v1846_v1 }
  0x55   :  { %182 = vperm.xlu1 %1811, %v34_v7  }
  0x59   :  { %1812 = vset.pattern.permute.xlu1 %v1845_v0 }
  0x5a   :  { %278 = vperm.xlu1 %1812, %v33_v13  }
  0x5e   :  { %1813 = vset.pattern.permute.xlu1 %v1846_v1 }
  0x5f   :  { %186 = vperm.xlu1 %1813, %v35_v8  }
  0x63   :  { %1814 = vset.pattern.permute.xlu1 %v1847_v10 }
  0x64   :  { %103 = vperm.xlu1 %1814, %v36_v18  }
  0x68   :  { %1815 = vset.pattern.permute.xlu1 %v1846_v1 }
  0x69   :  { %190 = vperm.xlu1 %1815, %v36_v18  }
  0x6d   :  { %1817 = vset.pattern.permute.xlu1 %v1847_v10 }
  0x6e   :  { %108 = vperm.xlu1 %1817, %v37_v14  }
  0x72   :  { %1818 = vset.pattern.permute.xlu1 %v1845_v0 }
  0x73   :  { %290 = vperm.xlu1 %1818, %v36_v18  }
  0x77   :  { %1819 = vset.pattern.permute.xlu1 %v1847_v10 }
  0x78   :  { %113 = vperm.xlu1 %1819, %v38_v15  }
  0x7c   :  { %1821 = vset.pattern.permute.xlu1 %v1845_v0 }
  0x7d   :  { %294 = vperm.xlu1 %1821, %v37_v14   ;;  %v143_v19 = vpop.permute.xlu1 %142  ;;  %v243_v20 = vpop.permute.xlu0 %242 }
  0x7e   :  { %v209_v8 = vmul.f32 %v1986_v48, %v143_v19  ;;  %v309_v10 = vmul.f32 %v1988_v49, %v243_v20 }
  0x81   :  { %1822 = vset.pattern.permute.xlu1 %v1846_v1  ;;  %v147_v21 = vpop.permute.xlu1 %146  ;;  %v1960_v22 = vpop.permute.xlu0 %262 }
  0x82   :  { %202 = vperm.xlu1 %1822, %v39_v17   ;;  %v210_v52 = vmul.f32 %v1986_v48, %v147_v21 }
  0x85   :  { %v151_v23 = vpop.permute.xlu1 %150  ;;  %v1962_v24 = vpop.permute.xlu0 %266 }
  0x86   :  { %1823 = vset.pattern.permute.xlu1 %v1845_v0  ;;  %v211_v58 = vmul.f32 %v1986_v48, %v151_v23 }
  0x87   :  { %298 = vperm.xlu1 %1823, %v38_v15  }
  0x89   :  { %v1965_v25 = vpop.permute.xlu0 %282 }
  0x8a   :  { %v247_v26 = vpop.permute.xlu1 %246 }
  0x8b   :  { %v310_v54 = vmul.f32 %v1988_v49, %v247_v26 }
  0x8d   :  { %v1967_v27 = vpop.permute.xlu0 %286 }
  0x8f   :  { %v59_v28 = vpop.permute.xlu1 %58 }
  0x90   :  { %v128_v17 = vmul.f32 %v1991_v50, %v59_v28 }
  0x92   :  { %v155_v29 = vpop.permute.xlu0 %154 }
  0x93   :  { %v212_v13 = vmul.f32 %v1986_v48, %v155_v29 }
  0x94   :  { %v251_v30 = vpop.permute.xlu1 %250 }
  0x95   :  { %v311_v61 = vmul.f32 %v1988_v49, %v251_v30  ;;  %v228_v23 = vadd.f32 %v212_v13, %v128_v17 }
  0x96   :  { %v159_v31 = vpop.permute.xlu0 %158 }
  0x97   :  { %v213_v20 = vmul.f32 %v1986_v48, %v159_v31  ;;  %v1826_v31 = vld [vmem:[%s2672_s2 + $0x10] sm:$0xff]  }
  0x98   :  { %1714 = vmatprep.subr.bf16.mxu0 %v1826_v31  ;;  %1785 = vmatprep.subr.bf16.mxu1 %v1826_v31 }
  0x99   :  { %v64_v32 = vpop.permute.xlu1 %63  ;;  %1715 = vmatpush3.bf16.msra.mxu0 %v1826_v31  ;;  %1789 = vmatpush3.bf16.msra.mxu1 %v1826_v31 }
  0x9a   :  { %v1969_v33 = vpop.permute.xlu0 %174  ;;  %v129_v21 = vmul.f32 %v1991_v50, %v64_v32 }
  0x9c   :  { %v229_v43 = vadd.f32 %v213_v20, %v129_v21 }
  0x9e   :  { %v255_v34 = vpop.permute.xlu1 %254  ;;  %v1971_v35 = vpop.permute.xlu0 %178 }
  0x9f   :  { %v312_v18 = vmul.f32 %v1988_v49, %v255_v34 }
  0xa1   :  { %v2046_v32 = vadd.f32 %v312_v18, %v228_v23 }
  0xa2   :  { %v1973_v37 = vpop.permute.xlu0 %194 }
  0xa3   :  { %v1975_v38 = vpop.permute.xlu1 %162 }
  0xa6   :  { %v1977_v40 = vpop.permute.xlu0 %198 }
  0xa8   :  { %v259_v41 = vpop.permute.xlu1 %258 }
  0xa9   :  { %v313_v28 = vmul.f32 %v1988_v49, %v259_v41  ;;  %v214_v41 = vmul.f32 %v1986_v48, %v1975_v38 }
  0xab   :  { %v44_v46 = vpop.permute.xlu0 %43 }
  0xac   :  { %v125_v7 = vmul.f32 %v1991_v50, %v44_v46  ;;  %v1827_v46 = vld [vmem:[%s2672_s2 + $0x8] sm:$0xff]  }
  0xad   :  { %v1984_v47 = vpop.permute.xlu1 %166  ;;  %1716 = vmatprep.subr.bf16.mxu0 %v1827_v46  ;;  %1786 = vmatprep.subr.bf16.mxu1 %v1827_v46 }
  0xae   :  { %v225_v11 = vadd.f32 %v209_v8, %v125_v7  ;;  %1717 = vmatpush3.bf16.msra.mxu0 %v1827_v46  ;;  %1790 = vmatpush3.bf16.msra.mxu1 %v1827_v46  ;;  %v217_v7 = vmul.f32 %v1986_v48, %v1969_v33 }
  0xaf   :  { %v49_v51 = vpop.permute.xlu0 %48 }
  0xb0   :  { %v126_v53 = vmul.f32 %v1991_v50, %v49_v51  ;;  %v2023_v14 = vadd.f32 %v309_v10, %v225_v11  ;;  %v2055_v51 = vadd.f32 %v313_v28, %v229_v43 }
  0xb2   :  { %v226_v55 = vadd.f32 %v210_v52, %v126_v53  ;;  %v1996_v56 = vpop.permute.xlu1 %78  ;;  %v344_v26 = vsel %vm343_vm0, %v2023_v14, 0.0  ;;  %v215_v52 = vmul.f32 %v1986_v48, %v1984_v47  ;;  %v1828_v53 = vld [vmem:[%s2672_s2] sm:$0xff]   ;;  %v315_v47 = vmul.f32 %v1988_v49, %v1962_v24 }
  0xb3   :  { %v54_v57 = vpop.permute.xlu0 %53  ;;  %v351_v8 = vsel %vm343_vm0, %v2055_v51, 0.0  ;;  %1718 = vmatprep.subr.bf16.mxu0 %v1828_v53  ;;  %1787 = vmatprep.subr.bf16.mxu1 %v1828_v53  ;;  %v132_v10 = vmul.f32 %v1991_v50, %v1996_v56  ;;  %v218_v24 = vmul.f32 %v1986_v48, %v1971_v35 }
  0xb4   :  { %v1999_v59 = vadd.f32 %v310_v54, %v226_v55  ;;  %v127_v60 = vmul.f32 %v1991_v50, %v54_v57  ;;  %v349_v54 = vsel %vm343_vm0, %v2046_v32, 0.0  ;;  %1719 = vmatpush3.bf16.msra.mxu0 %v1828_v53  ;;  %1791 = vmatpush3.bf16.msra.mxu1 %v1828_v53 }
  0xb6   :  { %v227_v62 = vadd.f32 %v211_v58, %v127_v60  ;;  %v345_v19 = vsel %vm343_vm0, %v1999_v59, 0.0  ;;  %v314_v60 = vmul.f32 %v1988_v49, %v1960_v22 }
  0xb7   :  { %v171_v63 = vpop.permute.xlu1 %170  ;;  %v69_v12 = vpop.permute.xlu0 %68  ;;  %v346_v34 = vadd.f32 %v345_v19, %v344_v26 }
  0xb8   :  { %v2003_v0 = vadd.f32 %v311_v61, %v227_v62  ;;  %v130_v39 = vmul.f32 %v1991_v50, %v69_v12  ;;  %v216_v61 = vmul.f32 %v1986_v48, %v171_v63 }
  0xba   :  { %v347_v29 = vsel %vm343_vm0, %v2003_v0, 0.0  ;;  %v230_v55 = vadd.f32 %v214_v41, %v130_v39  ;;  %v232_v16 = vadd.f32 %v216_v61, %v132_v10 }
  0xbb   :  { %v74_v30 = vpop.permute.xlu0 %73  ;;  %v348_v44 = vadd.f32 %v347_v29, %v346_v34 }
  0xbc   :  { %v2005_v1 = vpop.permute.xlu1 %83  ;;  %v131_v45 = vmul.f32 %v1991_v50, %v74_v30  ;;  %v2075_v22 = vadd.f32 %v314_v60, %v230_v55 }
  0xbd   :  { %v350_v57 = vadd.f32 %v349_v54, %v348_v44  ;;  %v133_v63 = vmul.f32 %v1991_v50, %v2005_v1 }
  0xbe   :  { %v231_v58 = vadd.f32 %v215_v52, %v131_v45  ;;  %v353_v1 = vsel %vm343_vm0, %v2075_v22, 0.0 }
  0xbf   :  { %v94_v62 = vpop.permute.xlu0 %93  ;;  %v352_v33 = vadd.f32 %v351_v8, %v350_v57 }
  0xc0   :  { %v2083_v12 = vadd.f32 %v315_v47, %v231_v58 }
  0xc1   :  { %v2007_v2 = vpop.permute.xlu1 %270  ;;  %v354_v20 = vadd.f32 %v353_v1, %v352_v33 }
  0xc2   :  { %v316_v11 = vmul.f32 %v1988_v49, %v2007_v2  ;;  %v233_v2 = vadd.f32 %v217_v7, %v133_v63  ;;  %v355_v21 = vsel %vm343_vm0, %v2083_v12, 0.0 }
  0xc3   :  { %v99_v18 = vpop.permute.xlu0 %98  ;;  %v356_v31 = vadd.f32 %v355_v21, %v354_v20 }
  0xc4   :  { %v2091_v19 = vadd.f32 %v316_v11, %v232_v16 }
  0xc6   :  { %v2009_v3 = vpop.permute.xlu1 %88 }
  0xc7   :  { %v134_v17 = vmul.f32 %v1991_v50, %v2009_v3  ;;  %v135_v3 = vmul.f32 %v1991_v50, %v94_v62 }
  0xc9   :  { %v234_v23 = vadd.f32 %v218_v24, %v134_v17 }
  0xcb   :  { %v2011_v4 = vpop.permute.xlu1 %274 }
  0xcc   :  { %v317_v56 = vmul.f32 %v1988_v49, %v2011_v4  ;;  %v136_v4 = vmul.f32 %v1991_v50, %v99_v18 }
  0xce   :  { %v2099_v26 = vadd.f32 %v317_v56, %v233_v2 }
  0xd0   :  { %v2013_v5 = vpop.permute.xlu1 %182  ;;  %v359_v39 = vsel %vm343_vm0, %v2099_v26, 0.0 }
  0xd1   :  { %v219_v29 = vmul.f32 %v1986_v48, %v2013_v5  ;;  %v319_v5 = vmul.f32 %v1988_v49, %v1965_v25  ;;  %v119_v25 = vpop.permute.xlu0 %118 }
  0xd3   :  { %v235_v43 = vadd.f32 %v219_v29, %v135_v3 }
  0xd5   :  { %v2015_v6 = vpop.permute.xlu1 %278  ;;  %v2125_v58 = vadd.f32 %v319_v5, %v235_v43  ;;  %v303_v10 = vpop.permute.xlu0 %302 }
  0xd6   :  { %v318_v35 = vmul.f32 %v1988_v49, %v2015_v6  ;;  %v357_v6 = vsel %vm343_vm0, %v2091_v19, 0.0  ;;  %v324_v56 = vmul.f32 %v1988_v49, %v303_v10 }
  0xd7   :  { %v358_v41 = vadd.f32 %v357_v6, %v356_v31 }
  0xd8   :  { %v2107_v34 = vadd.f32 %v318_v35, %v234_v23 }
  0xd9   :  { %v360_v57 = vadd.f32 %v359_v39, %v358_v41 }
  0xda   :  { %v2019_v9 = vpop.permute.xlu1 %186  ;;  %v361_v52 = vsel %vm343_vm0, %v2107_v34, 0.0 }
  0xdb   :  { %v220_v30 = vmul.f32 %v1986_v48, %v2019_v9  ;;  %v320_v9 = vmul.f32 %v1988_v49, %v1967_v27  ;;  %v362_v62 = vadd.f32 %v361_v52, %v360_v57 }
  0xdd   :  { %v236_v44 = vadd.f32 %v220_v30, %v136_v4 }
  0xdf   :  { %v2025_v15 = vpop.permute.xlu1 %103  ;;  %v2127_v27 = vadd.f32 %v320_v9, %v236_v44 }
  0xe0   :  { %v137_v53 = vmul.f32 %v1991_v50, %v2025_v15 }
  0xe1   :  { %v365_v63 = vsel %vm343_vm0, %v2127_v27, 0.0 }
  0xe4   :  { %v2041_v36 = vpop.permute.xlu1 %190 }
  0xe5   :  { %v221_v45 = vmul.f32 %v1986_v48, %v2041_v36  ;;  %v222_v36 = vmul.f32 %v1986_v48, %v1973_v37  ;;  %v363_v37 = vsel %vm343_vm0, %v2125_v58, 0.0 }
  0xe6   :  { %v364_v33 = vadd.f32 %v363_v37, %v362_v62 }
  0xe7   :  { %v237_v60 = vadd.f32 %v221_v45, %v137_v53 }
  0xe8   :  { %v366_v18 = vadd.f32 %v365_v63, %v364_v33 }
  0xe9   :  { %v109_v38 = vpop.permute.xlu1 %108 }
  0xea   :  { %v138_v54 = vmul.f32 %v1991_v50, %v109_v38  ;;  %v140_v38 = vmul.f32 %v1991_v50, %v119_v25 }
  0xec   :  { %v238_v47 = vadd.f32 %v222_v36, %v138_v54 }
  0xee   :  { %v291_v13 = vpop.permute.xlu1 %290 }
  0xef   :  { %v321_v55 = vmul.f32 %v1988_v49, %v291_v13  ;;  %v223_v13 = vmul.f32 %v1986_v48, %v1977_v40 }
  0xf1   :  { %v2130_v7 = vadd.f32 %v321_v55, %v237_v60 }
  0xf3   :  { %v114_v28 = vpop.permute.xlu1 %113  ;;  %v367_v16 = vsel %vm343_vm0, %v2130_v7, 0.0 }
  0xf4   :  { %v139_v11 = vmul.f32 %v1991_v50, %v114_v28  ;;  %v368_v20 = vadd.f32 %v367_v16, %v366_v18 }
  0xf6   :  { %v239_v2 = vadd.f32 %v223_v13, %v139_v11 }
  0xf8   :  { %v295_v46 = vpop.permute.xlu1 %294 }
  0xf9   :  { %v322_v61 = vmul.f32 %v1988_v49, %v295_v46 }
  0xfb   :  { %v2139_v24 = vadd.f32 %v322_v61, %v238_v47 }
  0xfd   :  { %v203_v15 = vpop.permute.xlu1 %202  ;;  %v369_v35 = vsel %vm343_vm0, %v2139_v24, 0.0 }
  0xfe   :  { %v224_v8 = vmul.f32 %v1986_v48, %v203_v15  ;;  %v370_v40 = vadd.f32 %v369_v35, %v368_v20 }
 0x100   :  { %v240_v17 = vadd.f32 %v224_v8, %v140_v38 }
 0x102   :  { %v299_v1 = vpop.permute.xlu1 %298  ;;  %v2149_v21 = vadd.f32 %v324_v56, %v240_v17 }
 0x103   :  { %v323_v50 = vmul.f32 %v1988_v49, %v299_v1 }
 0x104   :  { %v373_v23 = vsel %vm343_vm0, %v2149_v21, 0.0 }
 0x105   :  { %v2151_v3 = vadd.f32 %v323_v50, %v239_v2 }
 0x107   :  { %v371_v48 = vsel %vm343_vm0, %v2151_v3, 0.0 }
 0x108   :  { %v372_v4 = vadd.f32 %v371_v48, %v370_v40 }
 0x10a   :  { %v374_v29 = vadd.f32 %v373_v23, %v372_v4 }
 0x10c   :  { %v375_v30 = vrot.slane %v374_v29, 4 }
 0x10e   :  { %v376_v28 = vadd.f32 %v375_v30, %v374_v29 }
 0x110   :  { %v377_v6 = vrot.slane %v376_v28, 2 }
 0x112   :  { %v378_v31 = vadd.f32 %v377_v6, %v376_v28 }
 0x114   :  { %v379_v39 = vrot.slane %v378_v31, 1 }
 0x116   :  { %v380_v49 = vadd.f32 %v379_v39, %v378_v31 }
 0x118   :  { %v2157_v43 = vmul.f32 0.0078125, %v380_v49 }
 0x11a   :  { %v382_v44 = vsub.f32 %v2023_v14, %v2157_v43  ;;  %v383_v45 = vsub.f32 %v1999_v59, %v2157_v43  ;;  %v384_v5 = vsub.f32 %v2003_v0, %v2157_v43  ;;  %v385_v9 = vsub.f32 %v2046_v32, %v2157_v43 }
 0x11b   :  { %v386_v52 = vsub.f32 %v2055_v51, %v2157_v43  ;;  %v387_v54 = vsub.f32 %v2075_v22, %v2157_v43  ;;  %v388_v60 = vsub.f32 %v2083_v12, %v2157_v43  ;;  %v389_v15 = vsub.f32 %v2091_v19, %v2157_v43 }
 0x11c   :  { %v398_v41 = vmul.f32 %v382_v44, %v382_v44  ;;  %v399_v46 = vmul.f32 %v383_v45, %v383_v45  ;;  %v400_v53 = vmul.f32 %v384_v5, %v384_v5  ;;  %v401_v55 = vmul.f32 %v385_v9, %v385_v9 }
 0x11d   :  { %v402_v61 = vmul.f32 %v386_v52, %v386_v52  ;;  %v403_v38 = vmul.f32 %v387_v54, %v387_v54  ;;  %v390_v37 = vsub.f32 %v2099_v26, %v2157_v43  ;;  %v404_v63 = vmul.f32 %v388_v60, %v388_v60 }
 0x11e   :  { %v414_v36 = vsel %vm343_vm0, %v398_v41, 0.0  ;;  %v415_v57 = vsel %vm343_vm0, %v399_v46, 0.0  ;;  %v417_v62 = vsel %vm343_vm0, %v400_v53, 0.0  ;;  %v419_v8 = vsel %vm343_vm0, %v401_v55, 0.0 }
 0x11f   :  { %v416_v25 = vadd.f32 %v415_v57, %v414_v36  ;;  %v421_v11 = vsel %vm343_vm0, %v402_v61, 0.0  ;;  %v391_v13 = vsub.f32 %v2107_v34, %v2157_v43  ;;  %v405_v16 = vmul.f32 %v389_v15, %v389_v15 }
 0x120   :  { %v423_v17 = vsel %vm343_vm0, %v403_v38, 0.0  ;;  %v392_v18 = vsub.f32 %v2125_v58, %v2157_v43  ;;  %v406_v1 = vmul.f32 %v390_v37, %v390_v37  ;;  %v425_v2 = vsel %vm343_vm0, %v404_v63, 0.0 }
 0x121   :  { %v418_v47 = vadd.f32 %v417_v62, %v416_v25  ;;  %v393_v50 = vsub.f32 %v2127_v27, %v2157_v43  ;;  %v407_v20 = vmul.f32 %v391_v13, %v391_v13  ;;  %v427_v40 = vsel %vm343_vm0, %v405_v16, 0.0  ;;  %v341_v13 = vld [vmem:[%s2673_s5] sm:$0x1] }
 0x122   :  { %v394_v4 = vsub.f32 %v2130_v7, %v2157_v43  ;;  %v408_v23 = vmul.f32 %v392_v18, %v392_v18  ;;  %v429_v29 = vsel %vm343_vm0, %v406_v1, 0.0  ;;  %v395_v28 = vsub.f32 %v2139_v24, %v2157_v43 }
 0x123   :  { %v420_v10 = vadd.f32 %v419_v8, %v418_v47  ;;  %v409_v6 = vmul.f32 %v393_v50, %v393_v50  ;;  %v431_v31 = vsel %vm343_vm0, %v407_v20, 0.0  ;;  %v396_v49 = vsub.f32 %v2151_v3, %v2157_v43 }
 0x124   :  { %v410_v44 = vmul.f32 %v394_v4, %v394_v4  ;;  %v433_v45 = vsel %vm343_vm0, %v408_v23, 0.0  ;;  %v397_v9 = vsub.f32 %v2149_v21, %v2157_v43  ;;  %v411_v41 = vmul.f32 %v395_v28, %v395_v28 }
 0x125   :  { %v422_v33 = vadd.f32 %v421_v11, %v420_v10  ;;  %v435_v46 = vsel %vm343_vm0, %v409_v6, 0.0  ;;  %v412_v53 = vmul.f32 %v396_v49, %v396_v49 }
 0x126   :  { %v437_v54 = vsel %vm343_vm0, %v410_v44, 0.0  ;;  %v413_v36 = vmul.f32 %v397_v9, %v397_v9  ;;  %v439_v57 = vsel %vm343_vm0, %v411_v41, 0.0 }
 0x127   :  { %v424_v56 = vadd.f32 %v423_v17, %v422_v33  ;;  %v441_v60 = vsel %vm343_vm0, %v412_v53, 0.0 }
 0x128   :  { %v443_v62 = vsel %vm343_vm0, %v413_v36, 0.0 }
 0x129   :  { %v426_v35 = vadd.f32 %v425_v2, %v424_v56  ;;  %v342_v56 = vld [vmem:[%s2673_s5 + $0x1] sm:$0x1] }
 0x12b   :  { %v428_v48 = vadd.f32 %v427_v40, %v426_v35 }
 0x12d   :  { %v430_v30 = vadd.f32 %v429_v29, %v428_v48 }
 0x12f   :  { %v432_v39 = vadd.f32 %v431_v31, %v430_v30 }
 0x131   :  { %v434_v5 = vadd.f32 %v433_v45, %v432_v39 }
 0x133   :  { %v436_v52 = vadd.f32 %v435_v46, %v434_v5 }
 0x135   :  { %v438_v55 = vadd.f32 %v437_v54, %v436_v52 }
 0x137   :  { %v440_v25 = vadd.f32 %v439_v57, %v438_v55 }
 0x139   :  { %v442_v61 = vadd.f32 %v441_v60, %v440_v25 }
 0x13b   :  { %v444_v47 = vadd.f32 %v443_v62, %v442_v61 }
 0x13d   :  { %v445_v15 = vrot.slane %v444_v47, 4 }
 0x13f   :  { %v446_v38 = vadd.f32 %v445_v15, %v444_v47 }
 0x141   :  { %v447_v8 = vrot.slane %v446_v38, 2 }
 0x143   :  { %v448_v10 = vadd.f32 %v447_v8, %v446_v38 }
 0x145   :  { %v449_v37 = vrot.slane %v448_v10, 1 }
 0x147   :  { %v450_v63 = vadd.f32 %v449_v37, %v448_v10 }
 0x149   :  { %v451_v11 = vmul.f32 0.0078125, %v450_v63 }
 0x14b   :  { %v452_v33 = vadd.f32 1e-05, %v451_v11 }
 0x14d   :  { %1837 = vrsqrt.f32 %v452_v33 }
 0x15a   :  { %v1838_v16 = vpop.eup %1837 }
 0x15b   :  { %v454_v17 = vmul.f32 %v1838_v16, %v341_v13 }
 0x15d   :  { %v455_v18 = vmul.f32 %v454_v17, %v2157_v43  ;;  %v460_v1 = vrot.slane %v454_v17, %v1979_v42 }
 0x15f   :  { %v456_v2 = vsub.f32 %v342_v56, %v455_v18  ;;  %v475_v35 = vmul.f32 %v460_v1, %v2151_v3  ;;  %v461_v50 = vmul.f32 %v460_v1, %v2023_v14  ;;  %v462_v20 = vmul.f32 %v460_v1, %v1999_v59  ;;  %v1830_v18 = vld [vmem:[%s2674_s3 + $0x10] sm:$0xff]  }
 0x160   :  { %v469_v40 = vmul.f32 %v460_v1, %v2099_v26  ;;  %v470_v48 = vmul.f32 %v460_v1, %v2107_v34  ;;  %v463_v4 = vmul.f32 %v460_v1, %v2003_v0  ;;  %v464_v23 = vmul.f32 %v460_v1, %v2046_v32 }
 0x161   :  { %v480_v29 = vrot.slane %v456_v2, %v1979_v42  ;;  %v471_v43 = vmul.f32 %v460_v1, %v2125_v58  ;;  %v472_v30 = vmul.f32 %v460_v1, %v2127_v27  ;;  %v465_v3 = vmul.f32 %v460_v1, %v2055_v51  ;;  %v1831_v2 = vld [vmem:[%s2674_s3 + $0x8] sm:$0xff]  }
 0x162   :  { %v466_v14 = vmul.f32 %v460_v1, %v2075_v22  ;;  %v473_v59 = vmul.f32 %v460_v1, %v2130_v7  ;;  %v474_v26 = vmul.f32 %v460_v1, %v2139_v24  ;;  %v467_v34 = vmul.f32 %v460_v1, %v2083_v12 }
 0x163   :  { %v495_v28 = vadd.f32 %v480_v29, %v475_v35  ;;  %v481_v0 = vadd.f32 %v480_v29, %v461_v50  ;;  %v482_v6 = vadd.f32 %v480_v29, %v462_v20  ;;  %v489_v32 = vadd.f32 %v480_v29, %v469_v40  ;;  %v1832_v20 = vld [vmem:[%s2674_s3] sm:$0xff]  }
 0x164   :  { %v490_v31 = vadd.f32 %v480_v29, %v470_v48  ;;  %v483_v39 = vadd.f32 %v480_v29, %v463_v4  ;;  %v484_v49 = vadd.f32 %v480_v29, %v464_v23  ;;  %v491_v58 = vadd.f32 %v480_v29, %v471_v43 }
 0x165   :  { %v497_v44 = vmax.f32 %v481_v0, 0.0  ;;  %v498_v27 = vmax.f32 %v482_v6, 0.0  ;;  %v505_v45 = vmax.f32 %v489_v32, 0.0  ;;  %v492_v51 = vadd.f32 %v480_v29, %v472_v30 }
 0x166   :  { %v506_v5 = vmax.f32 %v490_v31, 0.0  ;;  %v499_v22 = vmax.f32 %v483_v39, 0.0  ;;  %v500_v9 = vmax.f32 %v484_v49, 0.0  ;;  %v507_v7 = vmax.f32 %v491_v58, 0.0 }
 0x167   :  { %v513_v41 = vpack.c.bf16 %v498_v27, %v497_v44  ;;  %v508_v24 = vmax.f32 %v492_v51, 0.0  ;;  %v485_v46 = vadd.f32 %v480_v29, %v465_v3  ;;  %v486_v12 = vadd.f32 %v480_v29, %v466_v14 }
 0x168   :  { %v517_v52 = vpack.c.bf16 %v506_v5, %v505_v45  ;;  %v514_v53 = vpack.c.bf16 %v500_v9, %v499_v22  ;;  %v493_v54 = vadd.f32 %v480_v29, %v473_v59  ;;  %v494_v55 = vadd.f32 %v480_v29, %v474_v26 }
 0x169   :  { %1720 = vmatprep.mubr.msk.bf16.mxu0 %vm343_vm0, %v513_v41  ;;  %v518_v36 = vpack.c.bf16 %v508_v24, %v507_v7  ;;  %v501_v57 = vmax.f32 %v485_v46, 0.0  ;;  %v502_v25 = vmax.f32 %v486_v12, 0.0  ;;  %v468_v60 = vmul.f32 %v460_v1, %v2091_v19 }
 0x16a   :  { %1728 = vmatprep.mubr.msk.bf16.mxu1 %vm343_vm0, %v517_v52  ;;  %1721 = vmatmul.mubr.msk.bf16.vlgmr.msra.gmra.mxu0 %vm343_vm0, %v514_v53  ;;  %v509_v61 = vmax.f32 %v493_v54, 0.0  ;;  %v510_v62 = vmax.f32 %v494_v55, 0.0  ;;  %v487_v47 = vadd.f32 %v480_v29, %v467_v34  ;;  %v476_v15 = vmul.f32 %v460_v1, %v2149_v21  ;;  %v1829_v21 = vld [vmem:[%s2674_s3 + $0x18] sm:$0xff]  }
 0x16b   :  { %1729 = vmatmul.mubr.msk.bf16.vlgmr.msra.gmra.mxu1 %vm343_vm0, %v518_v36  ;;  %v515_v38 = vpack.c.bf16 %v502_v25, %v501_v57  ;;  %v488_v8 = vadd.f32 %v480_v29, %v468_v60  ;;  %v511_v19 = vmax.f32 %v495_v28, 0.0  ;;  %1736 = vmatprep.subr.bf16.mxu1 %v1829_v21 }
 0x16c   :  { %v519_v10 = vpack.c.bf16 %v510_v62, %v509_v61  ;;  %v503_v37 = vmax.f32 %v487_v47, 0.0  ;;  %v496_v63 = vadd.f32 %v480_v29, %v476_v15  ;;  %1737 = vmatpush3.bf16.msra.mxu1 %v1829_v21 }
 0x16d   :  { %1724 = vmatprep.mubr.msk.bf16.mxu0 %vm343_vm0, %v515_v38  ;;  %v504_v11 = vmax.f32 %v488_v8, 0.0  ;;  %1738 = vmatprep.subr.bf16.mxu1 %v1830_v18 }
 0x16e   :  { %1732 = vmatprep.mubr.msk.bf16.mxu1 %vm343_vm0, %v519_v10  ;;  %v512_v33 = vmax.f32 %v496_v63, 0.0 }
 0x16f   :  { %v516_v13 = vpack.c.bf16 %v504_v11, %v503_v37 }
 0x170   :  { %v520_v16 = vpack.c.bf16 %v512_v33, %v511_v19  ;;  %1739 = vmatpush3.bf16.msra.mxu1 %v1830_v18 }
 0x171   :  { %1740 = vmatprep.subr.bf16.mxu1 %v1831_v2 }
 0x172   :  { %1725 = vmatmul.mubr.msk.bf16.gmra.mxu0 %vm343_vm0, %v516_v13 }
 0x173   :  { %1733 = vmatmul.mubr.msk.bf16.gmra.mxu1 %vm343_vm0, %v520_v16 }
 0x174   :  { %1741 = vmatpush3.bf16.msra.mxu1 %v1831_v2 }
 0x175   :  { %1742 = vmatprep.subr.bf16.mxu1 %v1832_v20 }
 0x178   :  { %1743 = vmatpush3.bf16.msra.mxu1 %v1832_v20 }
 0x22a   :  { %v2243_v17 = vpop.f32.mrf.mxu0 }
 0x22b   :  { %v2245_v56 = vpop.f32.mrf.mxu1  ;;  %v679_v30 = vsel %vm343_vm0, %v2243_v17, 0.0 }
 0x22c   :  { %v2250_v1 = vpop.f32.mrf.mxu0  ;;  %v695_v24 = vsel %vm343_vm0, %v2245_v56, 0.0 }
 0x22d   :  { %v2255_v35 = vpop.f32.mrf.mxu1  ;;  %v676_v48 = vsel %vm343_vm0, %v2250_v1, 0.0 }
 0x22e   :  { %v2257_v50 = vpop.f32.mrf.mxu0  ;;  %v691_v5 = vsel %vm343_vm0, %v2255_v35, 0.0 }
 0x22f   :  { %v2268_v23 = vpop.f32.mrf.mxu1  ;;  %v681_v59 = vsel %vm343_vm0, %v2257_v50, 0.0 }
 0x230   :  { %v2262_v40 = vpop.f32.mrf.mxu0  ;;  %v697_v12 = vsel %vm343_vm0, %v2268_v23, 0.0 }
 0x231   :  { %v677_v4 = vsel %vm343_vm0, %v2262_v40, 0.0  ;;  %v2278_v26 = vpop.f32.mrf.mxu1 }
 0x232   :  { %v678_v29 = vadd.f32 %v677_v4, %v676_v48  ;;  %v2270_v43 = vpop.f32.mrf.mxu0  ;;  %v693_v9 = vsel %vm343_vm0, %v2278_v26, 0.0 }
 0x233   :  { %v2288_v39 = vpop.f32.mrf.mxu1  ;;  %v687_v58 = vsel %vm343_vm0, %v2270_v43, 0.0 }
 0x234   :  { %v680_v3 = vadd.f32 %v679_v30, %v678_v29  ;;  %v2274_v14 = vpop.f32.mrf.mxu0  ;;  %v703_v25 = vsel %vm343_vm0, %v2288_v39, 0.0 }
 0x235   :  { %v683_v0 = vsel %vm343_vm0, %v2274_v14, 0.0  ;;  %v2294_v45 = vpop.f32.mrf.mxu1 }
 0x236   :  { %v682_v34 = vadd.f32 %v681_v59, %v680_v3  ;;  %v2280_v28 = vpop.f32.mrf.mxu0  ;;  %v699_v54 = vsel %vm343_vm0, %v2294_v45, 0.0 }
 0x237   :  { %v689_v27 = vsel %vm343_vm0, %v2280_v28, 0.0  ;;  %v2300_v7 = vpop.f32.mrf.mxu1 }
 0x238   :  { %v684_v6 = vadd.f32 %v683_v0, %v682_v34  ;;  %v2284_v32 = vpop.f32.mrf.mxu0  ;;  %v705_v61 = vsel %vm343_vm0, %v2300_v7, 0.0 }
 0x239   :  { %v685_v31 = vsel %vm343_vm0, %v2284_v32, 0.0  ;;  %v2306_v52 = vpop.f32.mrf.mxu1 }
 0x23a   :  { %v686_v49 = vadd.f32 %v685_v31, %v684_v6  ;;  %v701_v36 = vsel %vm343_vm0, %v2306_v52, 0.0 }
 0x23c   :  { %v688_v44 = vadd.f32 %v687_v58, %v686_v49 }
 0x23e   :  { %v690_v51 = vadd.f32 %v689_v27, %v688_v44 }
 0x240   :  { %v692_v22 = vadd.f32 %v691_v5, %v690_v51 }
 0x242   :  { %v694_v41 = vadd.f32 %v693_v9, %v692_v22 }
 0x244   :  { %v696_v46 = vadd.f32 %v695_v24, %v694_v41 }
 0x246   :  { %v698_v53 = vadd.f32 %v697_v12, %v696_v46 }
 0x248   :  { %v700_v55 = vadd.f32 %v699_v54, %v698_v53 }
 0x24a   :  { %v702_v57 = vadd.f32 %v701_v36, %v700_v55 }
 0x24c   :  { %v704_v60 = vadd.f32 %v703_v25, %v702_v57 }
 0x24e   :  { %v706_v62 = vadd.f32 %v705_v61, %v704_v60 }
 0x250   :  { %v707_v47 = vrot.slane %v706_v62, 4 }
 0x252   :  { %v708_v15 = vadd.f32 %v707_v47, %v706_v62 }
 0x254   :  { %v709_v38 = vrot.slane %v708_v15, 2 }
 0x256   :  { %v710_v8 = vadd.f32 %v709_v38, %v708_v15 }
 0x258   :  { %v711_v10 = vrot.slane %v710_v8, 1 }
 0x25a   :  { %v712_v37 = vadd.f32 %v711_v10, %v710_v8 }
 0x25c   :  { %v2316_v63 = vmul.f32 0.0078125, %v712_v37 }
 0x25e   :  { %v714_v11 = vsub.f32 %v2250_v1, %v2316_v63  ;;  %v715_v19 = vsub.f32 %v2262_v40, %v2316_v63  ;;  %v716_v33 = vsub.f32 %v2243_v17, %v2316_v63  ;;  %v717_v13 = vsub.f32 %v2257_v50, %v2316_v63 }
 0x25f   :  { %v718_v18 = vsub.f32 %v2274_v14, %v2316_v63  ;;  %v719_v20 = vsub.f32 %v2284_v32, %v2316_v63  ;;  %v720_v3 = vsub.f32 %v2270_v43, %v2316_v63  ;;  %v721_v6 = vsub.f32 %v2280_v28, %v2316_v63 }
 0x260   :  { %v730_v16 = vmul.f32 %v714_v11, %v714_v11  ;;  %v731_v21 = vmul.f32 %v715_v19, %v715_v19  ;;  %v732_v2 = vmul.f32 %v716_v33, %v716_v33  ;;  %v733_v48 = vmul.f32 %v717_v13, %v717_v13 }
 0x261   :  { %v734_v59 = vmul.f32 %v718_v18, %v718_v18  ;;  %v735_v31 = vmul.f32 %v719_v20, %v719_v20  ;;  %v722_v44 = vsub.f32 %v2255_v35, %v2316_v63  ;;  %v736_v27 = vmul.f32 %v720_v3, %v720_v3 }
 0x262   :  { %v746_v4 = vsel %vm343_vm0, %v730_v16, 0.0  ;;  %v747_v29 = vsel %vm343_vm0, %v731_v21, 0.0  ;;  %v749_v34 = vsel %vm343_vm0, %v732_v2, 0.0  ;;  %v751_v49 = vsel %vm343_vm0, %v733_v48, 0.0 }
 0x263   :  { %v748_v30 = vadd.f32 %v747_v29, %v746_v4  ;;  %v753_v51 = vsel %vm343_vm0, %v734_v59, 0.0  ;;  %v723_v22 = vsub.f32 %v2278_v26, %v2316_v63  ;;  %v737_v9 = vmul.f32 %v721_v6, %v721_v6 }
 0x264   :  { %v755_v41 = vsel %vm343_vm0, %v735_v31, 0.0  ;;  %v724_v46 = vsub.f32 %v2245_v56, %v2316_v63  ;;  %v738_v12 = vmul.f32 %v722_v44, %v722_v44  ;;  %v757_v53 = vsel %vm343_vm0, %v736_v27, 0.0 }
 0x265   :  { %v750_v0 = vadd.f32 %v749_v34, %v748_v30  ;;  %v725_v55 = vsub.f32 %v2268_v23, %v2316_v63  ;;  %v739_v36 = vmul.f32 %v723_v22, %v723_v22  ;;  %v759_v57 = vsel %vm343_vm0, %v737_v9, 0.0  ;;  %v674_v22 = vld [vmem:[%s2673_s5 + $0x2] sm:$0x1] }
 0x266   :  { %v726_v60 = vsub.f32 %v2294_v45, %v2316_v63  ;;  %v740_v61 = vmul.f32 %v724_v46, %v724_v46  ;;  %v761_v62 = vsel %vm343_vm0, %v738_v12, 0.0  ;;  %v727_v15 = vsub.f32 %v2306_v52, %v2316_v63 }
 0x267   :  { %v752_v58 = vadd.f32 %v751_v49, %v750_v0  ;;  %v741_v38 = vmul.f32 %v725_v55, %v725_v55  ;;  %v763_v8 = vsel %vm343_vm0, %v739_v36, 0.0  ;;  %v728_v37 = vsub.f32 %v2288_v39, %v2316_v63 }
 0x268   :  { %v742_v11 = vmul.f32 %v726_v60, %v726_v60  ;;  %v765_v19 = vsel %vm343_vm0, %v740_v61, 0.0  ;;  %v729_v13 = vsub.f32 %v2300_v7, %v2316_v63  ;;  %v743_v16 = vmul.f32 %v727_v15, %v727_v15 }
 0x269   :  { %v754_v5 = vadd.f32 %v753_v51, %v752_v58  ;;  %v767_v21 = vsel %vm343_vm0, %v741_v38, 0.0  ;;  %v744_v2 = vmul.f32 %v728_v37, %v728_v37 }
 0x26a   :  { %v769_v20 = vsel %vm343_vm0, %v742_v11, 0.0  ;;  %v745_v4 = vmul.f32 %v729_v13, %v729_v13  ;;  %v771_v29 = vsel %vm343_vm0, %v743_v16, 0.0 }
 0x26b   :  { %v756_v24 = vadd.f32 %v755_v41, %v754_v5  ;;  %v773_v3 = vsel %vm343_vm0, %v744_v2, 0.0 }
 0x26c   :  { %v775_v34 = vsel %vm343_vm0, %v745_v4, 0.0 }
 0x26d   :  { %v758_v54 = vadd.f32 %v757_v53, %v756_v24  ;;  %v675_v24 = vld [vmem:[%s2673_s5 + $0x3] sm:$0x1] }
 0x26f   :  { %v760_v25 = vadd.f32 %v759_v57, %v758_v54 }
 0x271   :  { %v762_v47 = vadd.f32 %v761_v62, %v760_v25 }
 0x273   :  { %v764_v10 = vadd.f32 %v763_v8, %v762_v47 }
 0x275   :  { %v766_v33 = vadd.f32 %v765_v19, %v764_v10 }
 0x277   :  { %v768_v18 = vadd.f32 %v767_v21, %v766_v33 }
 0x279   :  { %v770_v48 = vadd.f32 %v769_v20, %v768_v18 }
 0x27b   :  { %v772_v30 = vadd.f32 %v771_v29, %v770_v48 }
 0x27d   :  { %v774_v59 = vadd.f32 %v773_v3, %v772_v30 }
 0x27f   :  { %v776_v0 = vadd.f32 %v775_v34, %v774_v59 }
 0x281   :  { %v777_v6 = vrot.slane %v776_v0, 4 }
 0x283   :  { %v778_v31 = vadd.f32 %v777_v6, %v776_v0 }
 0x285   :  { %v779_v49 = vrot.slane %v778_v31, 2 }
 0x287   :  { %v780_v58 = vadd.f32 %v779_v49, %v778_v31 }
 0x289   :  { %v781_v44 = vrot.slane %v780_v58, 1 }
 0x28b   :  { %v782_v27 = vadd.f32 %v781_v44, %v780_v58 }
 0x28d   :  { %v783_v51 = vmul.f32 0.0078125, %v782_v27 }
 0x28f   :  { %v784_v5 = vadd.f32 1e-05, %v783_v51 }
 0x291   :  { %1839 = vrsqrt.f32 %v784_v5 }
 0x29e   :  { %v1840_v9 = vpop.eup %1839 }
 0x29f   :  { %v786_v41 = vmul.f32 %v1840_v9, %v674_v22 }
 0x2a1   :  { %v787_v46 = vmul.f32 %v786_v41, %v2316_v63  ;;  %v792_v12 = vrot.slane %v786_v41, %v1979_v42 }
 0x2a3   :  { %v788_v53 = vsub.f32 %v675_v24, %v787_v46  ;;  %v793_v55 = vmul.f32 %v792_v12, %v2250_v1  ;;  %v794_v36 = vmul.f32 %v792_v12, %v2262_v40  ;;  %v795_v57 = vmul.f32 %v2243_v17, %v792_v12  ;;  %v1833_v24 = vld [vmem:[%s2675_s4 + $0x18] sm:$0xff]  }
 0x2a4   :  { %v796_v25 = vmul.f32 %v2257_v50, %v792_v12  ;;  %v797_v60 = vmul.f32 %v792_v12, %v2274_v14  ;;  %v798_v61 = vmul.f32 %v792_v12, %v2284_v32  ;;  %v799_v1 = vmul.f32 %v2270_v43, %v792_v12  ;;  %1760 = vmatprep.subr.bf16.mxu0 %v1833_v24 }
 0x2a5   :  { %v812_v54 = vrot.slane %v788_v53, %v1979_v42  ;;  %v800_v50 = vmul.f32 %v2280_v28, %v792_v12  ;;  %v801_v14 = vmul.f32 %v792_v12, %v2255_v35  ;;  %v802_v32 = vmul.f32 %v792_v12, %v2278_v26  ;;  %1761 = vmatpush3.bf16.msra.mxu0 %v1833_v24  ;;  %v1835_v53 = vld [vmem:[%s2675_s4 + $0x8] sm:$0xff]  }
 0x2a6   :  { %v803_v35 = vmul.f32 %v2245_v56, %v792_v12  ;;  %v804_v26 = vmul.f32 %v2268_v23, %v792_v12  ;;  %v806_v29 = vmul.f32 %v792_v12, %v2306_v52  ;;  %v805_v30 = vmul.f32 %v792_v12, %v2294_v45 }
 0x2a7   :  { %v813_v62 = vadd.f32 %v812_v54, %v793_v55  ;;  %v814_v47 = vadd.f32 %v812_v54, %v794_v36  ;;  %v815_v63 = vadd.f32 %v812_v54, %v795_v57  ;;  %v816_v15 = vadd.f32 %v812_v54, %v796_v25 }
 0x2a8   :  { %v817_v38 = vadd.f32 %v812_v54, %v797_v60  ;;  %v818_v8 = vadd.f32 %v812_v54, %v798_v61  ;;  %v819_v16 = vadd.f32 %v812_v54, %v799_v1  ;;  %v820_v21 = vadd.f32 %v812_v54, %v800_v50 }
 0x2a9   :  { %v829_v10 = vmax.f32 %v813_v62, 0.0  ;;  %v830_v37 = vmax.f32 %v814_v47, 0.0  ;;  %v831_v11 = vmax.f32 %v815_v63, 0.0  ;;  %v832_v40 = vmax.f32 %v816_v15, 0.0 }
 0x2aa   :  { %v833_v19 = vmax.f32 %v817_v38, 0.0  ;;  %v834_v17 = vmax.f32 %v818_v8, 0.0  ;;  %v821_v2 = vadd.f32 %v812_v54, %v801_v14  ;;  %v822_v20 = vadd.f32 %v812_v54, %v802_v32 }
 0x2ab   :  { %v845_v33 = vpack.c.bf16 %v830_v37, %v829_v10  ;;  %v846_v13 = vpack.c.bf16 %v832_v40, %v831_v11  ;;  %v835_v43 = vmax.f32 %v819_v16, 0.0  ;;  %v836_v48 = vmax.f32 %v820_v21, 0.0 }
 0x2ac   :  { %v847_v18 = vpack.c.bf16 %v834_v17, %v833_v19  ;;  %v837_v28 = vmax.f32 %v821_v2, 0.0  ;;  %v838_v4 = vmax.f32 %v822_v20, 0.0  ;;  %v823_v59 = vadd.f32 %v812_v54, %v803_v35 }
 0x2ad   :  { %1744 = vmatprep.mubr.msk.bf16.mxu1 %vm343_vm0, %v845_v33  ;;  %v848_v3 = vpack.c.bf16 %v836_v48, %v835_v43  ;;  %v824_v34 = vadd.f32 %v812_v54, %v804_v26  ;;  %v826_v0 = vadd.f32 %v812_v54, %v806_v29  ;;  %v825_v31 = vadd.f32 %v812_v54, %v805_v30 }
 0x2ae   :  { %1745 = vmatmul.mubr.msk.bf16.vlgmr.msra.gmra.mxu1 %vm343_vm0, %v846_v13  ;;  %v849_v6 = vpack.c.bf16 %v838_v4, %v837_v28  ;;  %v839_v49 = vmax.f32 %v823_v59, 0.0  ;;  %v807_v23 = vmul.f32 %v2288_v39, %v792_v12  ;;  %v808_v52 = vmul.f32 %v2300_v7, %v792_v12  ;;  %v1834_v7 = vld [vmem:[%s2675_s4 + $0x10] sm:$0xff]  }
 0x2af   :  { %1748 = vmatprep.mubr.msk.bf16.mxu1 %vm343_vm0, %v847_v18  ;;  %v840_v58 = vmax.f32 %v824_v34, 0.0  ;;  %v842_v44 = vmax.f32 %v826_v0, 0.0  ;;  %v841_v56 = vmax.f32 %v825_v31, 0.0  ;;  %1762 = vmatprep.subr.bf16.mxu0 %v1834_v7 }
 0x2b0   :  { %v827_v45 = vadd.f32 %v812_v54, %v807_v23  ;;  %v828_v51 = vadd.f32 %v812_v54, %v808_v52  ;;  %1763 = vmatpush3.bf16.msra.mxu0 %v1834_v7  ;;  %v1836_v54 = vld [vmem:[%s2675_s4] sm:$0xff]  }
 0x2b1   :  { %v850_v27 = vpack.c.bf16 %v840_v58, %v839_v49  ;;  %v851_v5 = vpack.c.bf16 %v842_v44, %v841_v56  ;;  %1764 = vmatprep.subr.bf16.mxu0 %v1835_v53 }
 0x2b2   :  { %v843_v22 = vmax.f32 %v827_v45, 0.0  ;;  %v844_v9 = vmax.f32 %v828_v51, 0.0 }
 0x2b4   :  { %v852_v41 = vpack.c.bf16 %v844_v9, %v843_v22  ;;  %1765 = vmatpush3.bf16.msra.mxu0 %v1835_v53 }
 0x2b5   :  { %1766 = vmatprep.subr.bf16.mxu0 %v1836_v54 }
 0x2b6   :  { %1749 = vmatmul.mubr.msk.bf16.gmra.mxu1 %vm343_vm0, %v848_v3 }
 0x2b7   :  { %1752 = vmatprep.mubr.msk.bf16.mxu1 %vm343_vm0, %v849_v6 }
 0x2b8   :  { %1767 = vmatpush3.bf16.msra.mxu0 %v1836_v54 }
 0x2be   :  { %1753 = vmatmul.mubr.msk.bf16.gmra.mxu1 %vm343_vm0, %v850_v27 }
 0x2bf   :  { %1756 = vmatprep.mubr.msk.bf16.mxu1 %vm343_vm0, %v851_v5 }
 0x2c6   :  { %1757 = vmatmul.mubr.msk.bf16.gmra.mxu1 %vm343_vm0, %v852_v41 }
 0x36e   :  { %v2402_v39 = vpop.f32.mrf.mxu1 }
 0x36f   :  { %v1011_v61 = vsel %vm343_vm0, %v2402_v39, 0.0 }
 0x370   :  { %v2407_v46 = vpop.f32.mrf.mxu1 }
 0x371   :  { %v1008_v36 = vsel %vm343_vm0, %v2407_v46, 0.0 }
 0x372   :  { %v2409_v12 = vpop.f32.mrf.mxu1 }
 0x373   :  { %v1013_v63 = vsel %vm343_vm0, %v2409_v12, 0.0 }
 0x374   :  { %v2417_v55 = vpop.f32.mrf.mxu1 }
 0x375   :  { %v1009_v57 = vsel %vm343_vm0, %v2417_v55, 0.0 }
 0x376   :  { %v1010_v25 = vadd.f32 %v1009_v57, %v1008_v36  ;;  %v2423_v60 = vpop.f32.mrf.mxu1 }
 0x377   :  { %v1019_v19 = vsel %vm343_vm0, %v2423_v60, 0.0 }
 0x378   :  { %v1012_v62 = vadd.f32 %v1011_v61, %v1010_v25  ;;  %v2427_v47 = vpop.f32.mrf.mxu1 }
 0x379   :  { %v1015_v8 = vsel %vm343_vm0, %v2427_v47, 0.0 }
 0x37a   :  { %v1014_v15 = vadd.f32 %v1013_v63, %v1012_v62  ;;  %v2431_v38 = vpop.f32.mrf.mxu1 }
 0x37b   :  { %v1021_v33 = vsel %vm343_vm0, %v2431_v38, 0.0 }
 0x37c   :  { %v1016_v10 = vadd.f32 %v1015_v8, %v1014_v15  ;;  %v2435_v37 = vpop.f32.mrf.mxu1 }
 0x37d   :  { %v1017_v11 = vsel %vm343_vm0, %v2435_v37, 0.0 }
 0x37e   :  { %v1018_v1 = vadd.f32 %v1017_v11, %v1016_v10  ;;  %v2439_v40 = vpop.f32.mrf.mxu1 }
 0x37f   :  { %v1027_v43 = vsel %vm343_vm0, %v2439_v40, 0.0 }
 0x380   :  { %v1020_v17 = vadd.f32 %v1019_v19, %v1018_v1  ;;  %v2443_v50 = vpop.f32.mrf.mxu1 }
 0x381   :  { %v1023_v13 = vsel %vm343_vm0, %v2443_v50, 0.0 }
 0x382   :  { %v1022_v14 = vadd.f32 %v1021_v33, %v1020_v17  ;;  %v2447_v32 = vpop.f32.mrf.mxu1 }
 0x383   :  { %v1029_v4 = vsel %vm343_vm0, %v2447_v32, 0.0 }
 0x384   :  { %v1024_v16 = vadd.f32 %v1023_v13, %v1022_v14  ;;  %v2451_v21 = vpop.f32.mrf.mxu1 }
 0x385   :  { %v1025_v18 = vsel %vm343_vm0, %v2451_v21, 0.0 }
 0x386   :  { %v1026_v2 = vadd.f32 %v1025_v18, %v1024_v16  ;;  %v2455_v20 = vpop.f32.mrf.mxu1 }
 0x387   :  { %v1035_v0 = vsel %vm343_vm0, %v2455_v20, 0.0 }
 0x388   :  { %v1028_v48 = vadd.f32 %v1027_v43, %v1026_v2  ;;  %v2459_v28 = vpop.f32.mrf.mxu1 }
 0x389   :  { %v1031_v29 = vsel %vm343_vm0, %v2459_v28, 0.0 }
 0x38a   :  { %v1030_v35 = vadd.f32 %v1029_v4, %v1028_v48  ;;  %v2463_v26 = vpop.f32.mrf.mxu1 }
 0x38b   :  { %v1037_v31 = vsel %vm343_vm0, %v2463_v26, 0.0 }
 0x38c   :  { %v1032_v30 = vadd.f32 %v1031_v29, %v1030_v35  ;;  %v2467_v3 = vpop.f32.mrf.mxu1 }
 0x38d   :  { %v1033_v59 = vsel %vm343_vm0, %v2467_v3, 0.0 }
 0x38e   :  { %v1034_v34 = vadd.f32 %v1033_v59, %v1032_v30 }
 0x390   :  { %v1036_v6 = vadd.f32 %v1035_v0, %v1034_v34 }
 0x392   :  { %v1038_v49 = vadd.f32 %v1037_v31, %v1036_v6 }
 0x394   :  { %v1039_v58 = vrot.slane %v1038_v49, 4 }
 0x396   :  { %v1040_v44 = vadd.f32 %v1039_v58, %v1038_v49 }
 0x398   :  { %v1041_v56 = vrot.slane %v1040_v44, 2 }
 0x39a   :  { %v1042_v23 = vadd.f32 %v1041_v56, %v1040_v44 }
 0x39c   :  { %v1043_v52 = vrot.slane %v1042_v23, 1 }
 0x39e   :  { %v1044_v27 = vadd.f32 %v1043_v52, %v1042_v23 }
 0x3a0   :  { %v2475_v45 = vmul.f32 0.0078125, %v1044_v27 }
 0x3a2   :  { %v1046_v51 = vsub.f32 %v2407_v46, %v2475_v45  ;;  %v1047_v5 = vsub.f32 %v2417_v55, %v2475_v45  ;;  %v1048_v22 = vsub.f32 %v2402_v39, %v2475_v45  ;;  %v1049_v9 = vsub.f32 %v2409_v12, %v2475_v45 }
 0x3a3   :  { %v1050_v7 = vsub.f32 %v2427_v47, %v2475_v45  ;;  %v1051_v54 = vsub.f32 %v2435_v37, %v2475_v45  ;;  %v1052_v62 = vsub.f32 %v2423_v60, %v2475_v45  ;;  %v1053_v10 = vsub.f32 %v2431_v38, %v2475_v45 }
 0x3a4   :  { %v1062_v41 = vmul.f32 %v1046_v51, %v1046_v51  ;;  %v1063_v24 = vmul.f32 %v1047_v5, %v1047_v5  ;;  %v1064_v53 = vmul.f32 %v1048_v22, %v1048_v22  ;;  %v1065_v36 = vmul.f32 %v1049_v9, %v1049_v9 }
 0x3a5   :  { %v1066_v63 = vmul.f32 %v1050_v7, %v1050_v7  ;;  %v1067_v11 = vmul.f32 %v1051_v54, %v1051_v54  ;;  %v1054_v17 = vsub.f32 %v2443_v50, %v2475_v45  ;;  %v1068_v33 = vmul.f32 %v1052_v62, %v1052_v62 }
 0x3a6   :  { %v1078_v57 = vsel %vm343_vm0, %v1062_v41, 0.0  ;;  %v1079_v25 = vsel %vm343_vm0, %v1063_v24, 0.0  ;;  %v1081_v15 = vsel %vm343_vm0, %v1064_v53, 0.0  ;;  %v1083_v1 = vsel %vm343_vm0, %v1065_v36, 0.0 }
 0x3a7   :  { %v1080_v61 = vadd.f32 %v1079_v25, %v1078_v57  ;;  %v1085_v14 = vsel %vm343_vm0, %v1066_v63, 0.0  ;;  %v1055_v16 = vsub.f32 %v2451_v21, %v2475_v45  ;;  %v1069_v18 = vmul.f32 %v1053_v10, %v1053_v10 }
 0x3a8   :  { %v1087_v2 = vsel %vm343_vm0, %v1067_v11, 0.0  ;;  %v1056_v48 = vsub.f32 %v2439_v40, %v2475_v45  ;;  %v1070_v4 = vmul.f32 %v1054_v17, %v1054_v17  ;;  %v1089_v35 = vsel %vm343_vm0, %v1068_v33, 0.0 }
 0x3a9   :  { %v1082_v8 = vadd.f32 %v1081_v15, %v1080_v61  ;;  %v1057_v30 = vsub.f32 %v2447_v32, %v2475_v45  ;;  %v1071_v59 = vmul.f32 %v1055_v16, %v1055_v16  ;;  %v1091_v34 = vsel %vm343_vm0, %v1069_v18, 0.0  ;;  %v1006_v16 = vld [vmem:[%s2673_s5 + $0x4] sm:$0x1] }
 0x3aa   :  { %v1058_v6 = vsub.f32 %v2459_v28, %v2475_v45  ;;  %v1072_v31 = vmul.f32 %v1056_v48, %v1056_v48  ;;  %v1093_v49 = vsel %vm343_vm0, %v1070_v4, 0.0  ;;  %v1059_v44 = vsub.f32 %v2467_v3, %v2475_v45 }
 0x3ab   :  { %v1084_v19 = vadd.f32 %v1083_v1, %v1082_v8  ;;  %v1073_v56 = vmul.f32 %v1057_v30, %v1057_v30  ;;  %v1095_v23 = vsel %vm343_vm0, %v1071_v59, 0.0  ;;  %v1060_v27 = vsub.f32 %v2455_v20, %v2475_v45 }
 0x3ac   :  { %v1074_v51 = vmul.f32 %v1058_v6, %v1058_v6  ;;  %v1097_v5 = vsel %vm343_vm0, %v1072_v31, 0.0  ;;  %v1061_v9 = vsub.f32 %v2463_v26, %v2475_v45  ;;  %v1075_v41 = vmul.f32 %v1059_v44, %v1059_v44 }
 0x3ad   :  { %v1086_v13 = vadd.f32 %v1085_v14, %v1084_v19  ;;  %v1099_v24 = vsel %vm343_vm0, %v1073_v56, 0.0  ;;  %v1076_v53 = vmul.f32 %v1060_v27, %v1060_v27 }
 0x3ae   :  { %v1101_v54 = vsel %vm343_vm0, %v1074_v51, 0.0  ;;  %v1077_v57 = vmul.f32 %v1061_v9, %v1061_v9  ;;  %v1103_v25 = vsel %vm343_vm0, %v1075_v41, 0.0 }
 0x3af   :  { %v1088_v43 = vadd.f32 %v1087_v2, %v1086_v13  ;;  %v1105_v62 = vsel %vm343_vm0, %v1076_v53, 0.0 }
 0x3b0   :  { %v1107_v15 = vsel %vm343_vm0, %v1077_v57, 0.0 }
 0x3b1   :  { %v1090_v29 = vadd.f32 %v1089_v35, %v1088_v43  ;;  %v1007_v43 = vld [vmem:[%s2673_s5 + $0x5] sm:$0x1] }
 0x3b3   :  { %v1092_v0 = vadd.f32 %v1091_v34, %v1090_v29 }
 0x3b5   :  { %v1094_v58 = vadd.f32 %v1093_v49, %v1092_v0 }
 0x3b7   :  { %v1096_v52 = vadd.f32 %v1095_v23, %v1094_v58 }
 0x3b9   :  { %v1098_v22 = vadd.f32 %v1097_v5, %v1096_v52 }
 0x3bb   :  { %v1100_v7 = vadd.f32 %v1099_v24, %v1098_v22 }
 0x3bd   :  { %v1102_v36 = vadd.f32 %v1101_v54, %v1100_v7 }
 0x3bf   :  { %v1104_v61 = vadd.f32 %v1103_v25, %v1102_v36 }
 0x3c1   :  { %v1106_v63 = vadd.f32 %v1105_v62, %v1104_v61 }
 0x3c3   :  { %v1108_v8 = vadd.f32 %v1107_v15, %v1106_v63 }
 0x3c5   :  { %v1109_v10 = vrot.slane %v1108_v8, 4 }
 0x3c7   :  { %v1110_v11 = vadd.f32 %v1109_v10, %v1108_v8 }
 0x3c9   :  { %v1111_v1 = vrot.slane %v1110_v11, 2 }
 0x3cb   :  { %v1112_v19 = vadd.f32 %v1111_v1, %v1110_v11 }
 0x3cd   :  { %v1113_v17 = vrot.slane %v1112_v19, 1 }
 0x3cf   :  { %v1114_v33 = vadd.f32 %v1113_v17, %v1112_v19 }
 0x3d1   :  { %v1115_v14 = vmul.f32 0.0078125, %v1114_v33 }
 0x3d3   :  { %v1116_v13 = vadd.f32 1e-05, %v1115_v14 }
 0x3d5   :  { %1841 = vrsqrt.f32 %v1116_v13 }
 0x3e2   :  { %v1842_v18 = vpop.eup %1841 }
 0x3e3   :  { %v1118_v2 = vmul.f32 %v1842_v18, %v1006_v16 }
 0x3e5   :  { %v1119_v48 = vmul.f32 %v1118_v2, %v2475_v45  ;;  %v1124_v4 = vrot.slane %v1118_v2, %v1979_v42 }
 0x3e7   :  { %v1120_v35 = vsub.f32 %v1007_v43, %v1119_v48  ;;  %v1125_v30 = vmul.f32 %v1124_v4, %v2407_v46  ;;  %v1126_v59 = vmul.f32 %v1124_v4, %v2417_v55  ;;  %v1127_v34 = vmul.f32 %v2402_v39, %v1124_v4 }
 0x3e8   :  { %v1128_v0 = vmul.f32 %v2409_v12, %v1124_v4  ;;  %v1129_v6 = vmul.f32 %v1124_v4, %v2427_v47  ;;  %v1130_v31 = vmul.f32 %v1124_v4, %v2435_v37  ;;  %v1131_v46 = vmul.f32 %v2423_v60, %v1124_v4 }
 0x3e9   :  { %v1144_v29 = vrot.slane %v1120_v35, %v1979_v42  ;;  %v1132_v55 = vmul.f32 %v2431_v38, %v1124_v4  ;;  %v1133_v47 = vmul.f32 %v1124_v4, %v2443_v50  ;;  %v1134_v37 = vmul.f32 %v1124_v4, %v2451_v21 }
 0x3ea   :  { %v1135_v50 = vmul.f32 %v2439_v40, %v1124_v4  ;;  %v1136_v21 = vmul.f32 %v2447_v32, %v1124_v4  ;;  %v1137_v25 = vmul.f32 %v1124_v4, %v2459_v28  ;;  %v1138_v61 = vmul.f32 %v1124_v4, %v2467_v3 }
 0x3eb   :  { %v1145_v49 = vadd.f32 %v1144_v29, %v1125_v30  ;;  %v1146_v58 = vadd.f32 %v1144_v29, %v1126_v59  ;;  %v1147_v45 = vadd.f32 %v1144_v29, %v1127_v34  ;;  %v1148_v44 = vadd.f32 %v1144_v29, %v1128_v0 }
 0x3ec   :  { %v1149_v56 = vadd.f32 %v1144_v29, %v1129_v6  ;;  %v1150_v23 = vadd.f32 %v1144_v29, %v1130_v31  ;;  %v1151_v41 = vadd.f32 %v1144_v29, %v1131_v46  ;;  %v1152_v24 = vadd.f32 %v1144_v29, %v1132_v55 }
 0x3ed   :  { %v1161_v52 = vmax.f32 %v1145_v49, 0.0  ;;  %v1162_v27 = vmax.f32 %v1146_v58, 0.0  ;;  %v1163_v51 = vmax.f32 %v1147_v45, 0.0  ;;  %v1164_v39 = vmax.f32 %v1148_v44, 0.0 }
 0x3ee   :  { %v1165_v5 = vmax.f32 %v1149_v56, 0.0  ;;  %v1166_v12 = vmax.f32 %v1150_v23, 0.0  ;;  %v1153_v53 = vadd.f32 %v1144_v29, %v1133_v47  ;;  %v1154_v54 = vadd.f32 %v1144_v29, %v1134_v37 }
 0x3ef   :  { %v1177_v22 = vpack.c.bf16 %v1162_v27, %v1161_v52  ;;  %v1178_v9 = vpack.c.bf16 %v1164_v39, %v1163_v51  ;;  %v1167_v60 = vmax.f32 %v1151_v41, 0.0  ;;  %v1168_v38 = vmax.f32 %v1152_v24, 0.0 }
 0x3f0   :  { %v1179_v7 = vpack.c.bf16 %v1166_v12, %v1165_v5  ;;  %v1169_v36 = vmax.f32 %v1153_v53, 0.0  ;;  %v1170_v57 = vmax.f32 %v1154_v54, 0.0  ;;  %v1155_v63 = vadd.f32 %v1144_v29, %v1135_v50 }
 0x3f1   :  { %1768 = vmatprep.mubr.msk.bf16.mxu0 %vm343_vm0, %v1177_v22  ;;  %v1180_v62 = vpack.c.bf16 %v1168_v38, %v1167_v60  ;;  %v1156_v15 = vadd.f32 %v1144_v29, %v1136_v21  ;;  %v1157_v8 = vadd.f32 %v1144_v29, %v1137_v25  ;;  %v1158_v10 = vadd.f32 %v1144_v29, %v1138_v61 }
 0x3f2   :  { %1769 = vmatmul.mubr.msk.bf16.vlgmr.msra.gmra.mxu0 %vm343_vm0, %v1178_v9  ;;  %v1181_v11 = vpack.c.bf16 %v1170_v57, %v1169_v36  ;;  %v1171_v1 = vmax.f32 %v1155_v63, 0.0  ;;  %v1139_v32 = vmul.f32 %v2455_v20, %v1124_v4  ;;  %v1140_v28 = vmul.f32 %v2463_v26, %v1124_v4 }
 0x3f3   :  { %1772 = vmatprep.mubr.msk.bf16.mxu0 %vm343_vm0, %v1179_v7  ;;  %v1172_v19 = vmax.f32 %v1156_v15, 0.0  ;;  %v1173_v17 = vmax.f32 %v1157_v8, 0.0  ;;  %v1174_v40 = vmax.f32 %v1158_v10, 0.0 }
 0x3f4   :  { %v1159_v3 = vadd.f32 %v1144_v29, %v1139_v32  ;;  %v1160_v14 = vadd.f32 %v1144_v29, %v1140_v28 }
 0x3f5   :  { %v1182_v33 = vpack.c.bf16 %v1172_v19, %v1171_v1  ;;  %v1183_v13 = vpack.c.bf16 %v1174_v40, %v1173_v17 }
 0x3f6   :  { %v1175_v16 = vmax.f32 %v1159_v3, 0.0  ;;  %v1176_v18 = vmax.f32 %v1160_v14, 0.0 }
 0x3f8   :  { %v1184_v2 = vpack.c.bf16 %v1176_v18, %v1175_v16 }
 0x3fa   :  { %1773 = vmatmul.mubr.msk.bf16.gmra.mxu0 %vm343_vm0, %v1180_v62 }
 0x3fb   :  { %1776 = vmatprep.mubr.msk.bf16.mxu0 %vm343_vm0, %v1181_v11 }
 0x402   :  { %1777 = vmatmul.mubr.msk.bf16.gmra.mxu0 %vm343_vm0, %v1182_v33 }
 0x403   :  { %1780 = vmatprep.mubr.msk.bf16.mxu0 %vm343_vm0, %v1183_v13 }
 0x40a   :  { %1781 = vmatmul.mubr.msk.bf16.gmra.mxu0 %vm343_vm0, %v1184_v2 }
 0x4b2   :  { %v2558_v43 = vpop.f32.mrf.mxu0 }
 0x4b4   :  { %v2560_v48 = vpop.f32.mrf.mxu0 }
 0x4b6   :  { %v2562_v20 = vpop.f32.mrf.mxu0 }
 0x4b8   :  { %v2564_v26 = vpop.f32.mrf.mxu0 }
 0x4b9   :  { %v1340_v4 = vadd.f32 %v2564_v26, %v2560_v48 }
 0x4ba   :  { %v2568_v35 = vpop.f32.mrf.mxu0 }
 0x4bb   :  { %v1341_v29 = vadd.f32 %v2558_v43, %v1340_v4 }
 0x4bc   :  { %v2571_v30 = vpop.f32.mrf.mxu0 }
 0x4bd   :  { %v1342_v59 = vadd.f32 %v2562_v20, %v1341_v29 }
 0x4be   :  { %v2574_v34 = vpop.f32.mrf.mxu0 }
 0x4bf   :  { %v1343_v0 = vadd.f32 %v1342_v59, %v2571_v30 }
 0x4c0   :  { %v2577_v6 = vpop.f32.mrf.mxu0 }
 0x4c1   :  { %v1344_v31 = vadd.f32 %v1343_v0, %v2577_v6 }
 0x4c2   :  { %v2580_v49 = vpop.f32.mrf.mxu0 }
 0x4c3   :  { %v1345_v58 = vadd.f32 %v2568_v35, %v1344_v31 }
 0x4c4   :  { %v2583_v45 = vpop.f32.mrf.mxu0 }
 0x4c5   :  { %v1346_v44 = vadd.f32 %v2574_v34, %v1345_v58 }
 0x4c6   :  { %v2586_v56 = vpop.f32.mrf.mxu0 }
 0x4c7   :  { %v1347_v23 = vadd.f32 %v1346_v44, %v2583_v45 }
 0x4c8   :  { %v2589_v52 = vpop.f32.mrf.mxu0 }
 0x4c9   :  { %v1348_v27 = vadd.f32 %v1347_v23, %v2589_v52 }
 0x4ca   :  { %v2592_v46 = vpop.f32.mrf.mxu0 }
 0x4cb   :  { %v1349_v55 = vadd.f32 %v2580_v49, %v1348_v27 }
 0x4cc   :  { %v2595_v51 = vpop.f32.mrf.mxu0 }
 0x4cd   :  { %v1350_v39 = vadd.f32 %v2586_v56, %v1349_v55 }
 0x4ce   :  { %v2598_v5 = vpop.f32.mrf.mxu0 }
 0x4cf   :  { %v1351_v12 = vadd.f32 %v1350_v39, %v2595_v51 }
 0x4d0   :  { %v2601_v22 = vpop.f32.mrf.mxu0 }
 0x4d1   :  { %v1352_v47 = vadd.f32 %v1351_v12, %v2601_v22 }
 0x4d3   :  { %v1353_v37 = vadd.f32 %v2592_v46, %v1352_v47 }
 0x4d5   :  { %v1354_v9 = vadd.f32 %v2598_v5, %v1353_v37 }
 0x4d7   :  { %v1355_v41 = vrot.slane %v1354_v9, 4 }
 0x4d9   :  { %v1356_v24 = vadd.f32 %v1355_v41, %v1354_v9 }
 0x4db   :  { %v1357_v7 = vrot.slane %v1356_v24, 2 }
 0x4dd   :  { %v1358_v53 = vadd.f32 %v1357_v7, %v1356_v24 }
 0x4df   :  { %v1359_v54 = vrot.slane %v1358_v53, 1 }
 0x4e1   :  { %v1360_v60 = vadd.f32 %v1359_v54, %v1358_v53 }
 0x4e3   :  { %v1361_v38 = vmul.f32 0.0078125, %v1360_v60 }
 0x4e5   :  { %v1362_v36 = vsub.f32 %v2560_v48, %v1361_v38  ;;  %v1363_v57 = vsub.f32 %v2564_v26, %v1361_v38  ;;  %v1364_v50 = vsub.f32 %v2558_v43, %v1361_v38  ;;  %v1365_v61 = vsub.f32 %v2562_v20, %v1361_v38 }
 0x4e6   :  { %v1366_v62 = vsub.f32 %v2571_v30, %v1361_v38  ;;  %v1367_v8 = vsub.f32 %v2577_v6, %v1361_v38  ;;  %v1368_v1 = vsub.f32 %v2568_v35, %v1361_v38  ;;  %v1369_v40 = vsub.f32 %v2574_v34, %v1361_v38 }
 0x4e7   :  { %v1378_v21 = vmul.f32 %v1362_v36, %v1362_v36  ;;  %v1379_v25 = vmul.f32 %v1363_v57, %v1363_v57  ;;  %v1380_v63 = vmul.f32 %v1364_v50, %v1364_v50  ;;  %v1381_v10 = vmul.f32 %v1365_v61, %v1365_v61 }
 0x4e8   :  { %v1382_v19 = vmul.f32 %v1366_v62, %v1366_v62  ;;  %v1383_v32 = vmul.f32 %v1367_v8, %v1367_v8  ;;  %v1370_v33 = vsub.f32 %v2583_v45, %v1361_v38  ;;  %v1384_v3 = vmul.f32 %v1368_v1, %v1368_v1  ;;  %v1338_v8 = vld [vmem:[%s2673_s5 + $0x6] sm:$0x1]  ;;  %v1339_v1 = vld [vmem:[%s2673_s5 + $0x7] sm:$0x1] }
 0x4e9   :  { %v1394_v15 = vadd.f32 %v1379_v25, %v1378_v21  ;;  %v1371_v13 = vsub.f32 %v2589_v52, %v1361_v38  ;;  %v1385_v16 = vmul.f32 %v1369_v40, %v1369_v40  ;;  %v1372_v2 = vsub.f32 %v2580_v49, %v1361_v38 }
 0x4ea   :  { %v1386_v4 = vmul.f32 %v1370_v33, %v1370_v33  ;;  %v1373_v59 = vsub.f32 %v2586_v56, %v1361_v38  ;;  %v1374_v58 = vsub.f32 %v2595_v51, %v1361_v38  ;;  %v1375_v27 = vsub.f32 %v2601_v22, %v1361_v38 }
 0x4eb   :  { %v1395_v11 = vadd.f32 %v1394_v15, %v1380_v63  ;;  %v1387_v0 = vmul.f32 %v1371_v13, %v1371_v13  ;;  %v1388_v44 = vmul.f32 %v1372_v2, %v1372_v2  ;;  %v1376_v12 = vsub.f32 %v2592_v46, %v1361_v38 }
 0x4ec   :  { %v1389_v55 = vmul.f32 %v1373_v59, %v1373_v59  ;;  %v1390_v47 = vmul.f32 %v1374_v58, %v1374_v58  ;;  %v1377_v9 = vsub.f32 %v2598_v5, %v1361_v38  ;;  %v1391_v41 = vmul.f32 %v1375_v27, %v1375_v27 }
 0x4ed   :  { %v1396_v17 = vadd.f32 %v1395_v11, %v1381_v10  ;;  %v1392_v7 = vmul.f32 %v1376_v12, %v1376_v12 }
 0x4ee   :  { %v1393_v54 = vmul.f32 %v1377_v9, %v1377_v9 }
 0x4ef   :  { %v1397_v28 = vadd.f32 %v1396_v17, %v1382_v19 }
 0x4f1   :  { %v1398_v14 = vadd.f32 %v1397_v28, %v1383_v32 }
 0x4f3   :  { %v1399_v18 = vadd.f32 %v1398_v14, %v1384_v3 }
 0x4f5   :  { %v1400_v29 = vadd.f32 %v1399_v18, %v1385_v16 }
 0x4f7   :  { %v1401_v31 = vadd.f32 %v1400_v29, %v1386_v4 }
 0x4f9   :  { %v1402_v23 = vadd.f32 %v1401_v31, %v1387_v0 }
 0x4fb   :  { %v1403_v39 = vadd.f32 %v1402_v23, %v1388_v44 }
 0x4fd   :  { %v1404_v37 = vadd.f32 %v1403_v39, %v1389_v55 }
 0x4ff   :  { %v1405_v24 = vadd.f32 %v1404_v37, %v1390_v47 }
 0x501   :  { %v1406_v53 = vadd.f32 %v1405_v24, %v1391_v41 }
 0x503   :  { %v1407_v60 = vadd.f32 %v1406_v53, %v1392_v7 }
 0x505   :  { %v1408_v36 = vadd.f32 %v1407_v60, %v1393_v54 }
 0x507   :  { %v1409_v57 = vrot.slane %v1408_v36, 4 }
 0x509   :  { %v1410_v50 = vadd.f32 %v1409_v57, %v1408_v36 }
 0x50b   :  { %v1411_v21 = vrot.slane %v1410_v50, 2 }
 0x50d   :  { %v1412_v25 = vadd.f32 %v1411_v21, %v1410_v50 }
 0x50f   :  { %v1413_v61 = vrot.slane %v1412_v25, 1 }
 0x511   :  { %v1414_v62 = vadd.f32 %v1413_v61, %v1412_v25 }
 0x513   :  { %v1415_v63 = vmul.f32 0.0078125, %v1414_v62 }
 0x515   :  { %v1416_v15 = vadd.f32 1e-05, %v1415_v63 }
 0x517   :  { %1843 = vrsqrt.f32 %v1416_v15 }
 0x524   :  { %v1844_v10 = vpop.eup %1843 }
 0x525   :  { %v1418_v11 = vmul.f32 %v1844_v10, %v1338_v8 }
 0x527   :  { %v1419_v19 = vmul.f32 %v1418_v11, %v1361_v38  ;;  %v1424_v17 = vrot.slane %v1418_v11, %v1979_v42 }
 0x529   :  { %v1420_v40 = vsub.f32 %v1339_v1, %v1419_v19  ;;  %v1425_v32 = vmul.f32 %v1424_v17, %v2560_v48  ;;  %v1426_v28 = vmul.f32 %v1424_v17, %v2564_v26  ;;  %v1427_v33 = vmul.f32 %v2558_v43, %v1424_v17 }
 0x52a   :  { %v1428_v3 = vmul.f32 %v2562_v20, %v1424_v17  ;;  %v1429_v14 = vmul.f32 %v1424_v17, %v2571_v30  ;;  %v1430_v13 = vmul.f32 %v1424_v17, %v2577_v6  ;;  %v1431_v16 = vmul.f32 %v2568_v35, %v1424_v17 }
 0x52b   :  { %v1432_v18 = vmul.f32 %v2574_v34, %v1424_v17  ;;  %v1433_v38 = vmul.f32 %v1424_v17, %v2583_v45  ;;  %v1434_v2 = vmul.f32 %v1424_v17, %v2589_v52  ;;  %v1435_v48 = vmul.f32 %v2580_v49, %v1424_v17 }
 0x52c   :  { %v1436_v26 = vmul.f32 %v2586_v56, %v1424_v17  ;;  %v1444_v43 = vrot.slane %v1420_v40, %v1979_v42  ;;  %v1437_v20 = vmul.f32 %v1424_v17, %v2595_v51  ;;  %v1438_v30 = vmul.f32 %v1424_v17, %v2601_v22 }
 0x52d   :  { %v1439_v6 = vmul.f32 %v2592_v46, %v1424_v17  ;;  %v1440_v35 = vmul.f32 %v2598_v5, %v1424_v17 }
 0x52e   :  { %v1445_v4 = vadd.f32 %v1444_v43, %v1425_v32  ;;  %v1446_v34 = vadd.f32 %v1444_v43, %v1426_v28  ;;  %v1447_v29 = vadd.f32 %v1444_v43, %v1427_v33  ;;  %v1448_v45 = vadd.f32 %v1444_v43, %v1428_v3 }
 0x52f   :  { %v1449_v59 = vadd.f32 %v1444_v43, %v1429_v14  ;;  %v1450_v52 = vadd.f32 %v1444_v43, %v1430_v13  ;;  %v1451_v0 = vadd.f32 %v1444_v43, %v1431_v16  ;;  %v1452_v49 = vadd.f32 %v1444_v43, %v1432_v18 }
 0x530   :  { %v1453_v31 = vadd.f32 %v1444_v43, %v1433_v38  ;;  %v1454_v56 = vadd.f32 %v1444_v43, %v1434_v2  ;;  %v1455_v58 = vadd.f32 %v1444_v43, %v1435_v48  ;;  %v1456_v42 = vadd.f32 %v1444_v43, %v1436_v26 }
 0x531   :  { %v1457_v44 = vadd.f32 %v1444_v43, %v1437_v20  ;;  %v1458_v51 = vadd.f32 %v1444_v43, %v1438_v30  ;;  %v1459_v23 = vadd.f32 %v1444_v43, %v1439_v6  ;;  %v1460_v22 = vadd.f32 %v1444_v43, %v1440_v35 }
 0x532   :  { %v1461_v27 = vmax.f32 %v1445_v4, 0.0  ;;  %v1462_v46 = vmax.f32 %v1446_v34, 0.0  ;;  %v1463_v55 = vmax.f32 %v1447_v29, 0.0  ;;  %v1464_v5 = vmax.f32 %v1448_v45, 0.0 }
 0x533   :  { %v1465_v39 = vmax.f32 %v1449_v59, 0.0  ;;  %v1466_v12 = vmax.f32 %v1450_v52, 0.0  ;;  %v1467_v47 = vmax.f32 %v1451_v0, 0.0  ;;  %v1468_v37 = vmax.f32 %v1452_v49, 0.0 }
 0x534   :  { %v1469_v9 = vmax.f32 %v1453_v31, 0.0  ;;  %v1470_v41 = vmax.f32 %v1454_v56, 0.0  ;;  %v1471_v24 = vmax.f32 %v1455_v58, 0.0  ;;  %v1472_v7 = vmax.f32 %v1456_v42, 0.0 }
 0x535   :  { %v1473_v53 = vmax.f32 %v1457_v44, 0.0  ;;  %v1474_v54 = vmax.f32 %v1458_v51, 0.0  ;;  %v1475_v60 = vmax.f32 %v1459_v23, 0.0  ;;  %v1476_v36 = vmax.f32 %v1460_v22, 0.0 }
 0x536   :  { %v1632_v57 = vpack.c.bf16 %v1462_v46, %v1461_v27  ;;  %v1637_v50 = vpack.c.bf16 %v1464_v5, %v1463_v55  ;;  %v1642_v21 = vpack.c.bf16 %v1466_v12, %v1465_v39  ;;  %v1647_v25 = vpack.c.bf16 %v1468_v37, %v1467_v47 }
 0x537   :  { %v1652_v61 = vpack.c.bf16 %v1470_v41, %v1469_v9  ;;  %v1657_v62 = vpack.c.bf16 %v1472_v7, %v1471_v24  ;;  %v1662_v63 = vpack.c.bf16 %v1474_v54, %v1473_v53  ;;  %v1667_v15 = vpack.c.bf16 %v1476_v36, %v1475_v60 }
 0x538   :  { %1633 = vst [vmem:[%s2676_s6] sm:$0xff] %v1632_v57   ;;  %1669 = vst [vmem:[%s2676_s6 + $0x8] sm:$0xff] %v1637_v50  }
 0x539   :  { %1670 = vst [vmem:[%s2676_s6 + $0x10] sm:$0xff] %v1642_v21   ;;  %1671 = vst [vmem:[%s2676_s6 + $0x18] sm:$0xff] %v1647_v25  }
 0x53a   :  { %1672 = vst [vmem:[%s2676_s6 + $0x20] sm:$0xff] %v1652_v61   ;;  %1673 = vst [vmem:[%s2676_s6 + $0x28] sm:$0xff] %v1657_v62  }
 0x53b   :  { %1674 = vst [vmem:[%s2676_s6 + $0x30] sm:$0xff] %v1662_v63   ;;  %1675 = vst [vmem:[%s2676_s6 + $0x38] sm:$0xff] %v1667_v15  }

// kernel: cls_model_forward.3
= control target key start
LH: loop header
LB: loop body
LE: loop exit
PB: predicated region body
PF: predicated region fallthrough
CT: control target
= control target key end

     0   :  { %10 = vsyncpa [#allocation6], 0  ;;  %s3145_s18 = smov 0   ;;  %s3147_s19 = smov 0   ;;  %s4095_s0 = inlined_call_operand.vmem [shape: bf16[128,128], index: 0, kind: input, shape index: {}]   ;;  %s4096_s1 = inlined_call_operand.vmem [shape: bf16[128,1024], index: 1, kind: input, shape index: {}]   ;;  %s4097_s2 = inlined_call_operand.vmem [shape: f32[2,1024], index: 2, kind: input, shape index: {}]   ;;  %s4098_s3 = inlined_call_operand.vmem [shape: bf16[1024,128], index: 3, kind: input, shape index: {}]   ;;  %s4099_s4 = inlined_call_operand.vmem [shape: f32[1,128], index: 4, kind: input, shape index: {}]   ;;  %s4100_s5 = inlined_call_operand.hbm [shape: f32[2,128], index: 5, kind: output, shape index: {}]  }
   0x1   :  { %s3149_s20 = smov 0  }
   0x2 LB: > { %s2704_s21 = sadd.s32 4294967295, %s3105_s20   ;;  %s28_s22 = sadd.s32 1, %s3101_s19  ;;  %s3105_s20 = sphi %s3149_s20, %s16_s20   ;;  %s3101_s19 = sphi %s3147_s19, %s4109_s19   ;;  %s3097_s18 = sphi %s3145_s18, %s4108_s18  }
   0x3   : > { %p30_p0 = scmp.ge.s32.totalorder %s28_s22, 2  ;;  %p2707_p1 = scmp.ge.s32.totalorder %s3105_s20, 1 }
   0x4   : > { %p200_p2 = scmp.lt.s32.totalorder %s3105_s20, 3 }
   0x5   : > { %s4111_s22 = smov (%p30_p0, %s28_s22), 0 }
   0x6   : > { %p201_p3 = pnand %p2707_p1, %p200_p2 }
   0x7   : > { %s2708_s23 = sshll.u32 (!%p201_p3), %s3097_s18, 3  ;;  %p233_p4 = scmp.eq.s32.totalorder (!%p201_p3), %s3097_s18, 0 }
   0x8   : > { %204 = sbr.rel (%p201_p3) target bundleno = 685 (0x2ad), region = 40  ;;  %p226_p5 = scmp.lt.s32.totalorder (!%p201_p3), %s2708_s23, 15 }
   0xd   : > { %s4113_s23 = smov (!%p226_p5, %s2708_s23), 15  ;;  %238 = sbr.rel (!%p233_p4) target bundleno = 18 (0x12), region = 44  ;;  %v3107_v0 = vmov (%p233_p4), 0.0   ;;  %v3108_v1 = vmov (%p233_p4), -inf   ;;  %v3109_v2 = vmov (%p233_p4), inf  }
   0xe   : > { %s2709_s24 = sshll.u32 %s4113_s23, 2  ;;  %239 = vst [vmem:[#allocation2] sm:$0xff] (%p233_p4), %v3107_v0  ;;  %240 = vst [vmem:[#allocation2 + $0x8] sm:$0xff] (%p233_p4), %v3107_v0 }
   0xf   : > { %s3171_s27 = scalar_lea.vmem %s4095_s0, %s2709_s24  ;;  %241 = vst [vmem:[#allocation3] sm:$0xff] (%p233_p4), %v3108_v1  ;;  %242 = vst [vmem:[#allocation3 + $0x8] sm:$0xff] (%p233_p4), %v3108_v1 }
  0x10   : > { %243 = vst [vmem:[#allocation4] sm:$0xff] (%p233_p4), %v3109_v2  ;;  %244 = vst [vmem:[#allocation4 + $0x8] sm:$0xff] (%p233_p4), %v3109_v2 }
  0x12 PF: > { %v309_v3 = vld [vmem:[%s4096_s1 + $0x1c0] sm:$0xff]  ;;  %v310_v5 = vld [vmem:[%s4096_s1 + $0x1c8] sm:$0xff]  ;;  %v3110_v11 = vmov 0   ;;  %v311_v2 = vld [vmem:[%s4096_s1 + $0x1d0] sm:$0xff]  ;;  %p1687_p6 = scmp.eq.s32.totalorder %s3097_s18, 1  ;;  %s1351_s17 = sand.u32 1, %s3097_s18 }
  0x13   : > { %v313_v4 = vld [vmem:[%s4096_s1 + $0x1e0] sm:$0xff]  ;;  %v314_v7 = vld [vmem:[%s4096_s1 + $0x1e8] sm:$0xff]  ;;  %693 = vmatprep.mubr.bf16.mxu0 %v3110_v11  ;;  %766 = vmatprep.mubr.bf16.mxu1 %v3110_v11 }
  0x14   : > { %v2772_v6 = vcombine.high %v309_v3, %v313_v4  ;;  %v2771_v8 = vcombine.low %v309_v3, %v313_v4  ;;  %v301_v9 = vld [vmem:[%s4096_s1 + $0x180] sm:$0xff]  ;;  %v2774_v12 = vcombine.high %v310_v5, %v314_v7  ;;  %v2773_v13 = vcombine.low %v310_v5, %v314_v7  ;;  %v302_v15 = vld [vmem:[%s4096_s1 + $0x188] sm:$0xff]  ;;  %v315_v3 = vld [vmem:[%s4096_s1 + $0x1f0] sm:$0xff] }
  0x15   : > { %v305_v10 = vld [vmem:[%s4096_s1 + $0x1a0] sm:$0xff]  ;;  %v306_v16 = vld [vmem:[%s4096_s1 + $0x1a8] sm:$0xff]  ;;  %v312_v4 = vld [vmem:[%s4096_s1 + $0x1d8] sm:$0xff] }
  0x16   : > { %v2764_v14 = vcombine.high %v301_v9, %v305_v10  ;;  %v293_v17 = vld [vmem:[%s4096_s1 + $0x140] sm:$0xff]  ;;  %661 = vmatprep.subr.bf16.mxu0 %v2772_v6  ;;  %v2766_v18 = vcombine.high %v302_v15, %v306_v16  ;;  %v294_v20 = vld [vmem:[%s4096_s1 + $0x148] sm:$0xff]  ;;  %734 = vmatprep.subr.bf16.mxu1 %v2774_v12  ;;  %v2763_v22 = vcombine.low %v301_v9, %v305_v10  ;;  %v316_v5 = vld [vmem:[%s4096_s1 + $0x1f8] sm:$0xff] }
  0x17   : > { %v297_v19 = vld [vmem:[%s4096_s1 + $0x160] sm:$0xff]  ;;  %v298_v21 = vld [vmem:[%s4096_s1 + $0x168] sm:$0xff]  ;;  %662 = vmatpush1.bf16.msra.mxu0 %v2771_v8  ;;  %735 = vmatpush1.bf16.msra.mxu1 %v2773_v13  ;;  %v2765_v23 = vcombine.low %v302_v15, %v306_v16  ;;  %v2776_v8 = vcombine.high %v311_v2, %v315_v3  ;;  %v2778_v9 = vcombine.high %v312_v4, %v316_v5  ;;  %v303_v10 = vld [vmem:[%s4096_s1 + $0x190] sm:$0xff] }
  0x18   : > { %663 = vmatprep.subr.bf16.mxu0 %v2764_v14  ;;  %v2756_v24 = vcombine.high %v293_v17, %v297_v19  ;;  %736 = vmatprep.subr.bf16.mxu1 %v2766_v18  ;;  %v2758_v25 = vcombine.high %v294_v20, %v298_v21  ;;  %v285_v26 = vld [vmem:[%s4096_s1 + $0x100] sm:$0xff]  ;;  %v286_v28 = vld [vmem:[%s4096_s1 + $0x108] sm:$0xff]  ;;  %v2755_v30 = vcombine.low %v293_v17, %v297_v19  ;;  %v307_v12 = vld [vmem:[%s4096_s1 + $0x1b0] sm:$0xff] }
  0x19   : > { %v289_v27 = vld [vmem:[%s4096_s1 + $0x120] sm:$0xff]  ;;  %v290_v29 = vld [vmem:[%s4096_s1 + $0x128] sm:$0xff]  ;;  %v2757_v31 = vcombine.low %v294_v20, %v298_v21  ;;  %v304_v14 = vld [vmem:[%s4096_s1 + $0x198] sm:$0xff]  ;;  %v2775_v16 = vcombine.low %v311_v2, %v315_v3  ;;  %v2777_v17 = vcombine.low %v312_v4, %v316_v5  ;;  %v2768_v18 = vcombine.high %v303_v10, %v307_v12 }
  0x1a   : > { %v2748_v32 = vcombine.high %v285_v26, %v289_v27  ;;  %v2750_v33 = vcombine.high %v286_v28, %v290_v29  ;;  %v277_v34 = vld [vmem:[%s4096_s1 + $0xc0] sm:$0xff]  ;;  %v278_v36 = vld [vmem:[%s4096_s1 + $0xc8] sm:$0xff]  ;;  %v2747_v38 = vcombine.low %v285_v26, %v289_v27  ;;  %v2749_v39 = vcombine.low %v286_v28, %v290_v29  ;;  %v308_v15 = vld [vmem:[%s4096_s1 + $0x1b8] sm:$0xff] }
  0x1b   : > { %664 = vmatpush1.bf16.msra.mxu0 %v2763_v22  ;;  %737 = vmatpush1.bf16.msra.mxu1 %v2765_v23  ;;  %v281_v35 = vld [vmem:[%s4096_s1 + $0xe0] sm:$0xff]  ;;  %v282_v37 = vld [vmem:[%s4096_s1 + $0xe8] sm:$0xff]  ;;  %v2770_v19 = vcombine.high %v304_v14, %v308_v15  ;;  %v295_v20 = vld [vmem:[%s4096_s1 + $0x150] sm:$0xff] }
  0x1c   : > { %665 = vmatprep.subr.bf16.mxu0 %v2756_v24  ;;  %738 = vmatprep.subr.bf16.mxu1 %v2758_v25  ;;  %v2740_v40 = vcombine.high %v277_v34, %v281_v35  ;;  %v269_v41 = vld [vmem:[%s4096_s1 + $0x80] sm:$0xff]  ;;  %v2742_v42 = vcombine.high %v278_v36, %v282_v37  ;;  %v270_v44 = vld [vmem:[%s4096_s1 + $0x88] sm:$0xff]  ;;  %v2739_v46 = vcombine.low %v277_v34, %v281_v35  ;;  %v299_v21 = vld [vmem:[%s4096_s1 + $0x170] sm:$0xff] }
  0x1d   : > { %v273_v43 = vld [vmem:[%s4096_s1 + $0xa0] sm:$0xff]  ;;  %v274_v45 = vld [vmem:[%s4096_s1 + $0xa8] sm:$0xff]  ;;  %v2741_v47 = vcombine.low %v278_v36, %v282_v37  ;;  %v296_v22 = vld [vmem:[%s4096_s1 + $0x158] sm:$0xff]  ;;  %v2767_v24 = vcombine.low %v303_v10, %v307_v12  ;;  %v2769_v25 = vcombine.low %v304_v14, %v308_v15  ;;  %v2760_v26 = vcombine.high %v295_v20, %v299_v21 }
  0x1e   : > { %v2732_v48 = vcombine.high %v269_v41, %v273_v43  ;;  %v261_v49 = vld [vmem:[%s4096_s1 + $0x40] sm:$0xff]  ;;  %v2734_v50 = vcombine.high %v270_v44, %v274_v45  ;;  %v262_v52 = vld [vmem:[%s4096_s1 + $0x48] sm:$0xff]  ;;  %v2731_v54 = vcombine.low %v269_v41, %v273_v43  ;;  %v2733_v55 = vcombine.low %v270_v44, %v274_v45  ;;  %v300_v23 = vld [vmem:[%s4096_s1 + $0x178] sm:$0xff] }
  0x1f   : > { %666 = vmatpush1.bf16.msra.mxu0 %v2755_v30  ;;  %739 = vmatpush1.bf16.msra.mxu1 %v2757_v31  ;;  %v265_v51 = vld [vmem:[%s4096_s1 + $0x60] sm:$0xff]  ;;  %v266_v53 = vld [vmem:[%s4096_s1 + $0x68] sm:$0xff]  ;;  %v2762_v27 = vcombine.high %v296_v22, %v300_v23  ;;  %v287_v28 = vld [vmem:[%s4096_s1 + $0x110] sm:$0xff]  ;;  %v2761_v34 = vcombine.low %v296_v22, %v300_v23  ;;  %v1073_v12 = vlaneseq }
  0x20   : > { %667 = vmatprep.subr.bf16.mxu0 %v2748_v32  ;;  %740 = vmatprep.subr.bf16.mxu1 %v2750_v33  ;;  %v2724_v56 = vcombine.high %v261_v49, %v265_v51  ;;  %v2726_v57 = vcombine.high %v262_v52, %v266_v53  ;;  %v253_v58 = vld [vmem:[%s4096_s1] sm:$0xff]  ;;  %v254_v60 = vld [vmem:[%s4096_s1 + $0x8] sm:$0xff]  ;;  %v2723_v62 = vcombine.low %v261_v49, %v265_v51  ;;  %v291_v29 = vld [vmem:[%s4096_s1 + $0x130] sm:$0xff] }
  0x21   : > { %v257_v59 = vld [vmem:[%s4096_s1 + $0x20] sm:$0xff]  ;;  %v258_v61 = vld [vmem:[%s4096_s1 + $0x28] sm:$0xff]  ;;  %v2725_v63 = vcombine.low %v262_v52, %v266_v53  ;;  %v288_v31 = vld [vmem:[%s4096_s1 + $0x118] sm:$0xff]  ;;  %v2759_v33 = vcombine.low %v295_v20, %v299_v21  ;;  %v2752_v35 = vcombine.high %v287_v28, %v291_v29  ;;  %v2751_v41 = vcombine.low %v287_v28, %v291_v29 }
  0x22   : > { %v2716_v0 = vcombine.high %v253_v58, %v257_v59  ;;  %v2718_v1 = vcombine.high %v254_v60, %v258_v61  ;;  %v2715_v6 = vcombine.low %v253_v58, %v257_v59  ;;  %v2717_v7 = vcombine.low %v254_v60, %v258_v61  ;;  %v3290_v13 = vld [vmem:[%s3171_s27] sm:$0xff]   ;;  %v3321_v30 = vld [vmem:[%s3171_s27 + $0x8] sm:$0xff]   ;;  %v292_v32 = vld [vmem:[%s4096_s1 + $0x138] sm:$0xff] }
  0x23   : > { %668 = vmatpush1.bf16.msra.mxu0 %v2747_v38  ;;  %741 = vmatpush1.bf16.msra.mxu1 %v2749_v39  ;;  %v2754_v36 = vcombine.high %v288_v31, %v292_v32  ;;  %v279_v37 = vld [vmem:[%s4096_s1 + $0xd0] sm:$0xff]  ;;  %v280_v39 = vld [vmem:[%s4096_s1 + $0xd8] sm:$0xff]  ;;  %v3397_v15 = vshrl.u32 %v1073_v12, 7 }
  0x24   : > { %669 = vmatprep.subr.bf16.mxu0 %v2740_v40  ;;  %742 = vmatprep.subr.bf16.mxu1 %v2742_v42  ;;  %v283_v38 = vld [vmem:[%s4096_s1 + $0xf0] sm:$0xff]  ;;  %v284_v40 = vld [vmem:[%s4096_s1 + $0xf8] sm:$0xff]  ;;  %v2753_v42 = vcombine.low %v288_v31, %v292_v32 }
  0x25   : > { %v2744_v43 = vcombine.high %v279_v37, %v283_v38  ;;  %v2746_v44 = vcombine.high %v280_v39, %v284_v40  ;;  %v271_v45 = vld [vmem:[%s4096_s1 + $0x90] sm:$0xff]  ;;  %v276_v49 = vld [vmem:[%s4096_s1 + $0xb8] sm:$0xff]  ;;  %v2745_v51 = vcombine.low %v280_v39, %v284_v40 }
  0x26   : > { %v260_v2 = vld [vmem:[%s4096_s1 + $0x38] sm:$0xff] }
  0x27   : > { %670 = vmatpush1.bf16.msra.mxu0 %v2739_v46  ;;  %743 = vmatpush1.bf16.msra.mxu1 %v2741_v47  ;;  %v275_v46 = vld [vmem:[%s4096_s1 + $0xb0] sm:$0xff] }
  0x28   : > { %671 = vmatprep.subr.bf16.mxu0 %v2732_v48  ;;  %744 = vmatprep.subr.bf16.mxu1 %v2734_v50  ;;  %v2983_v47 = vld [vmem:[%s3171_s27 + $0x10] sm:$0xff]   ;;  %v272_v48 = vld [vmem:[%s4096_s1 + $0x98] sm:$0xff]  ;;  %v2743_v50 = vcombine.low %v279_v37, %v283_v38  ;;  %v2736_v52 = vcombine.high %v271_v45, %v275_v46  ;;  %v2735_v58 = vcombine.low %v271_v45, %v275_v46 }
  0x29   : > { %v2738_v53 = vcombine.high %v272_v48, %v276_v49  ;;  %v2737_v59 = vcombine.low %v272_v48, %v276_v49 }
  0x2b   : > { %672 = vmatpush1.bf16.msra.mxu0 %v2731_v54  ;;  %745 = vmatpush1.bf16.msra.mxu1 %v2733_v55  ;;  %v263_v54 = vld [vmem:[%s4096_s1 + $0x50] sm:$0xff] }
  0x2c   : > { %673 = vmatprep.subr.bf16.mxu0 %v2724_v56  ;;  %746 = vmatprep.subr.bf16.mxu1 %v2726_v57  ;;  %v267_v55 = vld [vmem:[%s4096_s1 + $0x70] sm:$0xff]  ;;  %v264_v56 = vld [vmem:[%s4096_s1 + $0x58] sm:$0xff] }
  0x2d   : > { %v268_v57 = vld [vmem:[%s4096_s1 + $0x78] sm:$0xff]  ;;  %v2728_v60 = vcombine.high %v263_v54, %v267_v55  ;;  %v2727_v3 = vcombine.low %v263_v54, %v267_v55 }
  0x2e   : > { %v2730_v61 = vcombine.high %v264_v56, %v268_v57  ;;  %v2729_v4 = vcombine.low %v264_v56, %v268_v57 }
  0x2f   : > { %674 = vmatpush1.bf16.msra.mxu0 %v2723_v62  ;;  %747 = vmatpush1.bf16.msra.mxu1 %v2725_v63  ;;  %v255_v62 = vld [vmem:[%s4096_s1 + $0x10] sm:$0xff] }
  0x30   : > { %675 = vmatprep.subr.bf16.mxu0 %v2716_v0  ;;  %748 = vmatprep.subr.bf16.mxu1 %v2718_v1  ;;  %v259_v63 = vld [vmem:[%s4096_s1 + $0x30] sm:$0xff]  ;;  %v2984_v0 = vld [vmem:[%s3171_s27 + $0x18] sm:$0xff]   ;;  %s1348_s27 = sshra.s32 %s3097_s18, 1 }
  0x31   : > { %v256_v1 = vld [vmem:[%s4096_s1 + $0x18] sm:$0xff]  ;;  %v2720_v5 = vcombine.high %v255_v62, %v259_v63  ;;  %s2853_s23 = sshll.u32 %s1348_s27, 4 }
  0x32   : > { %s3748_s24 = sadd.s32 %s2853_s23, %s1351_s17 }
  0x33   : > { %676 = vmatpush1.bf16.msra.mxu0 %v2715_v6  ;;  %749 = vmatpush1.bf16.msra.mxu1 %v2717_v7  ;;  %v2722_v6 = vcombine.high %v256_v1, %v260_v2  ;;  %v2719_v7 = vcombine.low %v255_v62, %v259_v63  ;;  %s1355_s25 = scalar_lea.vmem [#allocation3], %s3748_s24  ;;  %s1521_s26 = scalar_lea.vmem [#allocation4], %s3748_s24 }
  0x34   : > { %807 = vmatprep.subr.bf16.mxu0 %v2776_v8  ;;  %880 = vmatprep.subr.bf16.mxu1 %v2778_v9  ;;  %v2721_v8 = vcombine.low %v256_v1, %v260_v2  ;;  %v3111_v9 = vmov 1966171168  }
  0x35   : > { %v1071_v10 = vunpack.c.l.s4 %v3111_v9 }
  0x36   : > { %694 = vmatmul.mubr.bf16.vlgmr.msra.gmra.mxu0 %v3290_v13  ;;  %767 = vmatmul.mubr.bf16.vlgmr.msra.gmra.mxu1 %v3290_v13 }
  0x37   : > { %808 = vmatpush1.bf16.msra.mxu0 %v2775_v16  ;;  %881 = vmatpush1.bf16.msra.mxu1 %v2777_v17  ;;  %v1072_v14 = vunpack.c.0.s8 %v1071_v10 }
  0x38   : > { %809 = vmatprep.subr.bf16.mxu0 %v2768_v18  ;;  %882 = vmatprep.subr.bf16.mxu1 %v2770_v19 }
  0x39   : > { %703 = vmatprep.mubr.bf16.mxu0 %v3110_v11  ;;  %776 = vmatprep.mubr.bf16.mxu1 %v3110_v11  ;;  %v3400_v22 = vsub.s32 %v1072_v14, %v3397_v15 }
  0x3b   : > { %810 = vmatpush1.bf16.msra.mxu0 %v2767_v24  ;;  %883 = vmatpush1.bf16.msra.mxu1 %v2769_v25 }
  0x3c   : > { %811 = vmatprep.subr.bf16.mxu0 %v2760_v26  ;;  %884 = vmatprep.subr.bf16.mxu1 %v2762_v27 }
  0x3e   : > { %704 = vmatmul.mubr.bf16.gmra.mxu0 %v3321_v30  ;;  %777 = vmatmul.mubr.bf16.gmra.mxu1 %v3321_v30 }
  0x3f   : > { %812 = vmatpush1.bf16.msra.mxu0 %v2759_v33  ;;  %885 = vmatpush1.bf16.msra.mxu1 %v2761_v34 }
  0x40   : > { %813 = vmatprep.subr.bf16.mxu0 %v2752_v35  ;;  %886 = vmatprep.subr.bf16.mxu1 %v2754_v36 }
  0x41   : > { %713 = vmatprep.mubr.bf16.mxu0 %v3110_v11  ;;  %786 = vmatprep.mubr.bf16.mxu1 %v3110_v11 }
  0x43   : > { %814 = vmatpush1.bf16.msra.mxu0 %v2751_v41  ;;  %887 = vmatpush1.bf16.msra.mxu1 %v2753_v42 }
  0x44   : > { %815 = vmatprep.subr.bf16.mxu0 %v2744_v43  ;;  %888 = vmatprep.subr.bf16.mxu1 %v2746_v44 }
  0x46   : > { %714 = vmatmul.mubr.bf16.gmra.mxu0 %v2983_v47  ;;  %787 = vmatmul.mubr.bf16.gmra.mxu1 %v2983_v47 }
  0x47   : > { %816 = vmatpush1.bf16.msra.mxu0 %v2743_v50  ;;  %889 = vmatpush1.bf16.msra.mxu1 %v2745_v51 }
  0x48   : > { %817 = vmatprep.subr.bf16.mxu0 %v2736_v52  ;;  %890 = vmatprep.subr.bf16.mxu1 %v2738_v53 }
  0x49   : > { %723 = vmatprep.mubr.bf16.mxu0 %v3110_v11  ;;  %796 = vmatprep.mubr.bf16.mxu1 %v3110_v11 }
  0x4b   : > { %818 = vmatpush1.bf16.msra.mxu0 %v2735_v58  ;;  %891 = vmatpush1.bf16.msra.mxu1 %v2737_v59 }
  0x4c   : > { %819 = vmatprep.subr.bf16.mxu0 %v2728_v60  ;;  %892 = vmatprep.subr.bf16.mxu1 %v2730_v61 }
  0x4e   : > { %724 = vmatmul.mubr.bf16.gmra.mxu0 %v2984_v0  ;;  %797 = vmatmul.mubr.bf16.gmra.mxu1 %v2984_v0 }
  0x4f   : > { %820 = vmatpush1.bf16.msra.mxu0 %v2727_v3  ;;  %893 = vmatpush1.bf16.msra.mxu1 %v2729_v4 }
  0x50   : > { %821 = vmatprep.subr.bf16.mxu0 %v2720_v5  ;;  %894 = vmatprep.subr.bf16.mxu1 %v2722_v6 }
  0x51   : > { %839 = vmatprep.mubr.bf16.mxu0 %v3110_v11  ;;  %912 = vmatprep.mubr.bf16.mxu1 %v3110_v11 }
  0x53   : > { %822 = vmatpush1.bf16.msra.mxu0 %v2719_v7  ;;  %895 = vmatpush1.bf16.msra.mxu1 %v2721_v8 }
  0x56   : > { %840 = vmatmul.mubr.bf16.vlgmr.msra.gmra.mxu0 %v3290_v13  ;;  %913 = vmatmul.mubr.bf16.vlgmr.msra.gmra.mxu1 %v3290_v13 }
  0x57   : > { %849 = vmatprep.mubr.bf16.mxu0 %v3110_v11  ;;  %922 = vmatprep.mubr.bf16.mxu1 %v3110_v11 }
  0x5e   : > { %850 = vmatmul.mubr.bf16.gmra.mxu0 %v3321_v30  ;;  %923 = vmatmul.mubr.bf16.gmra.mxu1 %v3321_v30 }
  0x5f   : > { %859 = vmatprep.mubr.bf16.mxu0 %v3110_v11  ;;  %932 = vmatprep.mubr.bf16.mxu1 %v3110_v11 }
  0x66   : > { %860 = vmatmul.mubr.bf16.gmra.mxu0 %v2983_v47  ;;  %933 = vmatmul.mubr.bf16.gmra.mxu1 %v2983_v47 }
  0x67   : > { %869 = vmatprep.mubr.bf16.mxu0 %v3110_v11  ;;  %942 = vmatprep.mubr.bf16.mxu1 %v3110_v11 }
  0x6e   : > { %870 = vmatmul.mubr.bf16.gmra.mxu0 %v2984_v0  ;;  %943 = vmatmul.mubr.bf16.gmra.mxu1 %v2984_v0 }
  0xf6   : > { %v695_v13 = vpop.f32.mrf.mxu0  ;;  %v768_v16 = vpop.f32.mrf.mxu1 }
  0xf7   : > { %v1120_v19 = vmul.f32 %v695_v13, %v695_v13  ;;  %v1122_v20 = vmul.f32 %v768_v16, %v768_v16 }
  0xf8   : > { %v697_v17 = vpop.f32.mrf.mxu0  ;;  %v770_v18 = vpop.f32.mrf.mxu1 }
  0xf9   : > { %v1121_v23 = vmul.f32 %v697_v17, %v697_v17  ;;  %v1123_v11 = vmul.f32 %v770_v18, %v770_v18 }
  0xfa   : > { %v699_v21 = vpop.f32.mrf.mxu0  ;;  %v772_v26 = vpop.f32.mrf.mxu1 }
  0xfb   : > { %v954_v24 = vadd.f32 %v699_v21, %v695_v13  ;;  %v1128_v25 = vmul.f32 %v699_v21, %v699_v21  ;;  %v1357_v27 = vmax.f32 %v695_v13, %v699_v21  ;;  %v1523_v28 = vmin.f32 %v695_v13, %v699_v21 }
  0xfc   : > { %v980_v29 = vadd.f32 %v772_v26, %v768_v16  ;;  %v1130_v30 = vmul.f32 %v772_v26, %v772_v26  ;;  %v701_v31 = vpop.f32.mrf.mxu0  ;;  %v1383_v33 = vmax.f32 %v768_v16, %v772_v26  ;;  %v1549_v34 = vmin.f32 %v768_v16, %v772_v26  ;;  %v774_v36 = vpop.f32.mrf.mxu1 }
  0xfd   : > { %v1184_v32 = vadd.f32 %v1128_v25, %v1120_v19  ;;  %v1129_v35 = vmul.f32 %v701_v31, %v701_v31  ;;  %v967_v38 = vadd.f32 %v701_v31, %v697_v17  ;;  %v1370_v39 = vmax.f32 %v697_v17, %v701_v31 }
  0xfe   : > { %v1210_v37 = vadd.f32 %v1130_v30, %v1122_v20  ;;  %v1131_v40 = vmul.f32 %v774_v36, %v774_v36  ;;  %v705_v41 = vpop.f32.mrf.mxu0  ;;  %v1536_v43 = vmin.f32 %v697_v17, %v701_v31  ;;  %v993_v44 = vadd.f32 %v774_v36, %v770_v18  ;;  %v778_v46 = vpop.f32.mrf.mxu1 }
  0xff   : > { %v1197_v42 = vadd.f32 %v1129_v35, %v1121_v23  ;;  %v1396_v45 = vmax.f32 %v770_v18, %v774_v36  ;;  %v1562_v48 = vmin.f32 %v770_v18, %v774_v36  ;;  %v955_v49 = vadd.f32 %v954_v24, %v705_v41 }
 0x100   : > { %v1223_v47 = vadd.f32 %v1131_v40, %v1123_v11  ;;  %v1136_v50 = vmul.f32 %v705_v41, %v705_v41  ;;  %v707_v51 = vpop.f32.mrf.mxu0  ;;  %v1358_v52 = vmax.f32 %v1357_v27, %v705_v41  ;;  %v1524_v53 = vmin.f32 %v1523_v28, %v705_v41  ;;  %v780_v56 = vpop.f32.mrf.mxu1 }
 0x101   : > { %v981_v54 = vadd.f32 %v980_v29, %v778_v46  ;;  %v1138_v55 = vmul.f32 %v778_v46, %v778_v46  ;;  %v1384_v58 = vmax.f32 %v1383_v33, %v778_v46  ;;  %v1550_v59 = vmin.f32 %v1549_v34, %v778_v46 }
 0x102   : > { %v1185_v57 = vadd.f32 %v1184_v32, %v1136_v50  ;;  %v1137_v60 = vmul.f32 %v707_v51, %v707_v51  ;;  %v709_v61 = vpop.f32.mrf.mxu0  ;;  %v968_v63 = vadd.f32 %v967_v38, %v707_v51  ;;  %v1371_v0 = vmax.f32 %v1370_v39, %v707_v51  ;;  %v782_v2 = vpop.f32.mrf.mxu1 }
 0x103   : > { %v1211_v62 = vadd.f32 %v1210_v37, %v1138_v55  ;;  %v1139_v1 = vmul.f32 %v780_v56, %v780_v56  ;;  %v1537_v4 = vmin.f32 %v1536_v43, %v707_v51  ;;  %v994_v5 = vadd.f32 %v993_v44, %v780_v56 }
 0x104   : > { %v1198_v3 = vadd.f32 %v1197_v42, %v1137_v60  ;;  %v1397_v6 = vmax.f32 %v1396_v45, %v780_v56  ;;  %v711_v7 = vpop.f32.mrf.mxu0  ;;  %v1563_v9 = vmin.f32 %v1562_v48, %v780_v56  ;;  %v956_v10 = vadd.f32 %v955_v49, %v709_v61  ;;  %v784_v13 = vpop.f32.mrf.mxu1 }
 0x105   : > { %v1224_v8 = vadd.f32 %v1223_v47, %v1139_v1  ;;  %v1144_v12 = vmul.f32 %v709_v61, %v709_v61  ;;  %v1359_v14 = vmax.f32 %v1358_v52, %v709_v61  ;;  %v1525_v16 = vmin.f32 %v1524_v53, %v709_v61 }
 0x106   : > { %v982_v17 = vadd.f32 %v981_v54, %v782_v2  ;;  %v1146_v18 = vmul.f32 %v782_v2, %v782_v2  ;;  %v715_v19 = vpop.f32.mrf.mxu0  ;;  %v1385_v21 = vmax.f32 %v1384_v58, %v782_v2  ;;  %v1551_v23 = vmin.f32 %v1550_v59, %v782_v2  ;;  %v788_v24 = vpop.f32.mrf.mxu1 }
 0x107   : > { %v1186_v20 = vadd.f32 %v1185_v57, %v1144_v12  ;;  %v1145_v11 = vmul.f32 %v711_v7, %v711_v7  ;;  %v969_v26 = vadd.f32 %v968_v63, %v711_v7  ;;  %v1372_v27 = vmax.f32 %v1371_v0, %v711_v7 }
 0x108   : > { %v1212_v25 = vadd.f32 %v1211_v62, %v1146_v18  ;;  %v1147_v28 = vmul.f32 %v784_v13, %v784_v13  ;;  %v717_v29 = vpop.f32.mrf.mxu0  ;;  %v1538_v31 = vmin.f32 %v1537_v4, %v711_v7  ;;  %v995_v32 = vadd.f32 %v994_v5, %v784_v13  ;;  %v790_v34 = vpop.f32.mrf.mxu1 }
 0x109   : > { %v1199_v30 = vadd.f32 %v1198_v3, %v1145_v11  ;;  %v1398_v33 = vmax.f32 %v1397_v6, %v784_v13  ;;  %v1564_v36 = vmin.f32 %v1563_v9, %v784_v13  ;;  %v957_v37 = vadd.f32 %v956_v10, %v715_v19 }
 0x10a   : > { %v1225_v35 = vadd.f32 %v1224_v8, %v1147_v28  ;;  %v1152_v38 = vmul.f32 %v715_v19, %v715_v19  ;;  %v719_v39 = vpop.f32.mrf.mxu0  ;;  %v1360_v40 = vmax.f32 %v1359_v14, %v715_v19  ;;  %v1526_v41 = vmin.f32 %v1525_v16, %v715_v19  ;;  %v792_v44 = vpop.f32.mrf.mxu1 }
 0x10b   : > { %v983_v42 = vadd.f32 %v982_v17, %v788_v24  ;;  %v1154_v43 = vmul.f32 %v788_v24, %v788_v24  ;;  %v1386_v46 = vmax.f32 %v1385_v21, %v788_v24  ;;  %v1552_v47 = vmin.f32 %v1551_v23, %v788_v24 }
 0x10c   : > { %v1187_v45 = vadd.f32 %v1186_v20, %v1152_v38  ;;  %v1153_v48 = vmul.f32 %v717_v29, %v717_v29  ;;  %v721_v49 = vpop.f32.mrf.mxu0  ;;  %v970_v51 = vadd.f32 %v969_v26, %v717_v29  ;;  %v1373_v52 = vmax.f32 %v1372_v27, %v717_v29  ;;  %v3403_v54 = vpop.f32.mrf.mxu1 }
 0x10d   : > { %v1213_v50 = vadd.f32 %v1212_v25, %v1154_v43  ;;  %v1155_v53 = vmul.f32 %v790_v34, %v790_v34  ;;  %v1539_v56 = vmin.f32 %v1538_v31, %v717_v29  ;;  %v996_v57 = vadd.f32 %v995_v32, %v790_v34 }
 0x10e   : > { %v1200_v55 = vadd.f32 %v1199_v30, %v1153_v48  ;;  %v1399_v58 = vmax.f32 %v1398_v33, %v790_v34  ;;  %v725_v59 = vpop.f32.mrf.mxu0  ;;  %v3405_v61 = vmin.f32 %v1564_v36, %v790_v34  ;;  %v958_v62 = vadd.f32 %v957_v37, %v719_v39  ;;  %v798_v0 = vpop.f32.mrf.mxu1 }
 0x10f   : > { %v1226_v60 = vadd.f32 %v1225_v35, %v1155_v53  ;;  %v1160_v63 = vmul.f32 %v719_v39, %v719_v39  ;;  %v1361_v1 = vmax.f32 %v1360_v40, %v719_v39  ;;  %v1527_v2 = vmin.f32 %v1526_v41, %v719_v39 }
 0x110   : > { %v984_v3 = vadd.f32 %v983_v42, %v792_v44  ;;  %v1162_v4 = vmul.f32 %v792_v44, %v792_v44  ;;  %v1387_v6 = vmax.f32 %v1386_v46, %v792_v44  ;;  %v1553_v7 = vmin.f32 %v1552_v47, %v792_v44  ;;  %v727_v9 = vpop.f32.mrf.mxu0  ;;  %v3411_v20 = vpop.f32.mrf.mxu1 }
 0x111   : > { %v1188_v5 = vadd.f32 %v1187_v45, %v1160_v63  ;;  %v1161_v8 = vmul.f32 %v721_v49, %v721_v49  ;;  %v971_v12 = vadd.f32 %v970_v51, %v721_v49  ;;  %v1374_v13 = vmax.f32 %v1373_v52, %v721_v49 }
 0x112   : > { %v1214_v10 = vadd.f32 %v1213_v50, %v1162_v4  ;;  %v1163_v14 = vmul.f32 %v3403_v54, %v3403_v54  ;;  %v1540_v17 = vmin.f32 %v1539_v56, %v721_v49  ;;  %v997_v18 = vadd.f32 %v996_v57, %v3403_v54  ;;  %v729_v29 = vpop.f32.mrf.mxu0  ;;  %v802_v38 = vpop.f32.mrf.mxu1 }
 0x113   : > { %v1201_v16 = vadd.f32 %v1200_v55, %v1161_v8  ;;  %v1400_v19 = vmax.f32 %v1399_v58, %v3403_v54  ;;  %v1566_v23 = vmin.f32 %v3405_v61, %v3403_v54  ;;  %v959_v11 = vadd.f32 %v958_v62, %v725_v59 }
 0x114   : > { %v3413_v21 = vadd.f32 %v1226_v60, %v1163_v14  ;;  %v1168_v24 = vmul.f32 %v725_v59, %v725_v59  ;;  %v1362_v25 = vmax.f32 %v1361_v1, %v725_v59  ;;  %v1528_v26 = vmin.f32 %v1527_v2, %v725_v59  ;;  %v3433_v47 = vpop.f32.mrf.mxu0  ;;  %v3435_v57 = vpop.f32.mrf.mxu1 }
 0x115   : > { %v985_v27 = vadd.f32 %v984_v3, %v798_v0  ;;  %v1170_v28 = vmul.f32 %v798_v0, %v798_v0  ;;  %v1388_v31 = vmax.f32 %v1387_v6, %v798_v0  ;;  %v1554_v32 = vmin.f32 %v1553_v7, %v798_v0 }
 0x116   : > { %v1189_v30 = vadd.f32 %v1188_v5, %v1168_v24  ;;  %v1169_v33 = vmul.f32 %v727_v9, %v727_v9  ;;  %v3417_v35 = vadd.f32 %v971_v12, %v727_v9  ;;  %v3419_v36 = vmax.f32 %v1374_v13, %v727_v9  ;;  %v3437_v3 = vpop.f32.mrf.mxu0  ;;  %v3439_v13 = vpop.f32.mrf.mxu1 }
 0x117   : > { %v1215_v34 = vadd.f32 %v1214_v10, %v1170_v28  ;;  %v3421_v37 = vmin.f32 %v1540_v17, %v727_v9  ;;  %v3426_v40 = vadd.f32 %v997_v18, %v3411_v20  ;;  %v1171_v41 = vmul.f32 %v3411_v20, %v3411_v20 }
 0x118   : > { %v3423_v39 = vadd.f32 %v1201_v16, %v1169_v33  ;;  %v960_v42 = vadd.f32 %v959_v11, %v729_v29  ;;  %v3431_v43 = vmax.f32 %v1400_v19, %v3411_v20  ;;  %v1176_v44 = vmul.f32 %v729_v29, %v729_v29 }
 0x119   : > { %v1363_v45 = vmax.f32 %v1362_v25, %v729_v29  ;;  %v1529_v46 = vmin.f32 %v1528_v26, %v729_v29  ;;  %v986_v49 = vadd.f32 %v985_v27, %v802_v38  ;;  %v1178_v50 = vmul.f32 %v802_v38, %v802_v38  ;;  %v3441_v26 = vpop.f32.mrf.mxu0 }
 0x11a   : > { %v961_v48 = vrot.slane %v960_v42, 4  ;;  %v1389_v51 = vmax.f32 %v1388_v31, %v802_v38  ;;  %v1190_v52 = vadd.f32 %v1189_v30, %v1176_v44  ;;  %v1555_v56 = vmin.f32 %v1554_v32, %v802_v38  ;;  %v3445_v38 = vpop.f32.mrf.mxu1 }
 0x11b   : > { %v1364_v53 = vrot.slane %v1363_v45, 4  ;;  %v1530_v55 = vrot.slane %v1529_v46, 4  ;;  %v987_v59 = vrot.slane %v986_v49, 4  ;;  %v1216_v60 = vadd.f32 %v1215_v34, %v1178_v50 }
 0x11c   : > { %v962_v58 = vadd.f32 %v961_v48, %v960_v42  ;;  %v1390_v62 = vrot.slane %v1389_v51, 4  ;;  %v1191_v63 = vrot.slane %v1190_v52, 4  ;;  %v1556_v2 = vrot.slane %v1555_v56, 4 }
 0x11d   : > { %v1365_v0 = vmax.f32 %v1363_v45, %v1364_v53  ;;  %v1531_v1 = vmin.f32 %v1529_v46, %v1530_v55  ;;  %v988_v5 = vadd.f32 %v987_v59, %v986_v49  ;;  %v1217_v6 = vrot.slane %v1216_v60, 4 }
 0x11e   : > { %v963_v4 = vrot.slane %v962_v58, 2  ;;  %v1391_v7 = vmax.f32 %v1389_v51, %v1390_v62  ;;  %v1192_v8 = vadd.f32 %v1191_v63, %v1190_v52  ;;  %v1557_v12 = vmin.f32 %v1555_v56, %v1556_v2  ;;  %v3458_v52 = vpop.f32.mrf.mxu0  ;;  %v3474_v56 = vpop.f32.mrf.mxu1 }
 0x11f   : > { %v1366_v9 = vrot.slane %v1365_v0, 2  ;;  %v1532_v10 = vrot.slane %v1531_v1, 2  ;;  %v989_v16 = vrot.slane %v988_v5, 2  ;;  %v1218_v17 = vadd.f32 %v1217_v6, %v1216_v60 }
 0x120   : > { %v964_v14 = vadd.f32 %v963_v4, %v962_v58  ;;  %v1392_v18 = vrot.slane %v1391_v7, 2  ;;  %v1193_v19 = vrot.slane %v1192_v8, 2  ;;  %v1558_v25 = vrot.slane %v1557_v12, 2 }
 0x121   : > { %v1367_v11 = vmax.f32 %v1365_v0, %v1366_v9  ;;  %v1533_v24 = vmin.f32 %v1531_v1, %v1532_v10  ;;  %v990_v28 = vadd.f32 %v989_v16, %v988_v5  ;;  %v1219_v29 = vrot.slane %v1218_v17, 2  ;;  %v3487_v1 = vpop.f32.mrf.mxu0 }
 0x122   : > { %v965_v27 = vrot.slane %v964_v14, 1  ;;  %v1393_v30 = vmax.f32 %v1391_v7, %v1392_v18  ;;  %v1194_v31 = vadd.f32 %v1193_v19, %v1192_v8  ;;  %v3443_v34 = vmin.f32 %v1557_v12, %v1558_v25  ;;  %v3490_v8 = vpop.f32.mrf.mxu1 }
 0x123   : > { %v1368_v32 = vrot.slane %v1367_v11, 1  ;;  %v1534_v33 = vrot.slane %v1533_v24, 1  ;;  %v1567_v42 = vmin.f32 %v1566_v23, %v3411_v20  ;;  %v991_v44 = vrot.slane %v990_v28, 1  ;;  %v3492_v18 = vpop.f32.mrf.mxu0 }
 0x124   : > { %v3451_v45 = vadd.f32 %v1219_v29, %v1218_v17  ;;  %v1394_v46 = vrot.slane %v1393_v30, 1  ;;  %v1228_v48 = vadd.f32 %v3413_v21, %v1171_v41  ;;  %v3454_v49 = vadd.f32 %v965_v27, %v964_v14 }
 0x125   : > { %v1195_v50 = vrot.slane %v1194_v31, 1  ;;  %v3456_v51 = vmax.f32 %v1367_v11, %v1368_v32  ;;  %v3460_v53 = vmin.f32 %v1533_v24, %v1534_v33  ;;  %v3462_v55 = vadd.f32 %v991_v44, %v990_v28 }
 0x126   : > { %v1560_v54 = vrot.slane %v3443_v34, 1  ;;  %v973_v61 = vadd.f32 %v3417_v35, %v3433_v47  ;;  %v1221_v20 = vrot.slane %v3451_v45, 1  ;;  %v3468_v23 = vmax.f32 %v1393_v30, %v1394_v46  ;;  %v3494_v30 = vpop.f32.mrf.mxu1 }
 0x127   : > { %v1177_v21 = vmul.f32 %v3433_v47, %v3433_v47  ;;  %v1376_v41 = vmax.f32 %v3419_v36, %v3433_v47  ;;  %v3476_v58 = vadd.f32 %v1195_v50, %v1194_v31  ;;  %v1542_v60 = vmin.f32 %v3421_v37, %v3433_v47 }
 0x128   : > { %v974_v59 = vrot.slane %v973_v61, 4  ;;  %v999_v35 = vadd.f32 %v3426_v40, %v3435_v57  ;;  %v1179_v0 = vmul.f32 %v3435_v57, %v3435_v57  ;;  %v1402_v36 = vmax.f32 %v3431_v43, %v3435_v57 }
 0x129   : > { %v1203_v62 = vadd.f32 %v3423_v39, %v1177_v21  ;;  %v1377_v63 = vrot.slane %v1376_v41, 4  ;;  %v1543_v4 = vrot.slane %v1542_v60, 4  ;;  %v1568_v6 = vmin.f32 %v1567_v42, %v3435_v57 }
 0x12a   : > { %v975_v2 = vadd.f32 %v974_v59, %v973_v61  ;;  %v1000_v5 = vrot.slane %v999_v35, 4  ;;  %v1229_v7 = vadd.f32 %v1228_v48, %v1179_v0  ;;  %v1403_v40 = vrot.slane %v1402_v36, 4  ;;  %v3496_v61 = vpop.f32.mrf.mxu0 }
 0x12b   : > { %v1204_v37 = vrot.slane %v1203_v62, 4  ;;  %v1378_v47 = vmax.f32 %v1376_v41, %v1377_v63  ;;  %v1544_v9 = vmin.f32 %v1542_v60, %v1543_v4  ;;  %v1569_v12 = vrot.slane %v1568_v6, 4 }
 0x12c   : > { %v976_v39 = vrot.slane %v975_v2, 2  ;;  %v1001_v10 = vadd.f32 %v1000_v5, %v999_v35  ;;  %v1230_v43 = vrot.slane %v1229_v7, 4  ;;  %v1404_v17 = vmax.f32 %v1402_v36, %v1403_v40  ;;  %v3498_v36 = vpop.f32.mrf.mxu1 }
 0x12d   : > { %v1205_v14 = vadd.f32 %v1204_v37, %v1203_v62  ;;  %v1379_v16 = vrot.slane %v1378_v47, 2  ;;  %v1545_v11 = vrot.slane %v1544_v9, 2  ;;  %v1570_v57 = vmin.f32 %v1568_v6, %v1569_v12 }
 0x12e   : > { %v977_v19 = vadd.f32 %v976_v39, %v975_v2  ;;  %v1002_v24 = vrot.slane %v1001_v10, 2  ;;  %v1231_v28 = vadd.f32 %v1230_v43, %v1229_v7  ;;  %v1405_v29 = vrot.slane %v1404_v17, 2  ;;  %v3502_v39 = vpop.f32.mrf.mxu0  ;;  %v3512_v43 = vpop.f32.mrf.mxu1 }
 0x12f   : > { %v1206_v25 = vrot.slane %v1205_v14, 2  ;;  %v1380_v27 = vmax.f32 %v1378_v47, %v1379_v16  ;;  %v1546_v32 = vmin.f32 %v1544_v9, %v1545_v11  ;;  %v1571_v42 = vrot.slane %v1570_v57, 2 }
 0x130   : > { %v978_v31 = vrot.slane %v977_v19, 1  ;;  %v1003_v33 = vadd.f32 %v1002_v24, %v1001_v10  ;;  %v1232_v48 = vrot.slane %v1231_v28, 2  ;;  %v1406_v50 = vmax.f32 %v1404_v17, %v1405_v29  ;;  %v3514_v11 = vpop.f32.mrf.mxu0 }
 0x131   : > { %v1207_v44 = vadd.f32 %v1206_v25, %v1205_v14  ;;  %v1381_v46 = vrot.slane %v1380_v27, 1  ;;  %v1547_v41 = vrot.slane %v1546_v32, 1  ;;  %v1572_v60 = vmin.f32 %v1570_v57, %v1571_v42  ;;  %v3538_v57 = vpop.f32.mrf.mxu1 }
 0x132   : > { %v979_v21 = vadd.f32 %v978_v31, %v977_v19  ;;  %v1004_v59 = vrot.slane %v1003_v33, 1  ;;  %v1233_v63 = vadd.f32 %v1232_v48, %v1231_v28  ;;  %v1407_v0 = vrot.slane %v1406_v50, 1 }
 0x133   : > { %v1208_v35 = vrot.slane %v1207_v44, 1  ;;  %v1382_v62 = vmax.f32 %v1380_v27, %v1381_v46  ;;  %v1561_v2 = vmin.f32 %v3443_v34, %v1560_v54  ;;  %v1548_v4 = vmin.f32 %v1546_v32, %v1547_v41 }
 0x134   : > { %v1005_v5 = vadd.f32 %v1004_v59, %v1003_v33  ;;  %v1573_v6 = vrot.slane %v1572_v60, 1  ;;  %v1066_v37 = vcombine.low %v3454_v49, %v979_v21  ;;  %v1234_v7 = vrot.slane %v1233_v63, 1 }
 0x135   : > { %v1209_v47 = vadd.f32 %v1208_v35, %v1207_v44  ;;  %v1408_v40 = vmax.f32 %v1406_v50, %v1407_v0  ;;  %v1469_v9 = vcombine.low %v3456_v51, %v1382_v62  ;;  %v1635_v10 = vcombine.low %v3460_v53, %v1548_v4  ;;  %v3558_v44 = vpop.f32.mrf.mxu0 }
 0x136   : > { %v1067_v12 = vcombine.low %v3462_v55, %v1005_v5  ;;  %v1574_v14 = vmin.f32 %v1572_v60, %v1573_v6  ;;  %v1222_v34 = vadd.f32 %v1221_v20, %v3451_v45  ;;  %v1235_v16 = vadd.f32 %v1234_v7, %v1233_v63  ;;  %v934_v60 = vpop.f32.mrf.mxu1 }
 0x137   : > { %v1296_v54 = vcombine.low %v3476_v58, %v1209_v47  ;;  %v1470_v49 = vcombine.low %v3468_v23, %v1408_v40  ;;  %v3517_v51 = vrot.slane %v1066_v37, %v3400_v22  ;;  %v3520_v53 = vrot.slane %v1469_v9, %v3400_v22  ;;  %v863_v5 = vpop.f32.mrf.mxu0 }
 0x138   : > { %v1636_v17 = vcombine.low %v1561_v2, %v1574_v14  ;;  %v1297_v19 = vcombine.low %v1222_v34, %v1235_v16  ;;  %v3523_v55 = vrot.slane %v1635_v10, %v3400_v22  ;;  %v3526_v45 = vrot.slane %v1067_v12, %v3400_v22 }
 0x139   : > { %v3529_v20 = vrot.slane %v1296_v54, %v3400_v22  ;;  %v3532_v23 = vrot.slane %v1470_v49, %v3400_v22  ;;  %v1124_v58 = vmul.f32 %v3437_v3, %v3437_v3  ;;  %v1132_v24 = vmul.f32 %v3458_v52, %v3458_v52  ;;  %v3602_v49 = vpop.f32.mrf.mxu0 }
 0x13a   : > { %v3541_v25 = vrot.slane %v1636_v17, %v3400_v22  ;;  %v1126_v27 = vmul.f32 %v3439_v13, %v3439_v13  ;;  %v1125_v28 = vmul.f32 %v3441_v26, %v3441_v26  ;;  %v1127_v29 = vmul.f32 %v3445_v38, %v3445_v38 }
 0x13b   : > { %v3550_v31 = vrot.slane %v1297_v19, %v3400_v22  ;;  %v1006_v32 = vadd.f32 %v3458_v52, %v3437_v3  ;;  %v1409_v33 = vmax.f32 %v3437_v3, %v3458_v52  ;;  %v1575_v42 = vmin.f32 %v3437_v3, %v3458_v52 }
 0x13c   : > { %v1236_v46 = vadd.f32 %v1132_v24, %v1124_v58  ;;  %v1032_v48 = vadd.f32 %v3474_v56, %v3439_v13  ;;  %v1134_v50 = vmul.f32 %v3474_v56, %v3474_v56  ;;  %v1435_v21 = vmax.f32 %v3439_v13, %v3474_v56 }
 0x13d   : > { %v1601_v41 = vmin.f32 %v3439_v13, %v3474_v56  ;;  %v1019_v59 = vadd.f32 %v3487_v1, %v3441_v26  ;;  %v1133_v3 = vmul.f32 %v3487_v1, %v3487_v1  ;;  %v1422_v52 = vmax.f32 %v3441_v26, %v3487_v1 }
 0x13e   : > { %v1262_v35 = vadd.f32 %v1134_v50, %v1126_v27  ;;  %v1588_v62 = vmin.f32 %v3441_v26, %v3487_v1  ;;  %v1045_v63 = vadd.f32 %v3490_v8, %v3445_v38  ;;  %v1135_v13 = vmul.f32 %v3490_v8, %v3490_v8 }
 0x13f   : > { %v1249_v56 = vadd.f32 %v1133_v3, %v1125_v28  ;;  %v1448_v0 = vmax.f32 %v3445_v38, %v3490_v8  ;;  %v1614_v2 = vmin.f32 %v3445_v38, %v3490_v8  ;;  %v1007_v4 = vadd.f32 %v1006_v32, %v3492_v18  ;;  %v936_v8 = vpop.f32.mrf.mxu1 }
 0x140   : > { %v1275_v6 = vadd.f32 %v1135_v13, %v1127_v29  ;;  %v1140_v26 = vmul.f32 %v3492_v18, %v3492_v18  ;;  %v1410_v1 = vmax.f32 %v1409_v33, %v3492_v18  ;;  %v1576_v37 = vmin.f32 %v1575_v42, %v3492_v18 }
 0x141   : > { %v1033_v47 = vadd.f32 %v1032_v48, %v3494_v30  ;;  %v1142_v7 = vmul.f32 %v3494_v30, %v3494_v30  ;;  %v1436_v40 = vmax.f32 %v1435_v21, %v3494_v30  ;;  %v1602_v38 = vmin.f32 %v1601_v41, %v3494_v30  ;;  %v3611_v29 = vpop.f32.mrf.mxu1 }
 0x142   : > { %v1237_v9 = vadd.f32 %v1236_v46, %v1140_v26  ;;  %v1020_v10 = vadd.f32 %v1019_v59, %v3496_v61  ;;  %v1141_v12 = vmul.f32 %v3496_v61, %v3496_v61  ;;  %v1423_v14 = vmax.f32 %v1422_v52, %v3496_v61 }
 0x143   : > { %v1263_v34 = vadd.f32 %v1262_v35, %v1142_v7  ;;  %v1589_v18 = vmin.f32 %v1588_v62, %v3496_v61  ;;  %v1046_v54 = vadd.f32 %v1045_v63, %v3498_v36  ;;  %v1143_v16 = vmul.f32 %v3498_v36, %v3498_v36  ;;  %v3631_v13 = vpop.f32.mrf.mxu1 }
 0x144   : > { %v1250_v30 = vadd.f32 %v1249_v56, %v1141_v12  ;;  %v1449_v17 = vmax.f32 %v1448_v0, %v3498_v36  ;;  %v1615_v19 = vmin.f32 %v1614_v2, %v3498_v36  ;;  %v1008_v58 = vadd.f32 %v1007_v4, %v3502_v39 }
 0x145   : > { %v1276_v24 = vadd.f32 %v1275_v6, %v1143_v16  ;;  %v1148_v27 = vmul.f32 %v3502_v39, %v3502_v39  ;;  %v1411_v61 = vmax.f32 %v1410_v1, %v3502_v39  ;;  %v1577_v28 = vmin.f32 %v1576_v37, %v3502_v39  ;;  %v3622_v39 = vpop.f32.mrf.mxu0 }
 0x146   : > { %v1034_v32 = vadd.f32 %v1033_v47, %v3512_v43  ;;  %v1150_v33 = vmul.f32 %v3512_v43, %v3512_v43  ;;  %v1437_v42 = vmax.f32 %v1436_v40, %v3512_v43  ;;  %v1603_v36 = vmin.f32 %v1602_v38, %v3512_v43 }
 0x147   : > { %v1238_v46 = vadd.f32 %v1237_v9, %v1148_v27  ;;  %v1021_v48 = vadd.f32 %v1020_v10, %v3514_v11  ;;  %v1149_v50 = vmul.f32 %v3514_v11, %v3514_v11  ;;  %v1424_v21 = vmax.f32 %v1423_v14, %v3514_v11  ;;  %v871_v37 = vpop.f32.mrf.mxu0  ;;  %v944_v14 = vpop.f32.mrf.mxu1 }
 0x148   : > { %v1264_v41 = vadd.f32 %v1263_v34, %v1150_v33  ;;  %v1590_v59 = vmin.f32 %v1589_v18, %v3514_v11  ;;  %v1047_v3 = vadd.f32 %v1046_v54, %v3538_v57  ;;  %v1151_v52 = vmul.f32 %v3538_v57, %v3538_v57 }
 0x149   : > { %v1251_v35 = vadd.f32 %v1250_v30, %v1149_v50  ;;  %v1450_v43 = vmax.f32 %v1449_v17, %v3538_v57  ;;  %v1616_v62 = vmin.f32 %v1615_v19, %v3538_v57  ;;  %v1009_v63 = vadd.f32 %v1008_v58, %v3558_v44 }
 0x14a   : > { %v1277_v56 = vadd.f32 %v1276_v24, %v1151_v52  ;;  %v1156_v0 = vmul.f32 %v3558_v44, %v3558_v44  ;;  %v1412_v11 = vmax.f32 %v1411_v61, %v3558_v44  ;;  %v1578_v2 = vmin.f32 %v1577_v28, %v3558_v44 }
 0x14b   : > { %v1035_v4 = vadd.f32 %v1034_v32, %v934_v60  ;;  %v1158_v6 = vmul.f32 %v934_v60, %v934_v60  ;;  %v1438_v26 = vmax.f32 %v1437_v42, %v934_v60  ;;  %v1604_v1 = vmin.f32 %v1603_v36, %v934_v60  ;;  %v3664_v32 = vpop.f32.mrf.mxu1 }
 0x14c   : > { %v1239_v47 = vadd.f32 %v1238_v46, %v1156_v0  ;;  %v1022_v7 = vadd.f32 %v1021_v48, %v863_v5  ;;  %v1157_v57 = vmul.f32 %v863_v5, %v863_v5  ;;  %v3637_v40 = vmax.f32 %v1424_v21, %v863_v5 }
 0x14d   : > { %v1265_v38 = vadd.f32 %v1264_v41, %v1158_v6  ;;  %v3639_v9 = vmin.f32 %v1590_v59, %v863_v5  ;;  %v1048_v10 = vadd.f32 %v1047_v3, %v936_v8  ;;  %v1159_v12 = vmul.f32 %v936_v8, %v936_v8  ;;  %v3650_v5 = vpop.f32.mrf.mxu0  ;;  %v948_v0 = vpop.f32.mrf.mxu1 }
 0x14e   : > { %v1252_v34 = vadd.f32 %v1251_v35, %v1157_v57  ;;  %v3641_v18 = vmax.f32 %v1450_v43, %v936_v8  ;;  %v3643_v44 = vmin.f32 %v1616_v62, %v936_v8  ;;  %v1010_v54 = vadd.f32 %v1009_v63, %v3602_v49 }
 0x14f   : > { %v1278_v60 = vadd.f32 %v1277_v56, %v1159_v12  ;;  %v1164_v16 = vmul.f32 %v3602_v49, %v3602_v49  ;;  %v1413_v30 = vmax.f32 %v1412_v11, %v3602_v49  ;;  %v1579_v17 = vmin.f32 %v1578_v2, %v3602_v49  ;;  %v875_v41 = vpop.f32.mrf.mxu0 }
 0x150   : > { %v1036_v19 = vadd.f32 %v1035_v4, %v3611_v29  ;;  %v1166_v58 = vmul.f32 %v3611_v29, %v3611_v29  ;;  %v1439_v8 = vmax.f32 %v1438_v26, %v3611_v29  ;;  %v1605_v24 = vmin.f32 %v1604_v1, %v3611_v29 }
 0x151   : > { %v1240_v27 = vadd.f32 %v1239_v47, %v1164_v16  ;;  %v3658_v61 = vadd.f32 %v1022_v7, %v3622_v39  ;;  %v1165_v28 = vmul.f32 %v3622_v39, %v3622_v39  ;;  %v1426_v49 = vmax.f32 %v3637_v40, %v3622_v39 }
 0x152   : > { %v1266_v33 = vadd.f32 %v1265_v38, %v1166_v58  ;;  %v1592_v42 = vmin.f32 %v3639_v9, %v3622_v39  ;;  %v3669_v36 = vadd.f32 %v1048_v10, %v3631_v13  ;;  %v1167_v29 = vmul.f32 %v3631_v13, %v3631_v13 }
 0x153   : > { %v3673_v46 = vadd.f32 %v1252_v34, %v1165_v28  ;;  %v1452_v48 = vmax.f32 %v3641_v18, %v3631_v13  ;;  %v1618_v50 = vmin.f32 %v3643_v44, %v3631_v13  ;;  %v1011_v21 = vadd.f32 %v1010_v54, %v871_v37 }
 0x154   : > { %v3679_v59 = vadd.f32 %v1278_v60, %v1167_v29  ;;  %v1172_v3 = vmul.f32 %v871_v37, %v871_v37  ;;  %v1414_v52 = vmax.f32 %v1413_v30, %v871_v37  ;;  %v1580_v35 = vmin.f32 %v1579_v17, %v871_v37 }
 0x155   : > { %v1037_v43 = vadd.f32 %v1036_v19, %v944_v14  ;;  %v1174_v62 = vmul.f32 %v944_v14, %v944_v14  ;;  %v1440_v63 = vmax.f32 %v1439_v8, %v944_v14  ;;  %v1606_v56 = vmin.f32 %v1605_v24, %v944_v14 }
 0x156   : > { %v1241_v11 = vadd.f32 %v1240_v27, %v1172_v3  ;;  %v3683_v2 = vmul.f32 %v3650_v5, %v3650_v5  ;;  %v3687_v4 = vmul.f32 %v3664_v32, %v3664_v32  ;;  %v1012_v6 = vadd.f32 %v1011_v21, %v875_v41 }
 0x157   : > { %v1267_v26 = vadd.f32 %v1266_v33, %v1174_v62  ;;  %v1180_v1 = vmul.f32 %v875_v41, %v875_v41  ;;  %v1415_v47 = vmax.f32 %v1414_v52, %v875_v41  ;;  %v1581_v7 = vmin.f32 %v1580_v35, %v875_v41 }
 0x158   : > { %v1013_v37 = vrot.slane %v1012_v6, 4  ;;  %v1038_v57 = vadd.f32 %v1037_v43, %v948_v0  ;;  %v1182_v38 = vmul.f32 %v948_v0, %v948_v0  ;;  %v1441_v10 = vmax.f32 %v1440_v63, %v948_v0 }
 0x159   : > { %v1242_v12 = vadd.f32 %v1241_v11, %v1180_v1  ;;  %v1416_v14 = vrot.slane %v1415_v47, 4  ;;  %v1582_v34 = vrot.slane %v1581_v7, 4  ;;  %v1607_v54 = vmin.f32 %v1606_v56, %v948_v0 }
 0x15a   : > { %v1014_v60 = vadd.f32 %v1013_v37, %v1012_v6  ;;  %v1039_v16 = vrot.slane %v1038_v57, 4  ;;  %v1268_v30 = vadd.f32 %v1267_v26, %v1182_v38  ;;  %v1442_v17 = vrot.slane %v1441_v10, 4 }
 0x15b   : > { %v1243_v19 = vrot.slane %v1242_v12, 4  ;;  %v1417_v58 = vmax.f32 %v1415_v47, %v1416_v14  ;;  %v1583_v8 = vmin.f32 %v1581_v7, %v1582_v34  ;;  %v1608_v24 = vrot.slane %v1607_v54, 4 }
 0x15c   : > { %v1015_v27 = vrot.slane %v1014_v60, 2  ;;  %v1040_v28 = vadd.f32 %v1039_v16, %v1038_v57  ;;  %v1269_v33 = vrot.slane %v1268_v30, 4  ;;  %v1443_v29 = vmax.f32 %v1441_v10, %v1442_v17 }
 0x15d   : > { %v1244_v21 = vadd.f32 %v1243_v19, %v1242_v12  ;;  %v1418_v41 = vrot.slane %v1417_v58, 2  ;;  %v1584_v3 = vrot.slane %v1583_v8, 2  ;;  %v1609_v52 = vmin.f32 %v1607_v54, %v1608_v24 }
 0x15e   : > { %v1016_v35 = vadd.f32 %v1015_v27, %v1014_v60  ;;  %v1041_v43 = vrot.slane %v1040_v28, 2  ;;  %v1270_v62 = vadd.f32 %v1269_v33, %v1268_v30  ;;  %v1444_v63 = vrot.slane %v1443_v29, 2  ;;  %v877_v60 = vpop.f32.mrf.mxu0 }
 0x15f   : > { %v1245_v56 = vrot.slane %v1244_v21, 2  ;;  %v1419_v0 = vmax.f32 %v1417_v58, %v1418_v41  ;;  %v1585_v11 = vmin.f32 %v1583_v8, %v1584_v3  ;;  %v1610_v6 = vrot.slane %v1609_v52, 2 }
 0x160   : > { %v1017_v26 = vrot.slane %v1016_v35, 1  ;;  %v1042_v1 = vadd.f32 %v1041_v43, %v1040_v28  ;;  %v1271_v47 = vrot.slane %v1270_v62, 2  ;;  %v1445_v7 = vmax.f32 %v1443_v29, %v1444_v63  ;;  %v950_v28 = vpop.f32.mrf.mxu1 }
 0x161   : > { %v1246_v37 = vadd.f32 %v1245_v56, %v1244_v21  ;;  %v1420_v57 = vrot.slane %v1419_v0, 1  ;;  %v1586_v38 = vrot.slane %v1585_v11, 1  ;;  %v1611_v10 = vmin.f32 %v1609_v52, %v1610_v6 }
 0x162   : > { %v3689_v12 = vadd.f32 %v1017_v26, %v1016_v35  ;;  %v1043_v14 = vrot.slane %v1042_v1, 1  ;;  %v1272_v34 = vadd.f32 %v1271_v47, %v1270_v62  ;;  %v1446_v54 = vrot.slane %v1445_v7, 1 }
 0x163   : > { %v1247_v16 = vrot.slane %v1246_v37, 1  ;;  %v3691_v30 = vmax.f32 %v1419_v0, %v1420_v57  ;;  %v3693_v17 = vmin.f32 %v1585_v11, %v1586_v38  ;;  %v1612_v19 = vrot.slane %v1611_v10, 1 }
 0x164   : > { %v3695_v58 = vadd.f32 %v1043_v14, %v1042_v1  ;;  %v1273_v8 = vrot.slane %v1272_v34, 1  ;;  %v3697_v24 = vmax.f32 %v1445_v7, %v1446_v54  ;;  %v1024_v27 = vadd.f32 %v3658_v61, %v3650_v5 }
 0x165   : > { %v3701_v33 = vadd.f32 %v1247_v16, %v1246_v37  ;;  %v3703_v29 = vmin.f32 %v1611_v10, %v1612_v19  ;;  %v1181_v21 = vmul.f32 %v877_v60, %v877_v60  ;;  %v1254_v41 = vadd.f32 %v3673_v46, %v3683_v2 }
 0x166   : > { %v3707_v3 = vadd.f32 %v1273_v8, %v1272_v34  ;;  %v1025_v52 = vadd.f32 %v1024_v27, %v877_v60  ;;  %v1427_v35 = vmax.f32 %v1426_v49, %v3650_v5  ;;  %v1593_v61 = vmin.f32 %v1592_v42, %v3650_v5 }
 0x167   : > { %v1255_v43 = vadd.f32 %v1254_v41, %v1181_v21  ;;  %v1050_v62 = vadd.f32 %v3669_v36, %v3664_v32  ;;  %v1183_v63 = vmul.f32 %v950_v28, %v950_v28  ;;  %v1280_v46 = vadd.f32 %v3679_v59, %v3687_v4 }
 0x168   : > { %v1026_v2 = vrot.slane %v1025_v52, 4  ;;  %v1428_v56 = vmax.f32 %v1427_v35, %v877_v60  ;;  %v1594_v0 = vmin.f32 %v1593_v61, %v877_v60  ;;  %v1453_v40 = vmax.f32 %v1452_v48, %v3664_v32 }
 0x169   : > { %v1256_v49 = vrot.slane %v1255_v43, 4  ;;  %v1051_v11 = vadd.f32 %v1050_v62, %v950_v28  ;;  %v1281_v39 = vadd.f32 %v1280_v46, %v1183_v63  ;;  %v1619_v9 = vmin.f32 %v1618_v50, %v3664_v32 }
 0x16a   : > { %v1027_v5 = vadd.f32 %v1026_v2, %v1025_v52  ;;  %v1429_v42 = vrot.slane %v1428_v56, 4  ;;  %v1595_v36 = vrot.slane %v1594_v0, 4  ;;  %v1454_v59 = vmax.f32 %v1453_v40, %v950_v28 }
 0x16b   : > { %v1257_v4 = vadd.f32 %v1256_v49, %v1255_v43  ;;  %v1052_v6 = vrot.slane %v1051_v11, 4  ;;  %v1282_v26 = vrot.slane %v1281_v39, 4  ;;  %v1620_v1 = vmin.f32 %v1619_v9, %v950_v28 }
 0x16c   : > { %v1028_v47 = vrot.slane %v1027_v5, 2  ;;  %v1430_v7 = vmax.f32 %v1428_v56, %v1429_v42  ;;  %v1596_v18 = vmin.f32 %v1594_v0, %v1595_v36  ;;  %v1455_v48 = vrot.slane %v1454_v59, 4 }
 0x16d   : > { %v1258_v37 = vrot.slane %v1257_v4, 2  ;;  %v1053_v57 = vadd.f32 %v1052_v6, %v1051_v11  ;;  %v1283_v38 = vadd.f32 %v1282_v26, %v1281_v39  ;;  %v1621_v10 = vrot.slane %v1620_v1, 4 }
 0x16e   : > { %v1029_v14 = vadd.f32 %v1028_v47, %v1027_v5  ;;  %v1431_v34 = vrot.slane %v1430_v7, 2  ;;  %v1597_v13 = vrot.slane %v1596_v18, 2  ;;  %v1456_v44 = vmax.f32 %v1454_v59, %v1455_v48 }
 0x16f   : > { %v1259_v32 = vadd.f32 %v1258_v37, %v1257_v4  ;;  %v1054_v50 = vrot.slane %v1053_v57, 2  ;;  %v1284_v54 = vrot.slane %v1283_v38, 2  ;;  %v1622_v60 = vmin.f32 %v1620_v1, %v1621_v10 }
 0x170   : > { %v1030_v16 = vrot.slane %v1029_v14, 1  ;;  %v1432_v19 = vmax.f32 %v1430_v7, %v1431_v34  ;;  %v1598_v8 = vmin.f32 %v1596_v18, %v1597_v13  ;;  %v1457_v27 = vrot.slane %v1456_v44, 2  ;;  %v953_v34 = vld [vmem:[#allocation2] ss:$2 sm:$0xff] }
 0x171   : > { %v1260_v28 = vrot.slane %v1259_v32, 1  ;;  %v1055_v21 = vadd.f32 %v1054_v50, %v1053_v57  ;;  %v1285_v41 = vadd.f32 %v1284_v54, %v1283_v38  ;;  %v1623_v52 = vrot.slane %v1622_v60, 2  ;;  %v1356_v50 = vld [vmem:[%s1355_s25] ss:$2 sm:$0xff] }
 0x172   : > { %v1031_v35 = vadd.f32 %v1030_v16, %v1029_v14  ;;  %v1433_v61 = vrot.slane %v1432_v19, 1  ;;  %v1599_v43 = vrot.slane %v1598_v8, 1  ;;  %v1458_v62 = vmax.f32 %v1456_v44, %v1457_v27  ;;  %v1522_v16 = vld [vmem:[%s1521_s26] ss:$2 sm:$0xff] }
 0x173   : > { %v1261_v63 = vadd.f32 %v1260_v28, %v1259_v32  ;;  %v1056_v46 = vrot.slane %v1055_v21, 1  ;;  %v1286_v2 = vrot.slane %v1285_v41, 1  ;;  %v1624_v56 = vmin.f32 %v1622_v60, %v1623_v52  ;;  %v2987_v52 = vld [vmem:[%s4098_s3 + $0x38] sm:$0xff] (%p1687_p6)  }
 0x174   : > { %v1068_v0 = vcombine.low %v3689_v12, %v1031_v35  ;;  %v1434_v40 = vmax.f32 %v1432_v19, %v1433_v61  ;;  %v1600_v49 = vmin.f32 %v1598_v8, %v1599_v43  ;;  %v1459_v11 = vrot.slane %v1458_v62, 1  ;;  %v2988_v35 = vld [vmem:[%s4098_s3 + $0xb8] sm:$0xff] (%p1687_p6)   ;;  %v2989_v61 = vld [vmem:[%s4098_s3 + $0x70] sm:$0xff] (%p1687_p6)  }
 0x175   : > { %v1298_v39 = vcombine.low %v3701_v33, %v1261_v63  ;;  %v1057_v9 = vadd.f32 %v1056_v46, %v1055_v21  ;;  %v1287_v5 = vadd.f32 %v1286_v2, %v1285_v41  ;;  %v1625_v42 = vrot.slane %v1624_v56, 1  ;;  %v2985_v41 = vld [vmem:[%s4098_s3 + $0x78] sm:$0xff] (%p1687_p6)   ;;  %v2990_v43 = vld [vmem:[%s4098_s3 + $0xf0] sm:$0xff] (%p1687_p6)   ;;  %v2993_v46 = vld [vmem:[%s4098_s3 + $0x68] sm:$0xff] (%p1687_p6)  }
 0x176   : > { %v1090_v36 = vrot.slane %v1068_v0, %v3400_v22  ;;  %v1471_v59 = vcombine.low %v3691_v30, %v1434_v40  ;;  %v1637_v4 = vcombine.low %v3693_v17, %v1600_v49  ;;  %v1460_v6 = vmax.f32 %v1458_v62, %v1459_v11  ;;  %2855 = vmatprep.subr.bf16.mxu0 (%p1687_p6), %v2985_v41  ;;  %v2991_v62 = vld [vmem:[%s4098_s3 + $0x30] sm:$0xff] (%p1687_p6)   ;;  %v2994_v2 = vld [vmem:[%s4098_s3 + $0xe8] sm:$0xff] (%p1687_p6)   ;;  %v2997_v40 = vld [vmem:[%s4098_s3 + $0x60] sm:$0xff] (%p1687_p6)  }
 0x177   : > { %v1320_v26 = vrot.slane %v1298_v39, %v3400_v22  ;;  %v1069_v12 = vcombine.low %v3695_v58, %v1057_v9  ;;  %v1299_v1 = vcombine.low %v3707_v3, %v1287_v5  ;;  %v1626_v47 = vmin.f32 %v1624_v56, %v1625_v42  ;;  %2856 = vmatpush3.bf16.msra.mxu0 (%p1687_p6), %v2987_v52  ;;  %v2992_v63 = vld [vmem:[%s4098_s3 + $0xb0] sm:$0xff] (%p1687_p6)   ;;  %v2995_v56 = vld [vmem:[%s4098_s3 + $0x28] sm:$0xff] (%p1687_p6)   ;;  %v2998_v49 = vld [vmem:[%s4098_s3 + $0xe0] sm:$0xff] (%p1687_p6)  }
 0x178   : > { %v1098_v33 = vcombine.low %v3517_v51, %v3526_v45  ;;  %v1328_v7 = vcombine.low %v3529_v20, %v3550_v31  ;;  %v1493_v30 = vrot.slane %v1471_v59, %v3400_v22  ;;  %v1472_v17 = vcombine.low %v3697_v24, %v1460_v6  ;;  %2857 = vmatprep.subr.bf16.mxu0 (%p1687_p6), %v2989_v61  ;;  %v2996_v0 = vld [vmem:[%s4098_s3 + $0xa8] sm:$0xff] (%p1687_p6)   ;;  %v2999_v11 = vld [vmem:[%s4098_s3 + $0x20] sm:$0xff] (%p1687_p6)   ;;  %v3001_v9 = vld [vmem:[%s4098_s3 + $0x58] sm:$0xff] (%p1687_p6)  }
 0x179   : > { %v1659_v18 = vrot.slane %v1637_v4, %v3400_v22  ;;  %v1097_v48 = vrot.slane %v1069_v12, %v3400_v22  ;;  %v1327_v37 = vrot.slane %v1299_v1, %v3400_v22  ;;  %v1638_v58 = vcombine.low %v3703_v29, %v1626_v47  ;;  %v3000_v39 = vld [vmem:[%s4098_s3 + $0xa0] sm:$0xff] (%p1687_p6)   ;;  %v3002_v5 = vld [vmem:[%s4098_s3 + $0xd8] sm:$0xff] (%p1687_p6)   ;;  %v3005_v59 = vld [vmem:[%s4098_s3 + $0x50] sm:$0xff] (%p1687_p6)  }
 0x17a   : > { %v1501_v51 = vcombine.low %v3520_v53, %v3532_v23  ;;  %v1500_v45 = vrot.slane %v1472_v17, %v3400_v22  ;;  %v1667_v20 = vcombine.low %v3523_v55, %v3541_v25  ;;  %v1106_v57 = vrot.slane %v1098_v33, %v3400_v22  ;;  %v1119_v55 = vld [vmem:[#allocation2 + $0x1] ss:$2 sm:$0xff]  ;;  %v3003_v42 = vld [vmem:[%s4098_s3 + $0x18] sm:$0xff] (%p1687_p6)   ;;  %v3006_v4 = vld [vmem:[%s4098_s3 + $0xd0] sm:$0xff] (%p1687_p6)  }
 0x17b   : > { %v1099_v31 = vcombine.low %v1090_v36, %v1097_v48  ;;  %v1329_v24 = vcombine.low %v1320_v26, %v1327_v37  ;;  %v1666_v3 = vrot.slane %v1638_v58, %v3400_v22  ;;  %v1336_v10 = vrot.slane %v1328_v7, %v3400_v22  ;;  %2858 = vmatpush3.bf16.msra.mxu0 (%p1687_p6), %v2991_v62  ;;  %v3004_v36 = vld [vmem:[%s4098_s3 + $0x98] sm:$0xff] (%p1687_p6)   ;;  %v3007_v6 = vld [vmem:[%s4098_s3 + $0x10] sm:$0xff] (%p1687_p6)   ;;  %v3009_v12 = vld [vmem:[%s4098_s3 + $0x48] sm:$0xff] (%p1687_p6)  }
 0x17c   : > { %v1502_v38 = vcombine.low %v1493_v30, %v1500_v45  ;;  %v1509_v14 = vrot.slane %v1501_v51, %v3400_v22  ;;  %v1675_v13 = vrot.slane %v1667_v20, %v3400_v22  ;;  %2859 = vmatprep.subr.bf16.mxu0 (%p1687_p6), %v2993_v46  ;;  %v3008_v26 = vld [vmem:[%s4098_s3 + $0x90] sm:$0xff] (%p1687_p6)   ;;  %v3010_v1 = vld [vmem:[%s4098_s3 + $0xc8] sm:$0xff] (%p1687_p6)   ;;  %v3013_v7 = vld [vmem:[%s4098_s3 + $0x40] sm:$0xff] (%p1687_p6)  }
 0x17d   : > { %v1113_v29 = vrot.slane %v1099_v31, %v3400_v22  ;;  %v1343_v53 = vrot.slane %v1329_v24, %v3400_v22  ;;  %v1668_v23 = vcombine.low %v1659_v18, %v1666_v3  ;;  %v3011_v47 = vld [vmem:[%s4098_s3 + $0x8] sm:$0xff] (%p1687_p6)   ;;  %v3014_v30 = vld [vmem:[%s4098_s3 + $0xc0] sm:$0xff] (%p1687_p6)   ;;  %v3019_v20 = vld [vmem:[%s4098_s3 + $0x178] sm:$0xff] (%p1687_p6)  }
 0x17e   : > { %v1516_v25 = vrot.slane %v1502_v38, %v3400_v22  ;;  %v3012_v33 = vld [vmem:[%s4098_s3 + $0x88] sm:$0xff] (%p1687_p6)   ;;  %v3015_v17 = vld [vmem:[%s4098_s3] sm:$0xff] (%p1687_p6)   ;;  %v3020_v31 = vld [vmem:[%s4098_s3 + $0x1f8] sm:$0xff] (%p1687_p6)   ;;  %v3112_v38 = vmov (%p1687_p6), 1983009808  }
 0x17f   : > { %v1114_v44 = vcombine.low %v1106_v57, %v1113_v29  ;;  %v1344_v32 = vcombine.low %v1336_v10, %v1343_v53  ;;  %v1682_v54 = vrot.slane %v1668_v23, %v3400_v22  ;;  %v2986_v22 = vld [vmem:[%s4098_s3 + $0xf8] sm:$0xff] (%p1687_p6)   ;;  %2860 = vmatpush3.bf16.msra.mxu0 (%p1687_p6), %v2995_v56  ;;  %v3016_v18 = vld [vmem:[%s4098_s3 + $0x80] sm:$0xff] (%p1687_p6)   ;;  %v1757_v10 = vunpack.c.l.s4 (%p1687_p6), %v3112_v38 }
 0x180   : > { %v1517_v60 = vcombine.low %v1509_v14, %v1516_v25  ;;  %2877 = vmatprep.subr.bf16.mxu1 (%p1687_p6), %v2986_v22  ;;  %2861 = vmatprep.subr.bf16.mxu0 (%p1687_p6), %v2997_v40  ;;  %v1699_v25 = vld [vmem:[%s4097_s2] ss:$2 sm:$0xff] (%p1687_p6)  ;;  %v2782_v41 = vld [vmem:[%s4097_s2 + $0x1] ss:$2 sm:$0xff] (%p1687_p6) }
 0x181   : > { %v1116_v19 = vadd.f32 %v1114_v44, %v953_v34  ;;  %v1346_v8 = vadd.f32 %v1344_v32, %v1119_v55  ;;  %v1683_v27 = vcombine.low %v1675_v13, %v1682_v54  ;;  %1691 = sbr.rel (!%p1687_p6) target bundleno = 670 (0x29e), region = 48  ;;  %2878 = vmatpush3.bf16.msra.mxu1 (%p1687_p6), %v2988_v35  ;;  %v1758_v29 = vunpack.c.0.s8 (%p1687_p6), %v1757_v10 }
 0x182   : > { %v1519_v28 = vmax.f32 %v1356_v50, %v1517_v60  ;;  %2879 = vmatprep.subr.bf16.mxu1 (%p1687_p6), %v2990_v43  ;;  %v1719_v44 = vsub.s32 (%p1687_p6), 1, %v3397_v15  ;;  %v1727_v50 = vsub.s32 (%p1687_p6), 3, %v3397_v15  ;;  %v3113_v43 = vmov (%p1687_p6), 0  }
 0x183   : > { %1117 = vst [vmem:[#allocation2] ss:$2 sm:$0xff] %v1116_v19  ;;  %1347 = vst [vmem:[#allocation2 + $0x1] ss:$2 sm:$0xff] %v1346_v8  ;;  %v1685_v21 = vmin.f32 %v1522_v16, %v1683_v27  ;;  %2862 = vmatpush3.bf16.msra.mxu0 (%p1687_p6), %v2999_v11  ;;  %v3872_v14 = vsub.s32 (%p1687_p6), %v1758_v29, %v3397_v15  ;;  %v1715_v19 = vsub.s32 (%p1687_p6), 0, %v3397_v15  ;;  %v1723_v8 = vsub.s32 (%p1687_p6), 2, %v3397_v15 }
 0x184   : > { %1520 = vst [vmem:[%s1355_s25] ss:$2 sm:$0xff] %v1519_v28  ;;  %2863 = vmatprep.subr.bf16.mxu0 (%p1687_p6), %v3001_v9  ;;  %v3888_v28 = vsub.s32 (%p1687_p6), 5, %v3397_v15 }
 0x185   : > { %1686 = vst [vmem:[%s1521_s26] ss:$2 sm:$0xff] %v1685_v21  ;;  %2880 = vmatpush3.bf16.msra.mxu1 (%p1687_p6), %v2992_v63  ;;  %v3891_v21 = vsub.s32 (%p1687_p6), 7, %v3397_v15 }
 0x186   : > { %2881 = vmatprep.subr.bf16.mxu1 %v2994_v2 }
 0x187   : > { %2864 = vmatpush3.bf16.msra.mxu0 %v3003_v42 }
 0x188   : > { %2865 = vmatprep.subr.bf16.mxu0 %v3005_v59 }
 0x189   : > { %2882 = vmatpush3.bf16.msra.mxu1 %v2996_v0 }
 0x18a   : > { %2883 = vmatprep.subr.bf16.mxu1 %v2998_v49  ;;  %v1692_v48 = vld [vmem:[#allocation2] ss:$2 sm:$0xff]  ;;  %v1694_v37 = vld [vmem:[#allocation2 + $0x1] ss:$2 sm:$0xff] }
 0x18b   : > { %2866 = vmatpush3.bf16.msra.mxu0 %v3007_v6  ;;  %v1693_v58 = vmul.f32 0.0078125, %v1692_v48  ;;  %v1695_v51 = vmul.f32 0.0078125, %v1694_v37  ;;  %v1708_v53 = vld [vmem:[#allocation3] sm:$0xff] }
 0x18c   : > { %2867 = vmatprep.subr.bf16.mxu0 %v3009_v12  ;;  %v1710_v23 = vld [vmem:[#allocation4] sm:$0xff]  ;;  %v1755_v34 = vcombine.high %v1708_v53, %v1708_v53  ;;  %v1762_v13 = vrot.slane %v1708_v53, %v3872_v14 }
 0x18d   : > { %2884 = vmatpush3.bf16.msra.mxu1 %v3000_v39  ;;  %v1696_v45 = vmul.f32 %v1693_v58, %v1693_v58  ;;  %v1799_v55 = vcombine.high %v1710_v23, %v1710_v23  ;;  %v1806_v32 = vrot.slane %v1710_v23, %v3872_v14 }
 0x18e   : > { %2885 = vmatprep.subr.bf16.mxu1 %v3002_v5  ;;  %v1769_v54 = vrot.slane %v1755_v34, %v3872_v14  ;;  %v1770_v22 = vcombine.high %v1762_v13, %v1762_v13 }
 0x18f   : > { %2868 = vmatpush3.bf16.msra.mxu0 %v3011_v47  ;;  %v1697_v24 = vsub.f32 %v1695_v51, %v1696_v45  ;;  %v1813_v16 = vrot.slane %v1799_v55, %v3872_v14  ;;  %v1814_v35 = vcombine.high %v1806_v32, %v1806_v32 }
 0x190   : > { %2869 = vmatprep.subr.bf16.mxu0 %v3013_v7  ;;  %v1771_v61 = vcombine.high %v1769_v54, %v1769_v54 }
 0x191   : > { %2886 = vmatpush3.bf16.msra.mxu1 %v3004_v36  ;;  %v1698_v3 = vmax.f32 %v1697_v24, 0.0  ;;  %v1815_v46 = vcombine.high %v1813_v16, %v1813_v16 }
 0x192   : > { %2887 = vmatprep.subr.bf16.mxu1 %v3006_v4 }
 0x193   : > { %2870 = vmatpush3.bf16.msra.mxu0 %v3015_v17  ;;  %v1700_v57 = vadd.f32 1e-05, %v1698_v3 }
 0x194   : > { %2899 = vmatprep.subr.bf16.mxu0 %v3019_v20 }
 0x195   : > { %2888 = vmatpush3.bf16.msra.mxu1 %v3008_v26  ;;  %3053 = vrsqrt.f32 %v1700_v57 }
 0x196   : > { %2889 = vmatprep.subr.bf16.mxu1 %v3010_v1 }
 0x199   : > { %2890 = vmatpush3.bf16.msra.mxu1 %v3012_v33 }
 0x19a   : > { %2891 = vmatprep.subr.bf16.mxu1 %v3014_v30  ;;  %v1709_v30 = vld [vmem:[#allocation3 + $0x8] sm:$0xff] }
 0x19b   : > { %v3919_v51 = vrot.slane %v1709_v30, %v3872_v14  ;;  %v1772_v23 = vcombine.high %v1709_v30, %v1709_v30 }
 0x19d   : > { %2892 = vmatpush3.bf16.msra.mxu1 %v3016_v18  ;;  %v1787_v10 = vcombine.high %v3919_v51, %v3919_v51 }
 0x19e   : > { %2921 = vmatprep.subr.bf16.mxu1 %v3020_v31 }
 0x1a2   : > { %v3054_v60 = vpop.eup %3053 }
 0x1a3   : > { %v3885_v27 = vmul.f32 %v3054_v60, %v1699_v25  ;;  %v3023_v60 = vld [vmem:[%s4098_s3 + $0x170] sm:$0xff]  }
 0x1a5   : > { %v1705_v52 = vmul.f32 %v3885_v27, %v1693_v58  ;;  %vm1707_vm0 = vcmp.ge.f32.partialorder %v3885_v27, 0.0  ;;  %v1857_v63 = vrot.slane %v3885_v27, %v1719_v44  ;;  %v1865_v2 = vrot.slane %v3885_v27, %v1727_v50  ;;  %v1711_v58 = vld [vmem:[#allocation4 + $0x8] sm:$0xff] }
 0x1a6   : > { %v3898_v62 = vsel %vm1707_vm0, 1, %v3113_v43  ;;  %v1853_v11 = vrot.slane %v3885_v27, %v1715_v19  ;;  %v1861_v9 = vrot.slane %v3885_v27, %v1723_v8  ;;  %v1873_v17 = vrot.slane %v3885_v27, %v3888_v28 }
 0x1a7   : > { %v3902_v56 = vsub.f32 %v2782_v41, %v1705_v52  ;;  %v1720_v0 = vrot.slane %v3898_v62, %v1719_v44  ;;  %v1728_v40 = vrot.slane %v3898_v62, %v1727_v50  ;;  %v1716_v49 = vrot.slane %v3898_v62, %v1715_v19  ;;  %v3024_v41 = vld [vmem:[%s4098_s3 + $0x1f0] sm:$0xff]  }
 0x1a8   : > { %v1724_v39 = vrot.slane %v3898_v62, %v1723_v8  ;;  %v1736_v5 = vrot.slane %v3898_v62, %v3888_v28  ;;  %v3926_v31 = vrot.slane %v1711_v58, %v3872_v14  ;;  %v1744_v24 = vrot.slane %v3898_v62, %v3891_v21 }
 0x1a9   : > { %vm1746_vm1 = vcmp.eq.s32.totalorder %v1720_v0, 1  ;;  %v1906_v42 = vrot.slane %v3902_v56, %v1719_v44  ;;  %vm1748_vm2 = vcmp.eq.s32.totalorder %v1728_v40, 1  ;;  %v1914_v36 = vrot.slane %v3902_v56, %v1727_v50  ;;  %v3021_v44 = vld [vmem:[%s4098_s3 + $0x138] sm:$0xff]  }
 0x1aa   : > { %v1842_v59 = vsel %vm1746_vm1, %v1770_v22, %v1814_v35  ;;  %v1844_v4 = vsel %vm1748_vm2, %v1771_v61, %v1815_v46  ;;  %vm1745_vm3 = vcmp.eq.s32.totalorder %v1716_v49, 1  ;;  %v1902_v6 = vrot.slane %v3902_v56, %v1715_v19  ;;  %v3025_v61 = vld [vmem:[%s4098_s3 + $0x130] sm:$0xff]   ;;  %v3028_v49 = vld [vmem:[%s4098_s3 + $0x1e8] sm:$0xff]  }
 0x1ab   : > { %v1891_v26 = vmul.f32 %v1857_v63, %v1842_v59  ;;  %v1893_v12 = vmul.f32 %v1865_v2, %v1844_v4  ;;  %v1841_v1 = vsel %vm1745_vm3, %v1762_v13, %v1806_v32  ;;  %vm1747_vm4 = vcmp.eq.s32.totalorder %v1724_v39, 1  ;;  %v3026_v46 = vld [vmem:[%s4098_s3 + $0x1b0] sm:$0xff]   ;;  %v3027_v2 = vld [vmem:[%s4098_s3 + $0x168] sm:$0xff]   ;;  %v3031_v59 = vld [vmem:[%s4098_s3 + $0x160] sm:$0xff]  }
 0x1ac   : > { %v1890_v47 = vmul.f32 %v1853_v11, %v1841_v1  ;;  %v1843_v33 = vsel %vm1747_vm4, %v1769_v54, %v1813_v16  ;;  %v1910_v7 = vrot.slane %v3902_v56, %v1723_v8  ;;  %vm3921_vm5 = vcmp.eq.s32.totalorder %v1736_v5, 1  ;;  %v3022_v54 = vld [vmem:[%s4098_s3 + $0x1b8] sm:$0xff]  }
 0x1ad   : > { %v1940_v18 = vadd.f32 %v1906_v42, %v1891_v26  ;;  %v1942_v48 = vadd.f32 %v1914_v36, %v1893_v12  ;;  %v1892_v37 = vmul.f32 %v1861_v9, %v1843_v33  ;;  %v1831_v53 = vcombine.high %v3926_v31, %v3926_v31  ;;  %v3029_v9 = vld [vmem:[%s4098_s3 + $0x128] sm:$0xff]   ;;  %v3033_v12 = vld [vmem:[%s4098_s3 + $0x120] sm:$0xff]   ;;  %v3035_v33 = vld [vmem:[%s4098_s3 + $0x158] sm:$0xff]  }
 0x1ae   : > { %v1939_v45 = vadd.f32 %v1902_v6, %v1890_v47  ;;  %v1816_v34 = vcombine.high %v1711_v58, %v1711_v58  ;;  %v1922_v32 = vrot.slane %v3902_v56, %v3888_v28  ;;  %v3948_v19 = vrot.slane %v1772_v23, %v3872_v14  ;;  %v3030_v36 = vld [vmem:[%s4098_s3 + $0x1a8] sm:$0xff]   ;;  %v3034_v47 = vld [vmem:[%s4098_s3 + $0x1a0] sm:$0xff]   ;;  %v3038_v58 = vld [vmem:[%s4098_s3 + $0x198] sm:$0xff]  }
 0x1af   : > { %v1948_v3 = vmax.f32 %v1940_v18, 0.0  ;;  %v1950_v57 = vmax.f32 %v1942_v48, 0.0  ;;  %v1941_v38 = vadd.f32 %v1910_v7, %v1892_v37  ;;  %v1846_v16 = vsel %vm3921_vm5, %v1787_v10, %v1831_v53  ;;  %v3037_v18 = vld [vmem:[%s4098_s3 + $0x118] sm:$0xff]   ;;  %v3043_v10 = vld [vmem:[%s4098_s3 + $0x148] sm:$0xff]  }
 0x1b0   : > { %v1947_v29 = vmax.f32 %v1939_v45, 0.0  ;;  %v3951_v8 = vrot.slane %v1816_v34, %v3872_v14  ;;  %v1895_v22 = vmul.f32 %v1873_v17, %v1846_v16  ;;  %vm1752_vm6 = vcmp.eq.s32.totalorder %v1744_v24, 1  ;;  %v3039_v45 = vld [vmem:[%s4098_s3 + $0x150] sm:$0xff]   ;;  %v3046_v34 = vld [vmem:[%s4098_s3 + $0x188] sm:$0xff]  }
 0x1b1   : > { %v1956_v55 = vpack.c.bf16 %v1948_v3, %v1948_v3  ;;  %v1958_v25 = vpack.c.bf16 %v1950_v57, %v1950_v57  ;;  %v1949_v13 = vmax.f32 %v1941_v38, 0.0  ;;  %v1881_v52 = vrot.slane %v3885_v27, %v3891_v21  ;;  %v3041_v24 = vld [vmem:[%s4098_s3 + $0x110] sm:$0xff]  }
 0x1b2   : > { %v1955_v50 = vpack.c.bf16 %v1947_v29, %v1947_v29  ;;  %v1788_v35 = vcombine.high %v3948_v19, %v3948_v19  ;;  %v1832_v14 = vcombine.high %v3951_v8, %v3951_v8  ;;  %v1944_v43 = vadd.f32 %v1922_v32, %v1895_v22  ;;  %v3042_v38 = vld [vmem:[%s4098_s3 + $0x190] sm:$0xff]   ;;  %v3044_v29 = vld [vmem:[%s4098_s3 + $0x1c8] sm:$0xff]  }
 0x1b3   : > { %2514 = vmatprep.mubr.bf16.mxu0 %v1956_v55  ;;  %2554 = vmatprep.mubr.bf16.mxu1 %v1958_v25  ;;  %v1957_v28 = vpack.c.bf16 %v1949_v13, %v1949_v13  ;;  %v1930_v63 = vrot.slane %v3902_v56, %v3891_v21  ;;  %v1731_v40 = vsub.s32 4, %v3397_v15  ;;  %v1739_v39 = vsub.s32 6, %v3397_v15  ;;  %v3032_v15 = vld [vmem:[%s4098_s3 + $0x1e0] sm:$0xff]  }
 0x1b4   : > { %2515 = vmatmul.mubr.bf16.vlgmr.msra.gmra.mxu0 %v1955_v50  ;;  %v1848_v0 = vsel %vm1752_vm6, %v1788_v35, %v1832_v14  ;;  %v1952_v11 = vmax.f32 %v1944_v43, 0.0  ;;  %v3047_v55 = vld [vmem:[%s4098_s3 + $0x140] sm:$0xff]  }
 0x1b5   : > { %2555 = vmatmul.mubr.bf16.vlgmr.msra.gmra.mxu1 %v1957_v28  ;;  %2900 = vmatpush3.bf16.msra.mxu0 %v3021_v44  ;;  %v1897_v21 = vmul.f32 %v1881_v52, %v1848_v0  ;;  %v1732_v4 = vrot.slane %v3898_v62, %v1731_v40  ;;  %v1740_v26 = vrot.slane %v3898_v62, %v1739_v39  ;;  %v3036_v62 = vld [vmem:[%s4098_s3 + $0x1d8] sm:$0xff]   ;;  %v3048_v25 = vld [vmem:[%s4098_s3 + $0x1c0] sm:$0xff]  }
 0x1b6   : > { %2922 = vmatpush3.bf16.msra.mxu1 %v3022_v54  ;;  %2901 = vmatprep.subr.bf16.mxu0 %v3023_v60  ;;  %v1960_v5 = vpack.c.bf16 %v1952_v11, %v1952_v11  ;;  %v1869_v17 = vrot.slane %v3885_v27, %v1731_v40  ;;  %v1877_v37 = vrot.slane %v3885_v27, %v1739_v39  ;;  %v3040_v27 = vld [vmem:[%s4098_s3 + $0x1d0] sm:$0xff]   ;;  %v3049_v44 = vld [vmem:[%s4098_s3 + $0x100] sm:$0xff]  }
 0x1b7   : > { %2923 = vmatprep.subr.bf16.mxu1 %v3024_v41  ;;  %v1946_v42 = vadd.f32 %v1930_v63, %v1897_v21  ;;  %vm4001_vm7 = vcmp.eq.s32.totalorder %v1732_v4, 1  ;;  %vm4008_vm8 = vcmp.eq.s32.totalorder %v1740_v26, 1  ;;  %v1926_v57 = vrot.slane %v3902_v56, %v1739_v39  ;;  %v3050_v50 = vld [vmem:[%s4098_s3 + $0x180] sm:$0xff]  }
 0x1b8   : > { %2594 = vmatprep.mubr.bf16.mxu0 %v1960_v5  ;;  %v1845_v48 = vsel %vm4001_vm7, %v3919_v51, %v3926_v31  ;;  %v1847_v20 = vsel %vm4008_vm8, %v3948_v19, %v3951_v8  ;;  %v1918_v31 = vrot.slane %v3902_v56, %v1731_v40  ;;  %v3045_v56 = vld [vmem:[%s4098_s3 + $0x108] sm:$0xff]  }
 0x1b9   : > { %2902 = vmatpush3.bf16.msra.mxu0 %v3025_v61  ;;  %v1954_v6 = vmax.f32 %v1946_v42, 0.0  ;;  %v1894_v51 = vmul.f32 %v1869_v17, %v1845_v48  ;;  %v1896_v3 = vmul.f32 %v1877_v37, %v1847_v20  ;;  %v2783_v61 = vld [vmem:[%s4099_s4] ss:$0 sm:$0xff] }
 0x1ba   : > { %2924 = vmatpush3.bf16.msra.mxu1 %v3026_v46  ;;  %2903 = vmatprep.subr.bf16.mxu0 %v3027_v2 }
 0x1bb   : > { %2925 = vmatprep.subr.bf16.mxu1 %v3028_v49  ;;  %v1962_v1 = vpack.c.bf16 %v1954_v6, %v1954_v6  ;;  %v1943_v53 = vadd.f32 %v1918_v31, %v1894_v51  ;;  %v1945_v23 = vadd.f32 %v1926_v57, %v1896_v3 }
 0x1bd   : > { %2904 = vmatpush3.bf16.msra.mxu0 %v3029_v9  ;;  %2634 = vmatprep.mubr.bf16.mxu1 %v1962_v1  ;;  %v1951_v13 = vmax.f32 %v1943_v53, 0.0  ;;  %v1953_v32 = vmax.f32 %v1945_v23, 0.0 }
 0x1be   : > { %2926 = vmatpush3.bf16.msra.mxu1 %v3030_v36  ;;  %2905 = vmatprep.subr.bf16.mxu0 %v3031_v59 }
 0x1bf   : > { %2927 = vmatprep.subr.bf16.mxu1 %v3032_v15  ;;  %v1959_v54 = vpack.c.bf16 %v1951_v13, %v1951_v13  ;;  %v1961_v60 = vpack.c.bf16 %v1953_v32, %v1953_v32 }
 0x1c1   : > { %2906 = vmatpush3.bf16.msra.mxu0 %v3033_v12 }
 0x1c2   : > { %2928 = vmatpush3.bf16.msra.mxu1 %v3034_v47  ;;  %2907 = vmatprep.subr.bf16.mxu0 %v3035_v33 }
 0x1c3   : > { %2929 = vmatprep.subr.bf16.mxu1 %v3036_v62 }
 0x1c5   : > { %2908 = vmatpush3.bf16.msra.mxu0 %v3037_v18 }
 0x1c6   : > { %2930 = vmatpush3.bf16.msra.mxu1 %v3038_v58  ;;  %2909 = vmatprep.subr.bf16.mxu0 %v3039_v45 }
 0x1c7   : > { %2931 = vmatprep.subr.bf16.mxu1 %v3040_v27 }
 0x1c9   : > { %2910 = vmatpush3.bf16.msra.mxu0 %v3041_v24 }
 0x1ca   : > { %2932 = vmatpush3.bf16.msra.mxu1 %v3042_v38  ;;  %2911 = vmatprep.subr.bf16.mxu0 %v3043_v10 }
 0x1cb   : > { %2933 = vmatprep.subr.bf16.mxu1 %v3044_v29 }
 0x1cd   : > { %2912 = vmatpush3.bf16.msra.mxu0 %v3045_v56 }
 0x1ce   : > { %2934 = vmatpush3.bf16.msra.mxu1 %v3046_v34  ;;  %2913 = vmatprep.subr.bf16.mxu0 %v3047_v55 }
 0x1cf   : > { %2935 = vmatprep.subr.bf16.mxu1 %v3048_v25 }
 0x1d1   : > { %2914 = vmatpush3.bf16.msra.mxu0 %v3049_v44 }
 0x1d2   : > { %2936 = vmatpush3.bf16.msra.mxu1 %v3050_v50 }
 0x1d4   : > { %2595 = vmatmul.mubr.bf16.vlgmr.msra.gmra.mxu0 %v1959_v54 }
 0x1d5   : > { %2635 = vmatmul.mubr.bf16.vlgmr.msra.gmra.mxu1 %v1961_v60 }
 0x274   : > { %v2871_v16 = vpop.f32.mrf.mxu0 }
 0x275   : > { %v2893_v19 = vpop.f32.mrf.mxu1 }
 0x276   : > { %v2872_v8 = vpop.f32.mrf.mxu0 }
 0x277   : > { %v2894_v28 = vpop.f32.mrf.mxu1  ;;  %v2873_v14 = vadd.f32 %v2872_v8, %v2871_v16 }
 0x278   : > { %v2874_v41 = vpop.f32.mrf.mxu0  ;;  %v2895_v46 = vadd.f32 %v2894_v28, %v2893_v19 }
 0x279   : > { %v2896_v22 = vpop.f32.mrf.mxu1  ;;  %v2517_v43 = vadd.f32 %v2873_v14, %v2783_v61 }
 0x27a   : > { %v2875_v52 = vpop.f32.mrf.mxu0 }
 0x27b   : > { %v2897_v35 = vpop.f32.mrf.mxu1  ;;  %v2557_v40 = vadd.f32 %v2895_v46, %v2517_v43 }
 0x294   : > { %v2915_v63 = vpop.f32.mrf.mxu0 }
 0x295   : > { %v2937_v2 = vpop.f32.mrf.mxu1 }
 0x296   : > { %v2916_v0 = vpop.f32.mrf.mxu0 }
 0x297   : > { %v2917_v49 = vadd.f32 %v2916_v0, %v2915_v63  ;;  %v2938_v11 = vpop.f32.mrf.mxu1 }
 0x298   : > { %v2918_v21 = vpop.f32.mrf.mxu0  ;;  %v2939_v9 = vadd.f32 %v2938_v11, %v2937_v2 }
 0x299   : > { %v2597_v39 = vadd.f32 %v2917_v49, %v2557_v40  ;;  %v2940_v5 = vpop.f32.mrf.mxu1 }
 0x29a   : > { %v2919_v42 = vpop.f32.mrf.mxu0 }
 0x29b   : > { %v2637_v36 = vadd.f32 %v2939_v9, %v2597_v39  ;;  %v2941_v59 = vpop.f32.mrf.mxu1 }
 0x29d   : > { %2642 = vst [vmem:[#allocation5] sm:$0x3] %v2637_v36 }
 0x29e PF: > { %p4071_p7 = scmp.eq.s32.totalorder %s2704_s21, 1  ;;  %s3114_s11 = smov [#allocation5]  }
 0x29f   : > { %s2650_s12 = sshll.u32 %s3114_s11, 4  ;;  %s2651_s12 = int_to_ptr.vmem [resolvable:$true] %s2650_s12 }
 0x2a0   : > { %s3055_s13 = scalar_lea.vmem %s2651_s12, 32  ;;  %p3062_p11 = scmp.lt.s32.totalorder %s2651_s12, %s2651_s12 }
 0x2a1   : > { %p3056_p8 = scmp.ne.s32.totalorder %s2651_s12, %s3055_s13  ;;  %p3063_p12 = scmp.lt.s32.totalorder %s3055_s13, %s3055_s13 }
 0x2a3   : > { %p3057_p9 = pnand %p3056_p8, %p4071_p7  ;;  %p3064_p13 = por %p3063_p12, %p3062_p11 }
 0x2a5   : > { %p3058_p10 = pneg %p3057_p9 }
 0x2a7   : > { %p3065_p0 = pnand %p3064_p13, %p3058_p10 }
 0x2a9   : > { %3068 = shalt.err (!%p3065_p0)
}
 0x2aa   : > { %2944 = dma.vmem_to_hbm [thread:$0]  (%p4071_p7), %s2651_s12, 32, %s4100_s5, [#allocation6]  }
 0x2ab   : > { %3092 = dma.done.wait (%p4071_p7), [#allocation6], 32  }
 0x2ac   : > { %3094 = vsyncadd (%p4071_p7), [#allocation6], 4294967264 }
 0x2ad PF: > { %s16_s20 = sadd.s32 1, %s3105_s20   ;;  %s4108_s18 = smov %s3101_s19 }
 0x2ae   : > { %p13_p1 = scmp.ge.s32.totalorder %s16_s20, 4   ;;  %s4109_s19 = smov %s4111_s22 }
 0x2b0   :  { %15 = sbr.rel (!%p13_p1) target bundleno = 2 (0x2), region = 79 }
 0x2b5   :  { %2663 = vsyncpa [#allocation6], 1 }
 0x2b6   :  { %2665 = vsyncpa [#allocation6 + $0x1], 1 }

</bundles_post_ra>
